<compile_context>
chip_gen: v5e
topology: v5e:2x2
jax: 0.10.0
libtpu: 0.0.40
codegen_flags: <defaults>
</compile_context>

<pallas_src>
import functools
import math

import jax
import jax.numpy as jnp
from jax.experimental import pallas as pl
from jax.experimental.pallas import tpu as pltpu


PATCH_LEN = 4
STRIDE = 2
HEAD_PAD = 128          # lane-dense padded width of the head output

# packed-vector table layout (rows of a [n_rows, 128] f32 array)
_ROWS_PER_LAYER = 10
_R_BQ, _R_BK, _R_BV, _R_BO = 0, 1, 2, 3
_R_B1, _R_B2 = 4, 5
_R_N1W, _R_N1B, _R_N2W, _R_N2B = 6, 7, 8, 9


def _vec_rows(e_layers):
    row_norm_w = e_layers * _ROWS_PER_LAYER
    row_norm_b = row_norm_w + 1
    row_head_b = row_norm_w + 2
    row_vemb = ((row_norm_w + 3 + 7) // 8) * 8          # 8-aligned 4-row block
    total = ((row_vemb + PATCH_LEN + 7) // 8) * 8
    return row_norm_w, row_norm_b, row_head_b, row_vemb, total


class Config:
    task_name = "long_term_forecast"
    seq_len = 16
    pred_len = 8
    enc_in = 4
    d_model = 32
    d_ff = 64
    n_heads = 4
    e_layers = 2
    dropout = 0.0            # eval mode: dropout is identity
    activation = "relu"
    factor = 1
    output_attention = False


# ---------------------------------------------------------------------------
# Parameter construction (ALL layout plumbing done once here, not per call)
# ---------------------------------------------------------------------------

def positional_embedding(max_len, d_model):
    position = jnp.arange(max_len, dtype=jnp.float32)[:, None]
    div_term = jnp.exp(
        jnp.arange(0, d_model, 2, dtype=jnp.float32) * (-math.log(10000.0) / d_model)
    )
    pe = jnp.zeros((max_len, d_model), dtype=jnp.float32)
    pe = pe.at[:, 0::2].set(jnp.sin(position * div_term))
    pe = pe.at[:, 1::2].set(jnp.cos(position * div_term))
    return pe


def init_params(cfg, key):
    D, F, E, H = cfg.d_model, cfg.d_ff, cfg.e_layers, cfg.n_heads
    dk = D // H
    L = (cfg.seq_len - PATCH_LEN) // STRIDE + 2
    head_nf = D * L
    scale = 1.0 / math.sqrt(dk)

    keys = jax.random.split(key, 8)

    def w(k, shape):
        return 0.02 * jax.random.normal(k, shape, dtype=jnp.float32)

    # Attention projections.  The 1/sqrt(d_k) softmax scale is folded into Wq
    # (and would be folded into bq; bq is zero-initialised here).
    Wq = w(keys[0], (E, D, D)) * scale
    Wk = w(keys[1], (E, D, D))
    Wv = w(keys[2], (E, D, D))
    Wo = w(keys[3], (E, D, D))
    w_attn = jnp.stack([Wq, Wk, Wv, Wo], axis=1).reshape(E * 4, D, D)

    w_ffn1 = w(keys[4], (E, D, F))
    w_ffn2 = w(keys[5], (E, F, D))

    value_emb_w = w(keys[6], (PATCH_LEN, D))     # Linear(patch_len, d_model, bias=False)

    # Head weight: PyTorch flatten order is feature = d*L + l.  Re-lay out to
    # [L, D, HEAD_PAD] so the kernel contracts per patch-position block and
    # never relayouts [M, D] -> [bn, L*D].
    head_w = w(keys[7], (head_nf, cfg.pred_len))
    head_w3 = head_w.reshape(D, L, cfg.pred_len).transpose(1, 0, 2)   # [L, D, pred]
    head_w3 = jnp.pad(head_w3, ((0, 0), (0, 0), (0, HEAD_PAD - cfg.pred_len)))

    # All small vectors (biases, LN affine params, head bias, value-emb weight)
    # packed into one lane-padded table -> one DMA instead of ~13.
    row_norm_w, row_norm_b, row_head_b, row_vemb, n_rows = _vec_rows(E)
    vecs = jnp.zeros((n_rows, HEAD_PAD), jnp.float32)
    for layer in range(E):
        r0 = layer * _ROWS_PER_LAYER
        # bq/bk/bv/bo/b1/b2 are zero-initialised -> rows stay zero
        vecs = vecs.at[r0 + _R_N1W, :D].set(1.0)
        vecs = vecs.at[r0 + _R_N2W, :D].set(1.0)
    vecs = vecs.at[row_norm_w, :D].set(1.0)
    # norm_b / head_b stay zero
    vecs = vecs.at[row_vemb:row_vemb + PATCH_LEN, :D].set(value_emb_w)

    return {
        "pos_emb": positional_embedding(L, D),   # [L, D]
        "w_attn": w_attn,                        # [E*4, D, D]  (Wq*s, Wk, Wv, Wo)
        "w_ffn1": w_ffn1,                        # [E, D, F]
        "w_ffn2": w_ffn2,                        # [E, F, D]
        "vecs": vecs,                            # [n_rows, 128]
        "head_w3": head_w3,                      # [L, D, 128]
    }


# ---------------------------------------------------------------------------
# One fused Pallas kernel: embedding + encoder (all layers) + final LN + head
# ---------------------------------------------------------------------------

def _fused_model_kernel(patches_ref, pos_ref, wattn_ref, w1_ref, w2_ref,
                        vecs_ref, headw_ref, out_ref, *,
                        bn, L, d_model, d_ff, n_heads, e_layers, activation,
                        row_norm_w, row_norm_b, row_head_b, row_vemb):
    f32 = jnp.float32
    D, F, H = d_model, d_ff, n_heads
    dk = D // H
    M = bn * L                                      # rows ordered (l, b)

    def vrow(r, width):
        return vecs_ref[r:r + 1, :width]            # [1, width]

    def layer_norm(x, g, b):
        mu = jnp.mean(x, axis=-1, keepdims=True)
        xc = x - mu
        var = jnp.mean(xc * xc, axis=-1, keepdims=True)
        return xc * jax.lax.rsqrt(var + 1e-5) * g + b

    # ---- constants built once (iota / VPU only) ------------------------
    # cross-series mask: rows i, j belong to the same series iff (i-j) % bn == 0
    ri = jax.lax.broadcasted_iota(jnp.int32, (M, M), 0)
    ci = jax.lax.broadcasted_iota(jnp.int32, (M, M), 1)
    diff = ri - ci
    if bn & (bn - 1) == 0:
        same = (diff & (bn - 1)) == 0
    else:
        same = (diff % bn) == 0
    att_bias = jnp.where(same, 0.0, -1e30).astype(f32)          # [M, M]

    lane = jax.lax.broadcasted_iota(jnp.int32, (1, D), 1)
    head_masks = [((lane >= h * dk) & (lane < (h + 1) * dk)).astype(f32)
                  for h in range(H)]                             # each [1, D]

    # ---- patch value-embedding + positional embedding ------------------
    vemb = vecs_ref[row_vemb:row_vemb + PATCH_LEN, :D]           # [patch_len, D]
    zf = jnp.dot(patches_ref[...], vemb, preferred_element_type=f32) + pos_ref[...]

    # ---- transformer encoder (unrolled; weights resident in VMEM) ------
    for layer in range(e_layers):
        r0 = layer * _ROWS_PER_LAYER
        wq = wattn_ref[4 * layer + 0]                # 1/sqrt(dk) folded in
        wk = wattn_ref[4 * layer + 1]
        wv = wattn_ref[4 * layer + 2]
        wo = wattn_ref[4 * layer + 3]

        q = jnp.dot(zf, wq, preferred_element_type=f32) + vrow(r0 + _R_BQ, D)
        k = jnp.dot(zf, wk, preferred_element_type=f32) + vrow(r0 + _R_BK, D)
        v = jnp.dot(zf, wv, preferred_element_type=f32) + vrow(r0 + _R_BV, D)

        attn_out = jnp.zeros((M, D), f32)
        for h in range(H):
            # Zeroing the other heads' K columns restricts the contraction to
            # this head's d_k slice — no per-head lane slicing needed.
            s = jax.lax.dot_general(q, k * head_masks[h],
                                    (((1,), (1,)), ((), ())),
                                    preferred_element_type=f32)        # [M, M]
            s = s + att_bias
            s = s - jnp.max(s, axis=-1, keepdims=True)
            e = jnp.exp(s)
            p = e * pl.reciprocal(jnp.sum(e, axis=-1, keepdims=True), approx=True)
            # Masked V drops this head's output into its own columns, so the
            # accumulation over heads IS the concat — no lane shuffles.
            attn_out = attn_out + jnp.dot(p, v * head_masks[h],
                                          preferred_element_type=f32)  # [M, D]

        o = jnp.dot(attn_out, wo, preferred_element_type=f32) + vrow(r0 + _R_BO, D)
        x1 = layer_norm(zf + o, vrow(r0 + _R_N1W, D), vrow(r0 + _R_N1B, D))

        y = jnp.dot(x1, w1_ref[layer], preferred_element_type=f32) + vrow(r0 + _R_B1, F)
        y = jnp.maximum(y, 0.0) if activation == "relu" else jax.nn.gelu(y)
        y = jnp.dot(y, w2_ref[layer], preferred_element_type=f32) + vrow(r0 + _R_B2, D)

        zf = layer_norm(x1 + y, vrow(r0 + _R_N2W, D), vrow(r0 + _R_N2B, D))

    # ---- final encoder LayerNorm ----------------------------------------
    zf = layer_norm(zf, vrow(row_norm_w, D), vrow(row_norm_b, D))

    # ---- flatten head, no [M,D] -> [bn, L*D] relayout --------------------
    acc = jnp.zeros((bn, HEAD_PAD), f32)
    for l in range(L):
        acc = acc + jnp.dot(zf[l * bn:(l + 1) * bn, :], headw_ref[l],
                            preferred_element_type=f32)
    out_ref[...] = acc + vecs_ref[row_head_b:row_head_b + 1, :]


def fused_forward_core(params, cfg, patches, pos_tiled, bn, L):
    """patches: [L*bn, PATCH_LEN] ((l, b)-ordered) -> padded head output [bn, 128]."""
    args = (patches, pos_tiled, params["w_attn"], params["w_ffn1"],
            params["w_ffn2"], params["vecs"], params["head_w3"])

    def fullspec(a):
        zeros = (0,) * a.ndim
        return pl.BlockSpec(a.shape, lambda i, z=zeros: z)

    row_norm_w, row_norm_b, row_head_b, row_vemb, _ = _vec_rows(cfg.e_layers)
    kern = functools.partial(
        _fused_model_kernel,
        bn=bn, L=L, d_model=cfg.d_model, d_ff=cfg.d_ff, n_heads=cfg.n_heads,
        e_layers=cfg.e_layers, activation=cfg.activation,
        row_norm_w=row_norm_w, row_norm_b=row_norm_b,
        row_head_b=row_head_b, row_vemb=row_vemb)

    return pl.pallas_call(
        kern,
        out_shape=jax.ShapeDtypeStruct((bn, HEAD_PAD), jnp.float32),
        grid=(1,),
        in_specs=[fullspec(a) for a in args],
        out_specs=pl.BlockSpec((bn, HEAD_PAD), lambda i: (0, 0)),
        compiler_params=pltpu.CompilerParams(dimension_semantics=("arbitrary",)),
    )(*args)


# ---------------------------------------------------------------------------
# Forecast forward (instance norm / patch slicing / de-norm are tiny JAX glue)
# ---------------------------------------------------------------------------

def forward(params, cfg, x_enc):
    # x_enc: [B, seq_len, n_vars]
    B, S, NV = x_enc.shape
    L = (S - PATCH_LEN) // STRIDE + 2
    bn = B * NV

    # --- instance normalization (non-stationary) ---
    means = jnp.mean(x_enc, axis=1, keepdims=True)                       # [B,1,NV]
    xc = x_enc - means
    stdev = jnp.sqrt(jnp.var(xc, axis=1, keepdims=True) + 1e-5)          # unbiased=False
    xn = xc / stdev

    # --- patching: ReplicationPad1d((0, stride)) + unfold via static slices ---
    x = jnp.transpose(xn, (0, 2, 1)).reshape(bn, S)                      # [bn, S]
    xp = jnp.concatenate([x, jnp.repeat(x[:, -1:], STRIDE, axis=1)], axis=1)
    patches = jnp.concatenate(
        [xp[:, l * STRIDE:l * STRIDE + PATCH_LEN] for l in range(L)], axis=0
    ).astype(jnp.float32)                                                # [(l,b), patch_len]

    pos_tiled = jnp.repeat(params["pos_emb"], bn, axis=0)                # [L*bn, D]

    # --- one fused kernel: embedding + encoder + final LN + flatten head ---
    dec_pad = fused_forward_core(params, cfg, patches, pos_tiled, bn, L)  # [bn, 128]
    dec = dec_pad[:, :cfg.pred_len].reshape(B, NV, cfg.pred_len)
    dec = jnp.transpose(dec, (0, 2, 1))                                  # [B, pred_len, NV]

    # --- de-normalize ---
    dec = dec * stdev[:, 0, :][:, None, :] + means[:, 0, :][:, None, :]
    return dec[:, -cfg.pred_len:, :]


# ---------------------------------------------------------------------------
# Pure-JAX reference (mirrors the PyTorch forecast path) for a sanity check
# ---------------------------------------------------------------------------

def reference_forward(params, cfg, x_enc):
    B, S, NV = x_enc.shape
    D, F, E, H = cfg.d_model, cfg.d_ff, cfg.e_layers, cfg.n_heads
    dk = D // H
    L = (S - PATCH_LEN) // STRIDE + 2
    bn = B * NV
    row_norm_w, row_norm_b, row_head_b, row_vemb, _ = _vec_rows(E)
    vecs = params["vecs"]

    def ln(x, g, b):
        mu = jnp.mean(x, axis=-1, keepdims=True)
        xc = x - mu
        var = jnp.mean(xc * xc, axis=-1, keepdims=True)
        return xc * jax.lax.rsqrt(var + 1e-5) * g + b

    means = jnp.mean(x_enc, axis=1, keepdims=True)
    xc = x_enc - means
    stdev = jnp.sqrt(jnp.var(xc, axis=1, keepdims=True) + 1e-5)
    xn = xc / stdev

    x = jnp.transpose(xn, (0, 2, 1)).reshape(bn, S)
    xp = jnp.concatenate([x, jnp.repeat(x[:, -1:], STRIDE, axis=1)], axis=1)
    patches = jnp.stack([xp[:, l * STRIDE:l * STRIDE + PATCH_LEN] for l in range(L)],
                        axis=1)                                          # [bn, L, p]

    vemb = vecs[row_vemb:row_vemb + PATCH_LEN, :D]
    z = patches @ vemb + params["pos_emb"][None]                         # [bn, L, D]

    wa = params["w_attn"].reshape(E, 4, D, D)
    for layer in range(E):
        r0 = layer * _ROWS_PER_LAYER
        q = (z @ wa[layer, 0] + vecs[r0 + _R_BQ, :D]).reshape(bn, L, H, dk)
        k = (z @ wa[layer, 1] + vecs[r0 + _R_BK, :D]).reshape(bn, L, H, dk)
        v = (z @ wa[layer, 2] + vecs[r0 + _R_BV, :D]).reshape(bn, L, H, dk)
        s = jnp.einsum("blhd,bmhd->bhlm", q, k)
        p = jax.nn.softmax(s, axis=-1)
        o = jnp.einsum("bhlm,bmhd->blhd", p, v).reshape(bn, L, D)
        o = o @ wa[layer, 3] + vecs[r0 + _R_BO, :D]
        x1 = ln(z + o, vecs[r0 + _R_N1W, :D], vecs[r0 + _R_N1B, :D])
        y = jnp.maximum(x1 @ params["w_ffn1"][layer] + vecs[r0 + _R_B1, :F], 0.0)
        y = y @ params["w_ffn2"][layer] + vecs[r0 + _R_B2, :D]
        z = ln(x1 + y, vecs[r0 + _R_N2W, :D], vecs[r0 + _R_N2B, :D])

    z = ln(z, vecs[row_norm_w, :D], vecs[row_norm_b, :D])

    feat = jnp.transpose(z, (0, 2, 1)).reshape(bn, D * L)                # (d*L + l) order
    hw = jnp.transpose(params["head_w3"][:, :, :cfg.pred_len], (1, 0, 2)
                       ).reshape(D * L, cfg.pred_len)
    dec = feat @ hw + vecs[row_head_b, :cfg.pred_len]
    dec = jnp.transpose(dec.reshape(B, NV, cfg.pred_len), (0, 2, 1))
    dec = dec * stdev[:, 0, :][:, None, :] + means[:, 0, :][:, None, :]
    return dec[:, -cfg.pred_len:, :]


if __name__ == "__main__":
    cfg = Config()
    key = jax.random.PRNGKey(0)
    k_param, k_x = jax.random.split(key)

    params = init_params(cfg, k_param)
    x_enc = jax.random.normal(k_x, (2, cfg.seq_len, cfg.enc_in), dtype=jnp.float32)
    # x_mark_enc / x_dec / x_mark_dec / attributes are unused by the forecast path.

    fwd = jax.jit(functools.partial(forward, params, cfg))
    out = fwd(x_enc)
    jax.block_until_ready(out)
    assert out.shape == (2, cfg.pred_len, cfg.enc_in)
    assert bool(jnp.all(jnp.isfinite(out)))

    ref = reference_forward(params, cfg, x_enc)
    max_err = float(jnp.max(jnp.abs(out - ref)))
    assert max_err < 5e-3, f"mismatch vs pure-JAX reference: {max_err}"
    print("KERNEL_OK")
</pallas_src>

<mosaic_0001>
module attributes {stable_mosaic.version = 11 : i64} {
  func.func @_fused_model_kernel(%arg0: i32, %arg1: memref<64x4xf32, #tpu.memory_space<vmem>>, %arg2: memref<64x32xf32, #tpu.memory_space<vmem>>, %arg3: memref<8x32x32xf32, #tpu.memory_space<vmem>>, %arg4: memref<2x32x64xf32, #tpu.memory_space<vmem>>, %arg5: memref<2x64x32xf32, #tpu.memory_space<vmem>>, %arg6: memref<32x128xf32, #tpu.memory_space<vmem>>, %arg7: memref<8x32x128xf32, #tpu.memory_space<vmem>>, %arg8: memref<8x128xf32, #tpu.memory_space<vmem>>) attributes {dimension_semantics = [#tpu.dimension_semantics<arbitrary>], iteration_bounds = array<i64: 1>, scalar_prefetch = 0 : i64, scratch_operands = 0 : i64, tpu.core_type = #tpu.core_type<tc>, window_params = [{pipeline_mode = #tpu.pipeline_mode<synchronous>, transform_indices = @transform_0, window_bounds = array<i64: 64, 4>}, {pipeline_mode = #tpu.pipeline_mode<synchronous>, transform_indices = @transform_1, window_bounds = array<i64: 64, 32>}, {pipeline_mode = #tpu.pipeline_mode<synchronous>, transform_indices = @transform_2, window_bounds = array<i64: 8, 32, 32>}, {pipeline_mode = #tpu.pipeline_mode<synchronous>, transform_indices = @transform_3, window_bounds = array<i64: 2, 32, 64>}, {pipeline_mode = #tpu.pipeline_mode<synchronous>, transform_indices = @transform_4, window_bounds = array<i64: 2, 64, 32>}, {pipeline_mode = #tpu.pipeline_mode<synchronous>, transform_indices = @transform_5, window_bounds = array<i64: 32, 128>}, {pipeline_mode = #tpu.pipeline_mode<synchronous>, transform_indices = @transform_6, window_bounds = array<i64: 8, 32, 128>}, {pipeline_mode = #tpu.pipeline_mode<synchronous>, transform_indices = @transform_7, window_bounds = array<i64: 8, 128>}]} {
    %0 = tpu.iota {dimensions = array<i32: 0>} : vector<64x64xi32>
    %1 = tpu.iota {dimensions = array<i32: 1>} : vector<64x64xi32>
    %2 = arith.subi %0, %1 : vector<64x64xi32>
    %c7_i32 = arith.constant 7 : i32
    %3 = vector.broadcast %c7_i32 : i32 to vector<64x64xi32>
    %4 = arith.andi %2, %3 : vector<64x64xi32>
    %c0_i32 = arith.constant 0 : i32
    %5 = vector.broadcast %c0_i32 : i32 to vector<64x64xi32>
    %6 = arith.cmpi eq, %4, %5 : vector<64x64xi32>
    %cst = arith.constant 0.000000e+00 : f32
    %cst_0 = arith.constant -1.000000e+30 : f32
    %7 = vector.broadcast %cst : f32 to vector<64x64xf32>
    %8 = vector.broadcast %cst_0 : f32 to vector<64x64xf32>
    %9 = arith.select %6, %7, %8 : vector<64x64xi1>, vector<64x64xf32>
    %10 = tpu.iota {dimensions = array<i32: 1>} : vector<1x32xi32>
    %c0_i32_1 = arith.constant 0 : i32
    %11 = vector.broadcast %c0_i32_1 : i32 to vector<1x32xi32>
    %12 = arith.cmpi sge, %10, %11 : vector<1x32xi32>
    %c8_i32 = arith.constant 8 : i32
    %13 = vector.broadcast %c8_i32 : i32 to vector<1x32xi32>
    %14 = arith.cmpi slt, %10, %13 : vector<1x32xi32>
    %15 = arith.andi %12, %14 : vector<1x32xi1>
    %16 = arith.extui %15 : vector<1x32xi1> to vector<1x32xi32>
    %17 = arith.sitofp %16 : vector<1x32xi32> to vector<1x32xf32>
    %c8_i32_2 = arith.constant 8 : i32
    %18 = vector.broadcast %c8_i32_2 : i32 to vector<1x32xi32>
    %19 = arith.cmpi sge, %10, %18 : vector<1x32xi32>
    %c16_i32 = arith.constant 16 : i32
    %20 = vector.broadcast %c16_i32 : i32 to vector<1x32xi32>
    %21 = arith.cmpi slt, %10, %20 : vector<1x32xi32>
    %22 = arith.andi %19, %21 : vector<1x32xi1>
    %23 = arith.extui %22 : vector<1x32xi1> to vector<1x32xi32>
    %24 = arith.sitofp %23 : vector<1x32xi32> to vector<1x32xf32>
    %c16_i32_3 = arith.constant 16 : i32
    %25 = vector.broadcast %c16_i32_3 : i32 to vector<1x32xi32>
    %26 = arith.cmpi sge, %10, %25 : vector<1x32xi32>
    %c24_i32 = arith.constant 24 : i32
    %27 = vector.broadcast %c24_i32 : i32 to vector<1x32xi32>
    %28 = arith.cmpi slt, %10, %27 : vector<1x32xi32>
    %29 = arith.andi %26, %28 : vector<1x32xi1>
    %30 = arith.extui %29 : vector<1x32xi1> to vector<1x32xi32>
    %31 = arith.sitofp %30 : vector<1x32xi32> to vector<1x32xf32>
    %c24_i32_4 = arith.constant 24 : i32
    %32 = vector.broadcast %c24_i32_4 : i32 to vector<1x32xi32>
    %33 = arith.cmpi sge, %10, %32 : vector<1x32xi32>
    %c32_i32 = arith.constant 32 : i32
    %34 = vector.broadcast %c32_i32 : i32 to vector<1x32xi32>
    %35 = arith.cmpi slt, %10, %34 : vector<1x32xi32>
    %36 = arith.andi %33, %35 : vector<1x32xi1>
    %37 = arith.extui %36 : vector<1x32xi1> to vector<1x32xi32>
    %38 = arith.sitofp %37 : vector<1x32xi32> to vector<1x32xf32>
    %c24 = arith.constant 24 : index
    %c0 = arith.constant 0 : index
    %39 = vector.load %arg6[%c24, %c0] : memref<32x128xf32, #tpu.memory_space<vmem>>, vector<4x32xf32>
    %c0_5 = arith.constant 0 : index
    %c0_6 = arith.constant 0 : index
    %40 = vector.load %arg1[%c0_5, %c0_6] : memref<64x4xf32, #tpu.memory_space<vmem>>, vector<64x4xf32>
    %cst_7 = arith.constant dense<0.000000e+00> : vector<64x32xf32>
    %41 = tpu.matmul %40, %39, %cst_7 {dimension_numbers = #tpu.dot_dimension_numbers<[1], [0], [0], [1], [0, 0, 1, 1], [], []>} : vector<64x4xf32>, vector<4x32xf32>, vector<64x32xf32> -> vector<64x32xf32>
    %c0_8 = arith.constant 0 : index
    %c0_9 = arith.constant 0 : index
    %42 = vector.load %arg2[%c0_8, %c0_9] : memref<64x32xf32, #tpu.memory_space<vmem>>, vector<64x32xf32>
    %43 = arith.addf %41, %42 : vector<64x32xf32>
    %c0_10 = arith.constant 0 : index
    %c0_11 = arith.constant 0 : index
    %c0_12 = arith.constant 0 : index
    %44 = vector.load %arg3[%c0_10, %c0_11, %c0_12] : memref<8x32x32xf32, #tpu.memory_space<vmem>>, vector<1x32x32xf32>
    %45 = vector.shape_cast %44 : vector<1x32x32xf32> to vector<32x32xf32>
    %c1 = arith.constant 1 : index
    %c0_13 = arith.constant 0 : index
    %c0_14 = arith.constant 0 : index
    %46 = vector.load %arg3[%c1, %c0_13, %c0_14] : memref<8x32x32xf32, #tpu.memory_space<vmem>>, vector<1x32x32xf32>
    %47 = vector.shape_cast %46 : vector<1x32x32xf32> to vector<32x32xf32>
    %c2 = arith.constant 2 : index
    %c0_15 = arith.constant 0 : index
    %c0_16 = arith.constant 0 : index
    %48 = vector.load %arg3[%c2, %c0_15, %c0_16] : memref<8x32x32xf32, #tpu.memory_space<vmem>>, vector<1x32x32xf32>
    %49 = vector.shape_cast %48 : vector<1x32x32xf32> to vector<32x32xf32>
    %c3 = arith.constant 3 : index
    %c0_17 = arith.constant 0 : index
    %c0_18 = arith.constant 0 : index
    %50 = vector.load %arg3[%c3, %c0_17, %c0_18] : memref<8x32x32xf32, #tpu.memory_space<vmem>>, vector<1x32x32xf32>
    %51 = vector.shape_cast %50 : vector<1x32x32xf32> to vector<32x32xf32>
    %cst_19 = arith.constant dense<0.000000e+00> : vector<64x32xf32>
    %52 = tpu.matmul %43, %45, %cst_19 {dimension_numbers = #tpu.dot_dimension_numbers<[1], [0], [0], [1], [0, 0, 1, 1], [], []>} : vector<64x32xf32>, vector<32x32xf32>, vector<64x32xf32> -> vector<64x32xf32>
    %c0_20 = arith.constant 0 : index
    %c0_21 = arith.constant 0 : index
    %53 = vector.load %arg6[%c0_20, %c0_21] : memref<32x128xf32, #tpu.memory_space<vmem>>, vector<1x32xf32>
    %54 = vector.broadcast %53 : vector<1x32xf32> to vector<64x32xf32>
    %55 = arith.addf %52, %54 : vector<64x32xf32>
    %cst_22 = arith.constant dense<0.000000e+00> : vector<64x32xf32>
    %56 = tpu.matmul %43, %47, %cst_22 {dimension_numbers = #tpu.dot_dimension_numbers<[1], [0], [0], [1], [0, 0, 1, 1], [], []>} : vector<64x32xf32>, vector<32x32xf32>, vector<64x32xf32> -> vector<64x32xf32>
    %c1_23 = arith.constant 1 : index
    %c0_24 = arith.constant 0 : index
    %57 = vector.load %arg6[%c1_23, %c0_24] : memref<32x128xf32, #tpu.memory_space<vmem>>, vector<1x32xf32>
    %58 = vector.broadcast %57 : vector<1x32xf32> to vector<64x32xf32>
    %59 = arith.addf %56, %58 : vector<64x32xf32>
    %cst_25 = arith.constant dense<0.000000e+00> : vector<64x32xf32>
    %60 = tpu.matmul %43, %49, %cst_25 {dimension_numbers = #tpu.dot_dimension_numbers<[1], [0], [0], [1], [0, 0, 1, 1], [], []>} : vector<64x32xf32>, vector<32x32xf32>, vector<64x32xf32> -> vector<64x32xf32>
    %c2_26 = arith.constant 2 : index
    %c0_27 = arith.constant 0 : index
    %61 = vector.load %arg6[%c2_26, %c0_27] : memref<32x128xf32, #tpu.memory_space<vmem>>, vector<1x32xf32>
    %62 = vector.broadcast %61 : vector<1x32xf32> to vector<64x32xf32>
    %63 = arith.addf %60, %62 : vector<64x32xf32>
    %cst_28 = arith.constant 0.000000e+00 : f32
    %64 = vector.broadcast %cst_28 : f32 to vector<64x32xf32>
    %65 = vector.broadcast %17 : vector<1x32xf32> to vector<64x32xf32>
    %66 = arith.mulf %59, %65 : vector<64x32xf32>
    %cst_29 = arith.constant dense<0.000000e+00> : vector<64x64xf32>
    %67 = tpu.matmul %55, %66, %cst_29 {dimension_numbers = #tpu.dot_dimension_numbers<[1], [1], [0], [0], [0, 0, 1, 0], [], []>} : vector<64x32xf32>, vector<64x32xf32>, vector<64x64xf32> -> vector<64x64xf32>
    %68 = arith.addf %67, %9 : vector<64x64xf32>
    %cst_30 = arith.constant dense<0xFF800000> : vector<64xf32>
    %69 = vector.multi_reduction <maximumf>, %68, %cst_30 [1] : vector<64x64xf32> to vector<64xf32>
    %70 = vector.shape_cast %69 : vector<64xf32> to vector<64x1xf32>
    %71 = vector.broadcast %70 : vector<64x1xf32> to vector<64x64xf32>
    %72 = arith.subf %68, %71 : vector<64x64xf32>
    %73 = math.exp %72 : vector<64x64xf32>
    %cst_31 = arith.constant dense<0.000000e+00> : vector<64xf32>
    %74 = vector.multi_reduction <add>, %73, %cst_31 [1] : vector<64x64xf32> to vector<64xf32>
    %75 = vector.shape_cast %74 : vector<64xf32> to vector<64x1xf32>
    %76 = tpu.reciprocal %75 {approx = true} : vector<64x1xf32> -> vector<64x1xf32>
    %77 = vector.broadcast %76 : vector<64x1xf32> to vector<64x64xf32>
    %78 = arith.mulf %73, %77 : vector<64x64xf32>
    %79 = vector.broadcast %17 : vector<1x32xf32> to vector<64x32xf32>
    %80 = arith.mulf %63, %79 : vector<64x32xf32>
    %cst_32 = arith.constant dense<0.000000e+00> : vector<64x32xf32>
    %81 = tpu.matmul %78, %80, %cst_32 {dimension_numbers = #tpu.dot_dimension_numbers<[1], [0], [0], [1], [0, 0, 1, 1], [], []>} : vector<64x64xf32>, vector<64x32xf32>, vector<64x32xf32> -> vector<64x32xf32>
    %82 = arith.addf %64, %81 : vector<64x32xf32>
    %83 = vector.broadcast %24 : vector<1x32xf32> to vector<64x32xf32>
    %84 = arith.mulf %59, %83 : vector<64x32xf32>
    %cst_33 = arith.constant dense<0.000000e+00> : vector<64x64xf32>
    %85 = tpu.matmul %55, %84, %cst_33 {dimension_numbers = #tpu.dot_dimension_numbers<[1], [1], [0], [0], [0, 0, 1, 0], [], []>} : vector<64x32xf32>, vector<64x32xf32>, vector<64x64xf32> -> vector<64x64xf32>
    %86 = arith.addf %85, %9 : vector<64x64xf32>
    %cst_34 = arith.constant dense<0xFF800000> : vector<64xf32>
    %87 = vector.multi_reduction <maximumf>, %86, %cst_34 [1] : vector<64x64xf32> to vector<64xf32>
    %88 = vector.shape_cast %87 : vector<64xf32> to vector<64x1xf32>
    %89 = vector.broadcast %88 : vector<64x1xf32> to vector<64x64xf32>
    %90 = arith.subf %86, %89 : vector<64x64xf32>
    %91 = math.exp %90 : vector<64x64xf32>
    %cst_35 = arith.constant dense<0.000000e+00> : vector<64xf32>
    %92 = vector.multi_reduction <add>, %91, %cst_35 [1] : vector<64x64xf32> to vector<64xf32>
    %93 = vector.shape_cast %92 : vector<64xf32> to vector<64x1xf32>
    %94 = tpu.reciprocal %93 {approx = true} : vector<64x1xf32> -> vector<64x1xf32>
    %95 = vector.broadcast %94 : vector<64x1xf32> to vector<64x64xf32>
    %96 = arith.mulf %91, %95 : vector<64x64xf32>
    %97 = vector.broadcast %24 : vector<1x32xf32> to vector<64x32xf32>
    %98 = arith.mulf %63, %97 : vector<64x32xf32>
    %cst_36 = arith.constant dense<0.000000e+00> : vector<64x32xf32>
    %99 = tpu.matmul %96, %98, %cst_36 {dimension_numbers = #tpu.dot_dimension_numbers<[1], [0], [0], [1], [0, 0, 1, 1], [], []>} : vector<64x64xf32>, vector<64x32xf32>, vector<64x32xf32> -> vector<64x32xf32>
    %100 = arith.addf %82, %99 : vector<64x32xf32>
    %101 = vector.broadcast %31 : vector<1x32xf32> to vector<64x32xf32>
    %102 = arith.mulf %59, %101 : vector<64x32xf32>
    %cst_37 = arith.constant dense<0.000000e+00> : vector<64x64xf32>
    %103 = tpu.matmul %55, %102, %cst_37 {dimension_numbers = #tpu.dot_dimension_numbers<[1], [1], [0], [0], [0, 0, 1, 0], [], []>} : vector<64x32xf32>, vector<64x32xf32>, vector<64x64xf32> -> vector<64x64xf32>
    %104 = arith.addf %103, %9 : vector<64x64xf32>
    %cst_38 = arith.constant dense<0xFF800000> : vector<64xf32>
    %105 = vector.multi_reduction <maximumf>, %104, %cst_38 [1] : vector<64x64xf32> to vector<64xf32>
    %106 = vector.shape_cast %105 : vector<64xf32> to vector<64x1xf32>
    %107 = vector.broadcast %106 : vector<64x1xf32> to vector<64x64xf32>
    %108 = arith.subf %104, %107 : vector<64x64xf32>
    %109 = math.exp %108 : vector<64x64xf32>
    %cst_39 = arith.constant dense<0.000000e+00> : vector<64xf32>
    %110 = vector.multi_reduction <add>, %109, %cst_39 [1] : vector<64x64xf32> to vector<64xf32>
    %111 = vector.shape_cast %110 : vector<64xf32> to vector<64x1xf32>
    %112 = tpu.reciprocal %111 {approx = true} : vector<64x1xf32> -> vector<64x1xf32>
    %113 = vector.broadcast %112 : vector<64x1xf32> to vector<64x64xf32>
    %114 = arith.mulf %109, %113 : vector<64x64xf32>
    %115 = vector.broadcast %31 : vector<1x32xf32> to vector<64x32xf32>
    %116 = arith.mulf %63, %115 : vector<64x32xf32>
    %cst_40 = arith.constant dense<0.000000e+00> : vector<64x32xf32>
    %117 = tpu.matmul %114, %116, %cst_40 {dimension_numbers = #tpu.dot_dimension_numbers<[1], [0], [0], [1], [0, 0, 1, 1], [], []>} : vector<64x64xf32>, vector<64x32xf32>, vector<64x32xf32> -> vector<64x32xf32>
    %118 = arith.addf %100, %117 : vector<64x32xf32>
    %119 = vector.broadcast %38 : vector<1x32xf32> to vector<64x32xf32>
    %120 = arith.mulf %59, %119 : vector<64x32xf32>
    %cst_41 = arith.constant dense<0.000000e+00> : vector<64x64xf32>
    %121 = tpu.matmul %55, %120, %cst_41 {dimension_numbers = #tpu.dot_dimension_numbers<[1], [1], [0], [0], [0, 0, 1, 0], [], []>} : vector<64x32xf32>, vector<64x32xf32>, vector<64x64xf32> -> vector<64x64xf32>
    %122 = arith.addf %121, %9 : vector<64x64xf32>
    %cst_42 = arith.constant dense<0xFF800000> : vector<64xf32>
    %123 = vector.multi_reduction <maximumf>, %122, %cst_42 [1] : vector<64x64xf32> to vector<64xf32>
    %124 = vector.shape_cast %123 : vector<64xf32> to vector<64x1xf32>
    %125 = vector.broadcast %124 : vector<64x1xf32> to vector<64x64xf32>
    %126 = arith.subf %122, %125 : vector<64x64xf32>
    %127 = math.exp %126 : vector<64x64xf32>
    %cst_43 = arith.constant dense<0.000000e+00> : vector<64xf32>
    %128 = vector.multi_reduction <add>, %127, %cst_43 [1] : vector<64x64xf32> to vector<64xf32>
    %129 = vector.shape_cast %128 : vector<64xf32> to vector<64x1xf32>
    %130 = tpu.reciprocal %129 {approx = true} : vector<64x1xf32> -> vector<64x1xf32>
    %131 = vector.broadcast %130 : vector<64x1xf32> to vector<64x64xf32>
    %132 = arith.mulf %127, %131 : vector<64x64xf32>
    %133 = vector.broadcast %38 : vector<1x32xf32> to vector<64x32xf32>
    %134 = arith.mulf %63, %133 : vector<64x32xf32>
    %cst_44 = arith.constant dense<0.000000e+00> : vector<64x32xf32>
    %135 = tpu.matmul %132, %134, %cst_44 {dimension_numbers = #tpu.dot_dimension_numbers<[1], [0], [0], [1], [0, 0, 1, 1], [], []>} : vector<64x64xf32>, vector<64x32xf32>, vector<64x32xf32> -> vector<64x32xf32>
    %136 = arith.addf %118, %135 : vector<64x32xf32>
    %cst_45 = arith.constant dense<0.000000e+00> : vector<64x32xf32>
    %137 = tpu.matmul %136, %51, %cst_45 {dimension_numbers = #tpu.dot_dimension_numbers<[1], [0], [0], [1], [0, 0, 1, 1], [], []>} : vector<64x32xf32>, vector<32x32xf32>, vector<64x32xf32> -> vector<64x32xf32>
    %c3_46 = arith.constant 3 : index
    %c0_47 = arith.constant 0 : index
    %138 = vector.load %arg6[%c3_46, %c0_47] : memref<32x128xf32, #tpu.memory_space<vmem>>, vector<1x32xf32>
    %139 = vector.broadcast %138 : vector<1x32xf32> to vector<64x32xf32>
    %140 = arith.addf %137, %139 : vector<64x32xf32>
    %141 = arith.addf %43, %140 : vector<64x32xf32>
    %c6 = arith.constant 6 : index
    %c0_48 = arith.constant 0 : index
    %142 = vector.load %arg6[%c6, %c0_48] : memref<32x128xf32, #tpu.memory_space<vmem>>, vector<1x32xf32>
    %c7 = arith.constant 7 : index
    %c0_49 = arith.constant 0 : index
    %143 = vector.load %arg6[%c7, %c0_49] : memref<32x128xf32, #tpu.memory_space<vmem>>, vector<1x32xf32>
    %cst_50 = arith.constant dense<0.000000e+00> : vector<64xf32>
    %144 = vector.multi_reduction <add>, %141, %cst_50 [1] : vector<64x32xf32> to vector<64xf32>
    %145 = vector.shape_cast %144 : vector<64xf32> to vector<64x1xf32>
    %cst_51 = arith.constant 3.200000e+01 : f32
    %146 = vector.broadcast %cst_51 : f32 to vector<64x1xf32>
    %147 = arith.divf %145, %146 : vector<64x1xf32>
    %148 = vector.broadcast %147 : vector<64x1xf32> to vector<64x32xf32>
    %149 = arith.subf %141, %148 : vector<64x32xf32>
    %150 = arith.mulf %149, %149 : vector<64x32xf32>
    %cst_52 = arith.constant dense<0.000000e+00> : vector<64xf32>
    %151 = vector.multi_reduction <add>, %150, %cst_52 [1] : vector<64x32xf32> to vector<64xf32>
    %152 = vector.shape_cast %151 : vector<64xf32> to vector<64x1xf32>
    %cst_53 = arith.constant 3.200000e+01 : f32
    %153 = vector.broadcast %cst_53 : f32 to vector<64x1xf32>
    %154 = arith.divf %152, %153 : vector<64x1xf32>
    %cst_54 = arith.constant 9.99999974E-6 : f32
    %155 = vector.broadcast %cst_54 : f32 to vector<64x1xf32>
    %156 = arith.addf %154, %155 : vector<64x1xf32>
    %157 = math.rsqrt %156 : vector<64x1xf32>
    %158 = vector.broadcast %157 : vector<64x1xf32> to vector<64x32xf32>
    %159 = arith.mulf %149, %158 : vector<64x32xf32>
    %160 = vector.broadcast %142 : vector<1x32xf32> to vector<64x32xf32>
    %161 = arith.mulf %159, %160 : vector<64x32xf32>
    %162 = vector.broadcast %143 : vector<1x32xf32> to vector<64x32xf32>
    %163 = arith.addf %161, %162 : vector<64x32xf32>
    %c0_55 = arith.constant 0 : index
    %c0_56 = arith.constant 0 : index
    %c0_57 = arith.constant 0 : index
    %164 = vector.load %arg4[%c0_55, %c0_56, %c0_57] : memref<2x32x64xf32, #tpu.memory_space<vmem>>, vector<1x32x64xf32>
    %165 = vector.shape_cast %164 : vector<1x32x64xf32> to vector<32x64xf32>
    %cst_58 = arith.constant dense<0.000000e+00> : vector<64x64xf32>
    %166 = tpu.matmul %163, %165, %cst_58 {dimension_numbers = #tpu.dot_dimension_numbers<[1], [0], [0], [1], [0, 0, 1, 1], [], []>} : vector<64x32xf32>, vector<32x64xf32>, vector<64x64xf32> -> vector<64x64xf32>
    %c4 = arith.constant 4 : index
    %c0_59 = arith.constant 0 : index
    %167 = vector.load %arg6[%c4, %c0_59] : memref<32x128xf32, #tpu.memory_space<vmem>>, vector<1x64xf32>
    %168 = vector.broadcast %167 : vector<1x64xf32> to vector<64x64xf32>
    %169 = arith.addf %166, %168 : vector<64x64xf32>
    %cst_60 = arith.constant 0.000000e+00 : f32
    %170 = vector.broadcast %cst_60 : f32 to vector<64x64xf32>
    %171 = arith.maximumf %169, %170 : vector<64x64xf32>
    %c0_61 = arith.constant 0 : index
    %c0_62 = arith.constant 0 : index
    %c0_63 = arith.constant 0 : index
    %172 = vector.load %arg5[%c0_61, %c0_62, %c0_63] : memref<2x64x32xf32, #tpu.memory_space<vmem>>, vector<1x64x32xf32>
    %173 = vector.shape_cast %172 : vector<1x64x32xf32> to vector<64x32xf32>
    %cst_64 = arith.constant dense<0.000000e+00> : vector<64x32xf32>
    %174 = tpu.matmul %171, %173, %cst_64 {dimension_numbers = #tpu.dot_dimension_numbers<[1], [0], [0], [1], [0, 0, 1, 1], [], []>} : vector<64x64xf32>, vector<64x32xf32>, vector<64x32xf32> -> vector<64x32xf32>
    %c5 = arith.constant 5 : index
    %c0_65 = arith.constant 0 : index
    %175 = vector.load %arg6[%c5, %c0_65] : memref<32x128xf32, #tpu.memory_space<vmem>>, vector<1x32xf32>
    %176 = vector.broadcast %175 : vector<1x32xf32> to vector<64x32xf32>
    %177 = arith.addf %174, %176 : vector<64x32xf32>
    %178 = arith.addf %163, %177 : vector<64x32xf32>
    %c8 = arith.constant 8 : index
    %c0_66 = arith.constant 0 : index
    %179 = vector.load %arg6[%c8, %c0_66] : memref<32x128xf32, #tpu.memory_space<vmem>>, vector<1x32xf32>
    %c9 = arith.constant 9 : index
    %c0_67 = arith.constant 0 : index
    %180 = vector.load %arg6[%c9, %c0_67] : memref<32x128xf32, #tpu.memory_space<vmem>>, vector<1x32xf32>
    %cst_68 = arith.constant dense<0.000000e+00> : vector<64xf32>
    %181 = vector.multi_reduction <add>, %178, %cst_68 [1] : vector<64x32xf32> to vector<64xf32>
    %182 = vector.shape_cast %181 : vector<64xf32> to vector<64x1xf32>
    %cst_69 = arith.constant 3.200000e+01 : f32
    %183 = vector.broadcast %cst_69 : f32 to vector<64x1xf32>
    %184 = arith.divf %182, %183 : vector<64x1xf32>
    %185 = vector.broadcast %184 : vector<64x1xf32> to vector<64x32xf32>
    %186 = arith.subf %178, %185 : vector<64x32xf32>
    %187 = arith.mulf %186, %186 : vector<64x32xf32>
    %cst_70 = arith.constant dense<0.000000e+00> : vector<64xf32>
    %188 = vector.multi_reduction <add>, %187, %cst_70 [1] : vector<64x32xf32> to vector<64xf32>
    %189 = vector.shape_cast %188 : vector<64xf32> to vector<64x1xf32>
    %cst_71 = arith.constant 3.200000e+01 : f32
    %190 = vector.broadcast %cst_71 : f32 to vector<64x1xf32>
    %191 = arith.divf %189, %190 : vector<64x1xf32>
    %cst_72 = arith.constant 9.99999974E-6 : f32
    %192 = vector.broadcast %cst_72 : f32 to vector<64x1xf32>
    %193 = arith.addf %191, %192 : vector<64x1xf32>
    %194 = math.rsqrt %193 : vector<64x1xf32>
    %195 = vector.broadcast %194 : vector<64x1xf32> to vector<64x32xf32>
    %196 = arith.mulf %186, %195 : vector<64x32xf32>
    %197 = vector.broadcast %179 : vector<1x32xf32> to vector<64x32xf32>
    %198 = arith.mulf %196, %197 : vector<64x32xf32>
    %199 = vector.broadcast %180 : vector<1x32xf32> to vector<64x32xf32>
    %200 = arith.addf %198, %199 : vector<64x32xf32>
    %c4_73 = arith.constant 4 : index
    %c0_74 = arith.constant 0 : index
    %c0_75 = arith.constant 0 : index
    %201 = vector.load %arg3[%c4_73, %c0_74, %c0_75] : memref<8x32x32xf32, #tpu.memory_space<vmem>>, vector<1x32x32xf32>
    %202 = vector.shape_cast %201 : vector<1x32x32xf32> to vector<32x32xf32>
    %c5_76 = arith.constant 5 : index
    %c0_77 = arith.constant 0 : index
    %c0_78 = arith.constant 0 : index
    %203 = vector.load %arg3[%c5_76, %c0_77, %c0_78] : memref<8x32x32xf32, #tpu.memory_space<vmem>>, vector<1x32x32xf32>
    %204 = vector.shape_cast %203 : vector<1x32x32xf32> to vector<32x32xf32>
    %c6_79 = arith.constant 6 : index
    %c0_80 = arith.constant 0 : index
    %c0_81 = arith.constant 0 : index
    %205 = vector.load %arg3[%c6_79, %c0_80, %c0_81] : memref<8x32x32xf32, #tpu.memory_space<vmem>>, vector<1x32x32xf32>
    %206 = vector.shape_cast %205 : vector<1x32x32xf32> to vector<32x32xf32>
    %c7_82 = arith.constant 7 : index
    %c0_83 = arith.constant 0 : index
    %c0_84 = arith.constant 0 : index
    %207 = vector.load %arg3[%c7_82, %c0_83, %c0_84] : memref<8x32x32xf32, #tpu.memory_space<vmem>>, vector<1x32x32xf32>
    %208 = vector.shape_cast %207 : vector<1x32x32xf32> to vector<32x32xf32>
    %cst_85 = arith.constant dense<0.000000e+00> : vector<64x32xf32>
    %209 = tpu.matmul %200, %202, %cst_85 {dimension_numbers = #tpu.dot_dimension_numbers<[1], [0], [0], [1], [0, 0, 1, 1], [], []>} : vector<64x32xf32>, vector<32x32xf32>, vector<64x32xf32> -> vector<64x32xf32>
    %c10 = arith.constant 10 : index
    %c0_86 = arith.constant 0 : index
    %210 = vector.load %arg6[%c10, %c0_86] : memref<32x128xf32, #tpu.memory_space<vmem>>, vector<1x32xf32>
    %211 = vector.broadcast %210 : vector<1x32xf32> to vector<64x32xf32>
    %212 = arith.addf %209, %211 : vector<64x32xf32>
    %cst_87 = arith.constant dense<0.000000e+00> : vector<64x32xf32>
    %213 = tpu.matmul %200, %204, %cst_87 {dimension_numbers = #tpu.dot_dimension_numbers<[1], [0], [0], [1], [0, 0, 1, 1], [], []>} : vector<64x32xf32>, vector<32x32xf32>, vector<64x32xf32> -> vector<64x32xf32>
    %c11 = arith.constant 11 : index
    %c0_88 = arith.constant 0 : index
    %214 = vector.load %arg6[%c11, %c0_88] : memref<32x128xf32, #tpu.memory_space<vmem>>, vector<1x32xf32>
    %215 = vector.broadcast %214 : vector<1x32xf32> to vector<64x32xf32>
    %216 = arith.addf %213, %215 : vector<64x32xf32>
    %cst_89 = arith.constant dense<0.000000e+00> : vector<64x32xf32>
    %217 = tpu.matmul %200, %206, %cst_89 {dimension_numbers = #tpu.dot_dimension_numbers<[1], [0], [0], [1], [0, 0, 1, 1], [], []>} : vector<64x32xf32>, vector<32x32xf32>, vector<64x32xf32> -> vector<64x32xf32>
    %c12 = arith.constant 12 : index
    %c0_90 = arith.constant 0 : index
    %218 = vector.load %arg6[%c12, %c0_90] : memref<32x128xf32, #tpu.memory_space<vmem>>, vector<1x32xf32>
    %219 = vector.broadcast %218 : vector<1x32xf32> to vector<64x32xf32>
    %220 = arith.addf %217, %219 : vector<64x32xf32>
    %cst_91 = arith.constant 0.000000e+00 : f32
    %221 = vector.broadcast %cst_91 : f32 to vector<64x32xf32>
    %222 = vector.broadcast %17 : vector<1x32xf32> to vector<64x32xf32>
    %223 = arith.mulf %216, %222 : vector<64x32xf32>
    %cst_92 = arith.constant dense<0.000000e+00> : vector<64x64xf32>
    %224 = tpu.matmul %212, %223, %cst_92 {dimension_numbers = #tpu.dot_dimension_numbers<[1], [1], [0], [0], [0, 0, 1, 0], [], []>} : vector<64x32xf32>, vector<64x32xf32>, vector<64x64xf32> -> vector<64x64xf32>
    %225 = arith.addf %224, %9 : vector<64x64xf32>
    %cst_93 = arith.constant dense<0xFF800000> : vector<64xf32>
    %226 = vector.multi_reduction <maximumf>, %225, %cst_93 [1] : vector<64x64xf32> to vector<64xf32>
    %227 = vector.shape_cast %226 : vector<64xf32> to vector<64x1xf32>
    %228 = vector.broadcast %227 : vector<64x1xf32> to vector<64x64xf32>
    %229 = arith.subf %225, %228 : vector<64x64xf32>
    %230 = math.exp %229 : vector<64x64xf32>
    %cst_94 = arith.constant dense<0.000000e+00> : vector<64xf32>
    %231 = vector.multi_reduction <add>, %230, %cst_94 [1] : vector<64x64xf32> to vector<64xf32>
    %232 = vector.shape_cast %231 : vector<64xf32> to vector<64x1xf32>
    %233 = tpu.reciprocal %232 {approx = true} : vector<64x1xf32> -> vector<64x1xf32>
    %234 = vector.broadcast %233 : vector<64x1xf32> to vector<64x64xf32>
    %235 = arith.mulf %230, %234 : vector<64x64xf32>
    %236 = vector.broadcast %17 : vector<1x32xf32> to vector<64x32xf32>
    %237 = arith.mulf %220, %236 : vector<64x32xf32>
    %cst_95 = arith.constant dense<0.000000e+00> : vector<64x32xf32>
    %238 = tpu.matmul %235, %237, %cst_95 {dimension_numbers = #tpu.dot_dimension_numbers<[1], [0], [0], [1], [0, 0, 1, 1], [], []>} : vector<64x64xf32>, vector<64x32xf32>, vector<64x32xf32> -> vector<64x32xf32>
    %239 = arith.addf %221, %238 : vector<64x32xf32>
    %240 = vector.broadcast %24 : vector<1x32xf32> to vector<64x32xf32>
    %241 = arith.mulf %216, %240 : vector<64x32xf32>
    %cst_96 = arith.constant dense<0.000000e+00> : vector<64x64xf32>
    %242 = tpu.matmul %212, %241, %cst_96 {dimension_numbers = #tpu.dot_dimension_numbers<[1], [1], [0], [0], [0, 0, 1, 0], [], []>} : vector<64x32xf32>, vector<64x32xf32>, vector<64x64xf32> -> vector<64x64xf32>
    %243 = arith.addf %242, %9 : vector<64x64xf32>
    %cst_97 = arith.constant dense<0xFF800000> : vector<64xf32>
    %244 = vector.multi_reduction <maximumf>, %243, %cst_97 [1] : vector<64x64xf32> to vector<64xf32>
    %245 = vector.shape_cast %244 : vector<64xf32> to vector<64x1xf32>
    %246 = vector.broadcast %245 : vector<64x1xf32> to vector<64x64xf32>
    %247 = arith.subf %243, %246 : vector<64x64xf32>
    %248 = math.exp %247 : vector<64x64xf32>
    %cst_98 = arith.constant dense<0.000000e+00> : vector<64xf32>
    %249 = vector.multi_reduction <add>, %248, %cst_98 [1] : vector<64x64xf32> to vector<64xf32>
    %250 = vector.shape_cast %249 : vector<64xf32> to vector<64x1xf32>
    %251 = tpu.reciprocal %250 {approx = true} : vector<64x1xf32> -> vector<64x1xf32>
    %252 = vector.broadcast %251 : vector<64x1xf32> to vector<64x64xf32>
    %253 = arith.mulf %248, %252 : vector<64x64xf32>
    %254 = vector.broadcast %24 : vector<1x32xf32> to vector<64x32xf32>
    %255 = arith.mulf %220, %254 : vector<64x32xf32>
    %cst_99 = arith.constant dense<0.000000e+00> : vector<64x32xf32>
    %256 = tpu.matmul %253, %255, %cst_99 {dimension_numbers = #tpu.dot_dimension_numbers<[1], [0], [0], [1], [0, 0, 1, 1], [], []>} : vector<64x64xf32>, vector<64x32xf32>, vector<64x32xf32> -> vector<64x32xf32>
    %257 = arith.addf %239, %256 : vector<64x32xf32>
    %258 = vector.broadcast %31 : vector<1x32xf32> to vector<64x32xf32>
    %259 = arith.mulf %216, %258 : vector<64x32xf32>
    %cst_100 = arith.constant dense<0.000000e+00> : vector<64x64xf32>
    %260 = tpu.matmul %212, %259, %cst_100 {dimension_numbers = #tpu.dot_dimension_numbers<[1], [1], [0], [0], [0, 0, 1, 0], [], []>} : vector<64x32xf32>, vector<64x32xf32>, vector<64x64xf32> -> vector<64x64xf32>
    %261 = arith.addf %260, %9 : vector<64x64xf32>
    %cst_101 = arith.constant dense<0xFF800000> : vector<64xf32>
    %262 = vector.multi_reduction <maximumf>, %261, %cst_101 [1] : vector<64x64xf32> to vector<64xf32>
    %263 = vector.shape_cast %262 : vector<64xf32> to vector<64x1xf32>
    %264 = vector.broadcast %263 : vector<64x1xf32> to vector<64x64xf32>
    %265 = arith.subf %261, %264 : vector<64x64xf32>
    %266 = math.exp %265 : vector<64x64xf32>
    %cst_102 = arith.constant dense<0.000000e+00> : vector<64xf32>
    %267 = vector.multi_reduction <add>, %266, %cst_102 [1] : vector<64x64xf32> to vector<64xf32>
    %268 = vector.shape_cast %267 : vector<64xf32> to vector<64x1xf32>
    %269 = tpu.reciprocal %268 {approx = true} : vector<64x1xf32> -> vector<64x1xf32>
    %270 = vector.broadcast %269 : vector<64x1xf32> to vector<64x64xf32>
    %271 = arith.mulf %266, %270 : vector<64x64xf32>
    %272 = vector.broadcast %31 : vector<1x32xf32> to vector<64x32xf32>
    %273 = arith.mulf %220, %272 : vector<64x32xf32>
    %cst_103 = arith.constant dense<0.000000e+00> : vector<64x32xf32>
    %274 = tpu.matmul %271, %273, %cst_103 {dimension_numbers = #tpu.dot_dimension_numbers<[1], [0], [0], [1], [0, 0, 1, 1], [], []>} : vector<64x64xf32>, vector<64x32xf32>, vector<64x32xf32> -> vector<64x32xf32>
    %275 = arith.addf %257, %274 : vector<64x32xf32>
    %276 = vector.broadcast %38 : vector<1x32xf32> to vector<64x32xf32>
    %277 = arith.mulf %216, %276 : vector<64x32xf32>
    %cst_104 = arith.constant dense<0.000000e+00> : vector<64x64xf32>
    %278 = tpu.matmul %212, %277, %cst_104 {dimension_numbers = #tpu.dot_dimension_numbers<[1], [1], [0], [0], [0, 0, 1, 0], [], []>} : vector<64x32xf32>, vector<64x32xf32>, vector<64x64xf32> -> vector<64x64xf32>
    %279 = arith.addf %278, %9 : vector<64x64xf32>
    %cst_105 = arith.constant dense<0xFF800000> : vector<64xf32>
    %280 = vector.multi_reduction <maximumf>, %279, %cst_105 [1] : vector<64x64xf32> to vector<64xf32>
    %281 = vector.shape_cast %280 : vector<64xf32> to vector<64x1xf32>
    %282 = vector.broadcast %281 : vector<64x1xf32> to vector<64x64xf32>
    %283 = arith.subf %279, %282 : vector<64x64xf32>
    %284 = math.exp %283 : vector<64x64xf32>
    %cst_106 = arith.constant dense<0.000000e+00> : vector<64xf32>
    %285 = vector.multi_reduction <add>, %284, %cst_106 [1] : vector<64x64xf32> to vector<64xf32>
    %286 = vector.shape_cast %285 : vector<64xf32> to vector<64x1xf32>
    %287 = tpu.reciprocal %286 {approx = true} : vector<64x1xf32> -> vector<64x1xf32>
    %288 = vector.broadcast %287 : vector<64x1xf32> to vector<64x64xf32>
    %289 = arith.mulf %284, %288 : vector<64x64xf32>
    %290 = vector.broadcast %38 : vector<1x32xf32> to vector<64x32xf32>
    %291 = arith.mulf %220, %290 : vector<64x32xf32>
    %cst_107 = arith.constant dense<0.000000e+00> : vector<64x32xf32>
    %292 = tpu.matmul %289, %291, %cst_107 {dimension_numbers = #tpu.dot_dimension_numbers<[1], [0], [0], [1], [0, 0, 1, 1], [], []>} : vector<64x64xf32>, vector<64x32xf32>, vector<64x32xf32> -> vector<64x32xf32>
    %293 = arith.addf %275, %292 : vector<64x32xf32>
    %cst_108 = arith.constant dense<0.000000e+00> : vector<64x32xf32>
    %294 = tpu.matmul %293, %208, %cst_108 {dimension_numbers = #tpu.dot_dimension_numbers<[1], [0], [0], [1], [0, 0, 1, 1], [], []>} : vector<64x32xf32>, vector<32x32xf32>, vector<64x32xf32> -> vector<64x32xf32>
    %c13 = arith.constant 13 : index
    %c0_109 = arith.constant 0 : index
    %295 = vector.load %arg6[%c13, %c0_109] : memref<32x128xf32, #tpu.memory_space<vmem>>, vector<1x32xf32>
    %296 = vector.broadcast %295 : vector<1x32xf32> to vector<64x32xf32>
    %297 = arith.addf %294, %296 : vector<64x32xf32>
    %298 = arith.addf %200, %297 : vector<64x32xf32>
    %c16 = arith.constant 16 : index
    %c0_110 = arith.constant 0 : index
    %299 = vector.load %arg6[%c16, %c0_110] : memref<32x128xf32, #tpu.memory_space<vmem>>, vector<1x32xf32>
    %c17 = arith.constant 17 : index
    %c0_111 = arith.constant 0 : index
    %300 = vector.load %arg6[%c17, %c0_111] : memref<32x128xf32, #tpu.memory_space<vmem>>, vector<1x32xf32>
    %cst_112 = arith.constant dense<0.000000e+00> : vector<64xf32>
    %301 = vector.multi_reduction <add>, %298, %cst_112 [1] : vector<64x32xf32> to vector<64xf32>
    %302 = vector.shape_cast %301 : vector<64xf32> to vector<64x1xf32>
    %cst_113 = arith.constant 3.200000e+01 : f32
    %303 = vector.broadcast %cst_113 : f32 to vector<64x1xf32>
    %304 = arith.divf %302, %303 : vector<64x1xf32>
    %305 = vector.broadcast %304 : vector<64x1xf32> to vector<64x32xf32>
    %306 = arith.subf %298, %305 : vector<64x32xf32>
    %307 = arith.mulf %306, %306 : vector<64x32xf32>
    %cst_114 = arith.constant dense<0.000000e+00> : vector<64xf32>
    %308 = vector.multi_reduction <add>, %307, %cst_114 [1] : vector<64x32xf32> to vector<64xf32>
    %309 = vector.shape_cast %308 : vector<64xf32> to vector<64x1xf32>
    %cst_115 = arith.constant 3.200000e+01 : f32
    %310 = vector.broadcast %cst_115 : f32 to vector<64x1xf32>
    %311 = arith.divf %309, %310 : vector<64x1xf32>
    %cst_116 = arith.constant 9.99999974E-6 : f32
    %312 = vector.broadcast %cst_116 : f32 to vector<64x1xf32>
    %313 = arith.addf %311, %312 : vector<64x1xf32>
    %314 = math.rsqrt %313 : vector<64x1xf32>
    %315 = vector.broadcast %314 : vector<64x1xf32> to vector<64x32xf32>
    %316 = arith.mulf %306, %315 : vector<64x32xf32>
    %317 = vector.broadcast %299 : vector<1x32xf32> to vector<64x32xf32>
    %318 = arith.mulf %316, %317 : vector<64x32xf32>
    %319 = vector.broadcast %300 : vector<1x32xf32> to vector<64x32xf32>
    %320 = arith.addf %318, %319 : vector<64x32xf32>
    %c1_117 = arith.constant 1 : index
    %c0_118 = arith.constant 0 : index
    %c0_119 = arith.constant 0 : index
    %321 = vector.load %arg4[%c1_117, %c0_118, %c0_119] : memref<2x32x64xf32, #tpu.memory_space<vmem>>, vector<1x32x64xf32>
    %322 = vector.shape_cast %321 : vector<1x32x64xf32> to vector<32x64xf32>
    %cst_120 = arith.constant dense<0.000000e+00> : vector<64x64xf32>
    %323 = tpu.matmul %320, %322, %cst_120 {dimension_numbers = #tpu.dot_dimension_numbers<[1], [0], [0], [1], [0, 0, 1, 1], [], []>} : vector<64x32xf32>, vector<32x64xf32>, vector<64x64xf32> -> vector<64x64xf32>
    %c14 = arith.constant 14 : index
    %c0_121 = arith.constant 0 : index
    %324 = vector.load %arg6[%c14, %c0_121] : memref<32x128xf32, #tpu.memory_space<vmem>>, vector<1x64xf32>
    %325 = vector.broadcast %324 : vector<1x64xf32> to vector<64x64xf32>
    %326 = arith.addf %323, %325 : vector<64x64xf32>
    %cst_122 = arith.constant 0.000000e+00 : f32
    %327 = vector.broadcast %cst_122 : f32 to vector<64x64xf32>
    %328 = arith.maximumf %326, %327 : vector<64x64xf32>
    %c1_123 = arith.constant 1 : index
    %c0_124 = arith.constant 0 : index
    %c0_125 = arith.constant 0 : index
    %329 = vector.load %arg5[%c1_123, %c0_124, %c0_125] : memref<2x64x32xf32, #tpu.memory_space<vmem>>, vector<1x64x32xf32>
    %330 = vector.shape_cast %329 : vector<1x64x32xf32> to vector<64x32xf32>
    %cst_126 = arith.constant dense<0.000000e+00> : vector<64x32xf32>
    %331 = tpu.matmul %328, %330, %cst_126 {dimension_numbers = #tpu.dot_dimension_numbers<[1], [0], [0], [1], [0, 0, 1, 1], [], []>} : vector<64x64xf32>, vector<64x32xf32>, vector<64x32xf32> -> vector<64x32xf32>
    %c15 = arith.constant 15 : index
    %c0_127 = arith.constant 0 : index
    %332 = vector.load %arg6[%c15, %c0_127] : memref<32x128xf32, #tpu.memory_space<vmem>>, vector<1x32xf32>
    %333 = vector.broadcast %332 : vector<1x32xf32> to vector<64x32xf32>
    %334 = arith.addf %331, %333 : vector<64x32xf32>
    %335 = arith.addf %320, %334 : vector<64x32xf32>
    %c18 = arith.constant 18 : index
    %c0_128 = arith.constant 0 : index
    %336 = vector.load %arg6[%c18, %c0_128] : memref<32x128xf32, #tpu.memory_space<vmem>>, vector<1x32xf32>
    %c19 = arith.constant 19 : index
    %c0_129 = arith.constant 0 : index
    %337 = vector.load %arg6[%c19, %c0_129] : memref<32x128xf32, #tpu.memory_space<vmem>>, vector<1x32xf32>
    %cst_130 = arith.constant dense<0.000000e+00> : vector<64xf32>
    %338 = vector.multi_reduction <add>, %335, %cst_130 [1] : vector<64x32xf32> to vector<64xf32>
    %339 = vector.shape_cast %338 : vector<64xf32> to vector<64x1xf32>
    %cst_131 = arith.constant 3.200000e+01 : f32
    %340 = vector.broadcast %cst_131 : f32 to vector<64x1xf32>
    %341 = arith.divf %339, %340 : vector<64x1xf32>
    %342 = vector.broadcast %341 : vector<64x1xf32> to vector<64x32xf32>
    %343 = arith.subf %335, %342 : vector<64x32xf32>
    %344 = arith.mulf %343, %343 : vector<64x32xf32>
    %cst_132 = arith.constant dense<0.000000e+00> : vector<64xf32>
    %345 = vector.multi_reduction <add>, %344, %cst_132 [1] : vector<64x32xf32> to vector<64xf32>
    %346 = vector.shape_cast %345 : vector<64xf32> to vector<64x1xf32>
    %cst_133 = arith.constant 3.200000e+01 : f32
    %347 = vector.broadcast %cst_133 : f32 to vector<64x1xf32>
    %348 = arith.divf %346, %347 : vector<64x1xf32>
    %cst_134 = arith.constant 9.99999974E-6 : f32
    %349 = vector.broadcast %cst_134 : f32 to vector<64x1xf32>
    %350 = arith.addf %348, %349 : vector<64x1xf32>
    %351 = math.rsqrt %350 : vector<64x1xf32>
    %352 = vector.broadcast %351 : vector<64x1xf32> to vector<64x32xf32>
    %353 = arith.mulf %343, %352 : vector<64x32xf32>
    %354 = vector.broadcast %336 : vector<1x32xf32> to vector<64x32xf32>
    %355 = arith.mulf %353, %354 : vector<64x32xf32>
    %356 = vector.broadcast %337 : vector<1x32xf32> to vector<64x32xf32>
    %357 = arith.addf %355, %356 : vector<64x32xf32>
    %c20 = arith.constant 20 : index
    %c0_135 = arith.constant 0 : index
    %358 = vector.load %arg6[%c20, %c0_135] : memref<32x128xf32, #tpu.memory_space<vmem>>, vector<1x32xf32>
    %c21 = arith.constant 21 : index
    %c0_136 = arith.constant 0 : index
    %359 = vector.load %arg6[%c21, %c0_136] : memref<32x128xf32, #tpu.memory_space<vmem>>, vector<1x32xf32>
    %cst_137 = arith.constant dense<0.000000e+00> : vector<64xf32>
    %360 = vector.multi_reduction <add>, %357, %cst_137 [1] : vector<64x32xf32> to vector<64xf32>
    %361 = vector.shape_cast %360 : vector<64xf32> to vector<64x1xf32>
    %cst_138 = arith.constant 3.200000e+01 : f32
    %362 = vector.broadcast %cst_138 : f32 to vector<64x1xf32>
    %363 = arith.divf %361, %362 : vector<64x1xf32>
    %364 = vector.broadcast %363 : vector<64x1xf32> to vector<64x32xf32>
    %365 = arith.subf %357, %364 : vector<64x32xf32>
    %366 = arith.mulf %365, %365 : vector<64x32xf32>
    %cst_139 = arith.constant dense<0.000000e+00> : vector<64xf32>
    %367 = vector.multi_reduction <add>, %366, %cst_139 [1] : vector<64x32xf32> to vector<64xf32>
    %368 = vector.shape_cast %367 : vector<64xf32> to vector<64x1xf32>
    %cst_140 = arith.constant 3.200000e+01 : f32
    %369 = vector.broadcast %cst_140 : f32 to vector<64x1xf32>
    %370 = arith.divf %368, %369 : vector<64x1xf32>
    %cst_141 = arith.constant 9.99999974E-6 : f32
    %371 = vector.broadcast %cst_141 : f32 to vector<64x1xf32>
    %372 = arith.addf %370, %371 : vector<64x1xf32>
    %373 = math.rsqrt %372 : vector<64x1xf32>
    %374 = vector.broadcast %373 : vector<64x1xf32> to vector<64x32xf32>
    %375 = arith.mulf %365, %374 : vector<64x32xf32>
    %376 = vector.broadcast %358 : vector<1x32xf32> to vector<64x32xf32>
    %377 = arith.mulf %375, %376 : vector<64x32xf32>
    %378 = vector.broadcast %359 : vector<1x32xf32> to vector<64x32xf32>
    %379 = arith.addf %377, %378 : vector<64x32xf32>
    %cst_142 = arith.constant 0.000000e+00 : f32
    %380 = vector.broadcast %cst_142 : f32 to vector<8x128xf32>
    %381 = vector.extract_strided_slice %379 {offsets = [0, 0], sizes = [8, 32], strides = [1, 1]} : vector<64x32xf32> to vector<8x32xf32>
    %c0_143 = arith.constant 0 : index
    %c0_144 = arith.constant 0 : index
    %c0_145 = arith.constant 0 : index
    %382 = vector.load %arg7[%c0_143, %c0_144, %c0_145] : memref<8x32x128xf32, #tpu.memory_space<vmem>>, vector<1x32x128xf32>
    %383 = vector.shape_cast %382 : vector<1x32x128xf32> to vector<32x128xf32>
    %cst_146 = arith.constant dense<0.000000e+00> : vector<8x128xf32>
    %384 = tpu.matmul %381, %383, %cst_146 {dimension_numbers = #tpu.dot_dimension_numbers<[1], [0], [0], [1], [0, 0, 1, 1], [], []>} : vector<8x32xf32>, vector<32x128xf32>, vector<8x128xf32> -> vector<8x128xf32>
    %385 = arith.addf %380, %384 : vector<8x128xf32>
    %386 = vector.extract_strided_slice %379 {offsets = [8, 0], sizes = [8, 32], strides = [1, 1]} : vector<64x32xf32> to vector<8x32xf32>
    %c1_147 = arith.constant 1 : index
    %c0_148 = arith.constant 0 : index
    %c0_149 = arith.constant 0 : index
    %387 = vector.load %arg7[%c1_147, %c0_148, %c0_149] : memref<8x32x128xf32, #tpu.memory_space<vmem>>, vector<1x32x128xf32>
    %388 = vector.shape_cast %387 : vector<1x32x128xf32> to vector<32x128xf32>
    %cst_150 = arith.constant dense<0.000000e+00> : vector<8x128xf32>
    %389 = tpu.matmul %386, %388, %cst_150 {dimension_numbers = #tpu.dot_dimension_numbers<[1], [0], [0], [1], [0, 0, 1, 1], [], []>} : vector<8x32xf32>, vector<32x128xf32>, vector<8x128xf32> -> vector<8x128xf32>
    %390 = arith.addf %385, %389 : vector<8x128xf32>
    %391 = vector.extract_strided_slice %379 {offsets = [16, 0], sizes = [8, 32], strides = [1, 1]} : vector<64x32xf32> to vector<8x32xf32>
    %c2_151 = arith.constant 2 : index
    %c0_152 = arith.constant 0 : index
    %c0_153 = arith.constant 0 : index
    %392 = vector.load %arg7[%c2_151, %c0_152, %c0_153] : memref<8x32x128xf32, #tpu.memory_space<vmem>>, vector<1x32x128xf32>
    %393 = vector.shape_cast %392 : vector<1x32x128xf32> to vector<32x128xf32>
    %cst_154 = arith.constant dense<0.000000e+00> : vector<8x128xf32>
    %394 = tpu.matmul %391, %393, %cst_154 {dimension_numbers = #tpu.dot_dimension_numbers<[1], [0], [0], [1], [0, 0, 1, 1], [], []>} : vector<8x32xf32>, vector<32x128xf32>, vector<8x128xf32> -> vector<8x128xf32>
    %395 = arith.addf %390, %394 : vector<8x128xf32>
    %396 = vector.extract_strided_slice %379 {offsets = [24, 0], sizes = [8, 32], strides = [1, 1]} : vector<64x32xf32> to vector<8x32xf32>
    %c3_155 = arith.constant 3 : index
    %c0_156 = arith.constant 0 : index
    %c0_157 = arith.constant 0 : index
    %397 = vector.load %arg7[%c3_155, %c0_156, %c0_157] : memref<8x32x128xf32, #tpu.memory_space<vmem>>, vector<1x32x128xf32>
    %398 = vector.shape_cast %397 : vector<1x32x128xf32> to vector<32x128xf32>
    %cst_158 = arith.constant dense<0.000000e+00> : vector<8x128xf32>
    %399 = tpu.matmul %396, %398, %cst_158 {dimension_numbers = #tpu.dot_dimension_numbers<[1], [0], [0], [1], [0, 0, 1, 1], [], []>} : vector<8x32xf32>, vector<32x128xf32>, vector<8x128xf32> -> vector<8x128xf32>
    %400 = arith.addf %395, %399 : vector<8x128xf32>
    %401 = vector.extract_strided_slice %379 {offsets = [32, 0], sizes = [8, 32], strides = [1, 1]} : vector<64x32xf32> to vector<8x32xf32>
    %c4_159 = arith.constant 4 : index
    %c0_160 = arith.constant 0 : index
    %c0_161 = arith.constant 0 : index
    %402 = vector.load %arg7[%c4_159, %c0_160, %c0_161] : memref<8x32x128xf32, #tpu.memory_space<vmem>>, vector<1x32x128xf32>
    %403 = vector.shape_cast %402 : vector<1x32x128xf32> to vector<32x128xf32>
    %cst_162 = arith.constant dense<0.000000e+00> : vector<8x128xf32>
    %404 = tpu.matmul %401, %403, %cst_162 {dimension_numbers = #tpu.dot_dimension_numbers<[1], [0], [0], [1], [0, 0, 1, 1], [], []>} : vector<8x32xf32>, vector<32x128xf32>, vector<8x128xf32> -> vector<8x128xf32>
    %405 = arith.addf %400, %404 : vector<8x128xf32>
    %406 = vector.extract_strided_slice %379 {offsets = [40, 0], sizes = [8, 32], strides = [1, 1]} : vector<64x32xf32> to vector<8x32xf32>
    %c5_163 = arith.constant 5 : index
    %c0_164 = arith.constant 0 : index
    %c0_165 = arith.constant 0 : index
    %407 = vector.load %arg7[%c5_163, %c0_164, %c0_165] : memref<8x32x128xf32, #tpu.memory_space<vmem>>, vector<1x32x128xf32>
    %408 = vector.shape_cast %407 : vector<1x32x128xf32> to vector<32x128xf32>
    %cst_166 = arith.constant dense<0.000000e+00> : vector<8x128xf32>
    %409 = tpu.matmul %406, %408, %cst_166 {dimension_numbers = #tpu.dot_dimension_numbers<[1], [0], [0], [1], [0, 0, 1, 1], [], []>} : vector<8x32xf32>, vector<32x128xf32>, vector<8x128xf32> -> vector<8x128xf32>
    %410 = arith.addf %405, %409 : vector<8x128xf32>
    %411 = vector.extract_strided_slice %379 {offsets = [48, 0], sizes = [8, 32], strides = [1, 1]} : vector<64x32xf32> to vector<8x32xf32>
    %c6_167 = arith.constant 6 : index
    %c0_168 = arith.constant 0 : index
    %c0_169 = arith.constant 0 : index
    %412 = vector.load %arg7[%c6_167, %c0_168, %c0_169] : memref<8x32x128xf32, #tpu.memory_space<vmem>>, vector<1x32x128xf32>
    %413 = vector.shape_cast %412 : vector<1x32x128xf32> to vector<32x128xf32>
    %cst_170 = arith.constant dense<0.000000e+00> : vector<8x128xf32>
    %414 = tpu.matmul %411, %413, %cst_170 {dimension_numbers = #tpu.dot_dimension_numbers<[1], [0], [0], [1], [0, 0, 1, 1], [], []>} : vector<8x32xf32>, vector<32x128xf32>, vector<8x128xf32> -> vector<8x128xf32>
    %415 = arith.addf %410, %414 : vector<8x128xf32>
    %416 = vector.extract_strided_slice %379 {offsets = [56, 0], sizes = [8, 32], strides = [1, 1]} : vector<64x32xf32> to vector<8x32xf32>
    %c7_171 = arith.constant 7 : index
    %c0_172 = arith.constant 0 : index
    %c0_173 = arith.constant 0 : index
    %417 = vector.load %arg7[%c7_171, %c0_172, %c0_173] : memref<8x32x128xf32, #tpu.memory_space<vmem>>, vector<1x32x128xf32>
    %418 = vector.shape_cast %417 : vector<1x32x128xf32> to vector<32x128xf32>
    %cst_174 = arith.constant dense<0.000000e+00> : vector<8x128xf32>
    %419 = tpu.matmul %416, %418, %cst_174 {dimension_numbers = #tpu.dot_dimension_numbers<[1], [0], [0], [1], [0, 0, 1, 1], [], []>} : vector<8x32xf32>, vector<32x128xf32>, vector<8x128xf32> -> vector<8x128xf32>
    %420 = arith.addf %415, %419 : vector<8x128xf32>
    %c22 = arith.constant 22 : index
    %c0_175 = arith.constant 0 : index
    %421 = vector.load %arg6[%c22, %c0_175] : memref<32x128xf32, #tpu.memory_space<vmem>>, vector<1x128xf32>
    %422 = vector.broadcast %421 : vector<1x128xf32> to vector<8x128xf32>
    %423 = arith.addf %420, %422 : vector<8x128xf32>
    %c0_176 = arith.constant 0 : index
    %c0_177 = arith.constant 0 : index
    %424 = vector.load %arg8[%c0_176, %c0_177] : memref<8x128xf32, #tpu.memory_space<vmem>>, vector<8x128xf32>
    tpu.vector_store %arg8[%c0_176, %c0_177], %423 {strides = array<i32>} : memref<8x128xf32, #tpu.memory_space<vmem>>, vector<8x128xf32>,
    return
  }
  func.func @transform_0(%arg0: i32) -> (i32, i32) {
    %c0_i32 = arith.constant 0 : i32
    %c0_i32_0 = arith.constant 0 : i32
    %c0_i32_1 = arith.constant 0 : i32
    return %c0_i32, %c0_i32_0 : i32, i32
  }
  func.func @transform_1(%arg0: i32) -> (i32, i32) {
    %c0_i32 = arith.constant 0 : i32
    %c0_i32_0 = arith.constant 0 : i32
    %c0_i32_1 = arith.constant 0 : i32
    return %c0_i32, %c0_i32_0 : i32, i32
  }
  func.func @transform_2(%arg0: i32) -> (i32, i32, i32) {
    %c0_i32 = arith.constant 0 : i32
    %c0_i32_0 = arith.constant 0 : i32
    %c0_i32_1 = arith.constant 0 : i32
    %c0_i32_2 = arith.constant 0 : i32
    return %c0_i32, %c0_i32_0, %c0_i32_1 : i32, i32, i32
  }
  func.func @transform_3(%arg0: i32) -> (i32, i32, i32) {
    %c0_i32 = arith.constant 0 : i32
    %c0_i32_0 = arith.constant 0 : i32
    %c0_i32_1 = arith.constant 0 : i32
    %c0_i32_2 = arith.constant 0 : i32
    return %c0_i32, %c0_i32_0, %c0_i32_1 : i32, i32, i32
  }
  func.func @transform_4(%arg0: i32) -> (i32, i32, i32) {
    %c0_i32 = arith.constant 0 : i32
    %c0_i32_0 = arith.constant 0 : i32
    %c0_i32_1 = arith.constant 0 : i32
    %c0_i32_2 = arith.constant 0 : i32
    return %c0_i32, %c0_i32_0, %c0_i32_1 : i32, i32, i32
  }
  func.func @transform_5(%arg0: i32) -> (i32, i32) {
    %c0_i32 = arith.constant 0 : i32
    %c0_i32_0 = arith.constant 0 : i32
    %c0_i32_1 = arith.constant 0 : i32
    return %c0_i32, %c0_i32_0 : i32, i32
  }
  func.func @transform_6(%arg0: i32) -> (i32, i32, i32) {
    %c0_i32 = arith.constant 0 : i32
    %c0_i32_0 = arith.constant 0 : i32
    %c0_i32_1 = arith.constant 0 : i32
    %c0_i32_2 = arith.constant 0 : i32
    return %c0_i32, %c0_i32_0, %c0_i32_1 : i32, i32, i32
  }
  func.func @transform_7(%arg0: i32) -> (i32, i32) {
    %c0_i32 = arith.constant 0 : i32
    %c0_i32_0 = arith.constant 0 : i32
    %c0_i32_1 = arith.constant 0 : i32
    return %c0_i32, %c0_i32_0 : i32, i32
  }
}

</mosaic_0001>

<bundles_post_ra>
// kernel: forward.1
= control target key start
LH: loop header
LB: loop body
LE: loop exit
PB: predicated region body
PF: predicated region fallthrough
CT: control target
= control target key end

     0   :  { %12 = vsyncpa [#allocation3], 0  ;;  %s7396_s0 = inlined_call_operand.vmem [shape: f32[64,4], index: 0, kind: input, shape index: {}]   ;;  %s7397_s1 = inlined_call_operand.vmem [shape: f32[64,32], index: 1, kind: input, shape index: {}]   ;;  %s7398_s2 = inlined_call_operand.hbm [shape: f32[8,32,32], index: 2, kind: input, shape index: {}]   ;;  %s7399_s3 = inlined_call_operand.vmem [shape: f32[2,32,64], index: 3, kind: input, shape index: {}]   ;;  %s7400_s4 = inlined_call_operand.vmem [shape: f32[2,64,32], index: 4, kind: input, shape index: {}]   ;;  %s7401_s5 = inlined_call_operand.vmem [shape: f32[32,128], index: 5, kind: input, shape index: {}]   ;;  %s7402_s6 = inlined_call_operand.hbm [shape: f32[8,32,128], index: 6, kind: input, shape index: {}]   ;;  %s7403_s7 = inlined_call_operand.vmem [shape: f32[8,128], index: 7, kind: output, shape index: {}]  }
   0x1   :  { %s22_s26 = sshll.u32 %s7398_s2, 4  ;;  %s23_s26 = int_to_ptr.hbm [resolvable:$true] %s22_s26 }
   0x2   :  { %13 = vsyncpa [#allocation5], 0  ;;  %s4953_s27 = smov [#allocation2]   ;;  %s41_s8 = sshll.u32 %s7402_s6, 4  ;;  %s42_s8 = int_to_ptr.hbm [resolvable:$true] %s41_s8 }
   0x3   :  { %s24_s28 = sshll.u32 %s4953_s27, 4  ;;  %s4954_s9 = smov 128   ;;  %s25_s28 = int_to_ptr.vmem [resolvable:$true] %s24_s28 }
   0x4   :  { %s4955_s10 = smov 8   ;;  %s4956_s11 = smov [#allocation4]  }
   0x5   :  { %30 = dma.hbm_to_vmem [thread:$0]  %s23_s26, 4096, %s25_s28, [#allocation3], %s4954_s9, %s4954_s9, %s4955_s10  }
   0x6   :  { %s43_s12 = sshll.u32 %s4956_s11, 4  ;;  %s44_s12 = int_to_ptr.vmem [resolvable:$true] %s43_s12 }
   0x7   :  { %49 = dma.hbm_to_vmem [thread:$0]  %s42_s8, 4096, %s44_s12, [#allocation5], %s4954_s9, %s4954_s9, %s4955_s10  }
   0x8   :  { %4949 = dma.done.wait [#allocation3], 4096  }
   0x9   :  { %4950 = vsyncadd [#allocation3], 4294963200 }
   0xa   :  { %4951 = dma.done.wait [#allocation5], 4096  }
   0xb   :  { %4952 = vsyncadd [#allocation5], 4294963200  ;;  %vm163_vm0 = vcmask 1043456   ;;  %vm138_vm1 = vcmask 31744   ;;  %v121_v0 = vld [vmem:[%s7401_s5 + $0x18] sm:$0xf]  ;;  %v58_v57 = vlaneseq }
   0xc   :  { %v122_v1 = vld [vmem:[%s7396_s0] sm:$0xff]  ;;  %4213 = vmatpush.msk.msra.mxu0 %vm163_vm0, %v121_v0  ;;  %4530 = vmatpush.msk.msra.mxu1 %vm163_vm0, %v121_v0  ;;  %v127_v3 = vld [vmem:[%s7396_s0 + $0x28] sm:$0xff]  ;;  %v128_v4 = vld [vmem:[%s7396_s0 + $0x30] sm:$0xff]  ;;  %vm229_vm2 = vcmask 261120   ;;  %vm478_vm14 = vcmask 523264  }
   0xd   :  { %v126_v2 = vld [vmem:[%s7396_s0 + $0x20] sm:$0xff]  ;;  %4214 = vmatmul.msk.f32.vlgmr.msra.gmra.mxu0 %vm138_vm1, %v122_v1  ;;  %4531 = vmatpush.msk.msra.mxu2 %vm163_vm0, %v121_v0  ;;  %v211_v5 = vld [vmem:[#allocation2 + $0x18] sm:$0xff]  ;;  %v210_v8 = vld [vmem:[#allocation2 + $0x10] sm:$0xff]  ;;  %v5140_v59 = vand.u32 127, %v58_v57 }
   0xe   :  { %4218 = vmatmul.msk.f32.vlgmr.msra.gmra.mxu1 %vm138_vm1, %v126_v2  ;;  %4532 = vmatpush.msk.msra.mxu3 %vm163_vm0, %v121_v0  ;;  %v216_v6 = vld [vmem:[#allocation2 + $0x38] sm:$0xff]  ;;  %v215_v9 = vld [vmem:[#allocation2 + $0x30] sm:$0xff]  ;;  %v123_v10 = vld [vmem:[%s7396_s0 + $0x8] sm:$0xff] }
   0xf   :  { %v221_v7 = vld [vmem:[#allocation2 + $0x58] sm:$0xff]  ;;  %4219 = vmatmul.msk.f32.vlgmr.msra.gmra.mxu2 %vm138_vm1, %v127_v3  ;;  %4220 = vmatmul.msk.f32.vlgmr.msra.gmra.mxu3 %vm138_vm1, %v128_v4  ;;  %v220_v11 = vld [vmem:[#allocation2 + $0x50] sm:$0xff]  ;;  %v209_v15 = vld [vmem:[#allocation2 + $0x8] sm:$0xff]  ;;  %vm106_vm3 = vcmp.ge.s32.totalorder %v5140_v59, 8  ;;  %vm107_vm4 = vcmp.lt.s32.totalorder %v5140_v59, 16  ;;  %vm102_vm6 = vcmp.lt.s32.totalorder %v5140_v59, 8 }
  0x10   :  { %266 = vmatpush.msrb.mxu1 %v211_v5  ;;  %309 = vmatpush.msrb.mxu2 %v216_v6  ;;  %v129_v12 = vld [vmem:[%s7396_s0 + $0x38] sm:$0xff]  ;;  %v124_v13 = vld [vmem:[%s7396_s0 + $0x10] sm:$0xff]  ;;  %v214_v16 = vld [vmem:[#allocation2 + $0x28] sm:$0xff]  ;;  %v4957_v3 = vmov 0.0   ;;  %vm116_vm7 = vcmp.ge.s32.totalorder %v5140_v59, 24  ;;  %vm117_vm8 = vcmp.lt.s32.totalorder %v5140_v59, 32 }
  0x11   :  { %352 = vmatpush.msrb.mxu3 %v221_v7  ;;  %v125_v14 = vld [vmem:[%s7396_s0 + $0x18] sm:$0xff]  ;;  %v219_v17 = vld [vmem:[#allocation2 + $0x48] sm:$0xff]  ;;  %v208_v18 = vld [vmem:[#allocation2] sm:$0xff]  ;;  %v5164_v6 = vsel %vm102_vm6, 1.0, %v4957_v3  ;;  %vm111_vm10 = vcmp.ge.s32.totalorder %v5140_v59, 16  ;;  %vm112_vm11 = vcmp.lt.s32.totalorder %v5140_v59, 24 }
  0x12   :  { %267 = vmatpush.msrb.mxu1 %v210_v8  ;;  %310 = vmatpush.msrb.mxu2 %v215_v9  ;;  %v213_v19 = vld [vmem:[#allocation2 + $0x20] sm:$0xff]  ;;  %v131_v24 = vld [vmem:[%s7397_s1 + $0x8] sm:$0xff]  ;;  %v132_v27 = vld [vmem:[%s7397_s1 + $0x10] sm:$0xff] }
  0x13   :  { %353 = vmatpush.msrb.mxu3 %v220_v11  ;;  %v218_v20 = vld [vmem:[#allocation2 + $0x40] sm:$0xff]  ;;  %v133_v30 = vld [vmem:[%s7397_s1 + $0x18] sm:$0xff]  ;;  %v135_v36 = vld [vmem:[%s7397_s1 + $0x28] sm:$0xff] }
  0x14   :  { %268 = vmatpush.msrb.mxu1 %v209_v15  ;;  %311 = vmatpush.msrb.mxu2 %v214_v16  ;;  %v130_v21 = vld [vmem:[%s7397_s1] sm:$0xff]  ;;  %v136_v40 = vld [vmem:[%s7397_s1 + $0x30] sm:$0xff]  ;;  %v137_v42 = vld [vmem:[%s7397_s1 + $0x38] sm:$0xff] }
  0x15   :  { %4215 = vmatmul.msk.f32.gmra.mxu0 %vm138_vm1, %v123_v10  ;;  %354 = vmatpush.msrb.mxu3 %v219_v17  ;;  %v134_v33 = vld [vmem:[%s7397_s1 + $0x20] sm:$0xff]  ;;  %vm108_vm5 = vmand %vm106_vm3, %vm107_vm4 }
  0x16   :  { %269 = vmatpush.msrb.mxu1 %v208_v18  ;;  %312 = vmatpush.msrb.mxu2 %v213_v19  ;;  %v5147_v61 = vld [vmem:[%s7401_s5 + $0x1] ss:$0 sm:$0xff]  ;;  %v4542_v62 = vld [vmem:[%s7401_s5 + $0x2] ss:$0 sm:$0xff]  ;;  %v5159_v4 = vsel %vm108_vm5, 1.0, %v4957_v3  ;;  %vm118_vm9 = vmand %vm116_vm7, %vm117_vm8 }
  0x17   :  { %4221 = vmatmul.msk.f32.gmra.mxu3 %vm138_vm1, %v129_v12  ;;  %vm113_vm12 = vmand %vm111_vm10, %vm112_vm11 }
  0x18   :  { %355 = vmatpush.msrb.mxu3 %v218_v20 }
  0x1d   :  { %4216 = vmatmul.msk.f32.gmra.mxu0 %vm138_vm1, %v124_v13 }
  0x25   :  { %4217 = vmatmul.msk.f32.gmra.mxu0 %vm138_vm1, %v125_v14 }
  0x8a   :  { %v184_v22 = vpop.f32.mrf.mxu0 }
  0x8b   :  { %v5044_v23 = vadd.f32 %v184_v22, %v130_v21  ;;  %v196_v34 = vpop.f32.mrf.mxu1 }
  0x8c   :  { %v5088_v35 = vadd.f32 %v196_v34, %v134_v33 }
  0x8d   :  { %4222 = vmatmul.msk.f32.vlgmr.msrb.gmra.mxu1 %vm229_vm2, %v5044_v23  ;;  %4230 = vmatmul.msk.f32.vlgmr.msrb.gmra.mxu2 %vm229_vm2, %v5044_v23 }
  0x8e   :  { %4238 = vmatmul.msk.f32.vlgmr.msrb.gmra.mxu3 %vm229_vm2, %v5044_v23 }
  0x92   :  { %v187_v25 = vpop.f32.mrf.mxu0  ;;  %v199_v37 = vpop.f32.mrf.mxu2 }
  0x93   :  { %v5055_v26 = vadd.f32 %v187_v25, %v131_v24  ;;  %v5099_v38 = vadd.f32 %v199_v37, %v135_v36  ;;  %v202_v39 = vpop.f32.mrf.mxu3 }
  0x94   :  { %v5110_v41 = vadd.f32 %v202_v39, %v136_v40 }
  0x95   :  { %4223 = vmatmul.msk.f32.gmra.mxu1 %vm229_vm2, %v5055_v26  ;;  %4231 = vmatmul.msk.f32.gmra.mxu2 %vm229_vm2, %v5055_v26 }
  0x96   :  { %4239 = vmatmul.msk.f32.gmra.mxu3 %vm229_vm2, %v5055_v26 }
  0x9a   :  { %v190_v28 = vpop.f32.mrf.mxu0 }
  0x9b   :  { %v5066_v29 = vadd.f32 %v190_v28, %v132_v27  ;;  %v205_v43 = vpop.f32.mrf.mxu3 }
  0x9c   :  { %v5121_v44 = vadd.f32 %v205_v43, %v137_v42 }
  0x9d   :  { %4224 = vmatmul.msk.f32.gmra.mxu1 %vm229_vm2, %v5066_v29  ;;  %4232 = vmatmul.msk.f32.gmra.mxu2 %vm229_vm2, %v5066_v29 }
  0x9e   :  { %4240 = vmatmul.msk.f32.gmra.mxu3 %vm229_vm2, %v5066_v29 }
  0xa2   :  { %v193_v31 = vpop.f32.mrf.mxu0 }
  0xa3   :  { %v5077_v32 = vadd.f32 %v193_v31, %v133_v30 }
  0xa5   :  { %4225 = vmatmul.msk.f32.gmra.mxu1 %vm229_vm2, %v5077_v32  ;;  %4233 = vmatmul.msk.f32.gmra.mxu2 %vm229_vm2, %v5077_v32 }
  0xa6   :  { %4241 = vmatmul.msk.f32.gmra.mxu3 %vm229_vm2, %v5077_v32 }
  0xad   :  { %4226 = vmatmul.msk.f32.gmra.mxu1 %vm229_vm2, %v5088_v35  ;;  %4234 = vmatmul.msk.f32.gmra.mxu2 %vm229_vm2, %v5088_v35 }
  0xae   :  { %4242 = vmatmul.msk.f32.gmra.mxu3 %vm229_vm2, %v5088_v35 }
  0xb5   :  { %4227 = vmatmul.msk.f32.gmra.mxu1 %vm229_vm2, %v5099_v38  ;;  %4235 = vmatmul.msk.f32.gmra.mxu2 %vm229_vm2, %v5099_v38 }
  0xb6   :  { %4243 = vmatmul.msk.f32.gmra.mxu3 %vm229_vm2, %v5099_v38 }
  0xbd   :  { %4228 = vmatmul.msk.f32.gmra.mxu1 %vm229_vm2, %v5110_v41  ;;  %4236 = vmatmul.msk.f32.gmra.mxu2 %vm229_vm2, %v5110_v41 }
  0xbe   :  { %4244 = vmatmul.msk.f32.gmra.mxu3 %vm229_vm2, %v5110_v41 }
  0xc5   :  { %4229 = vmatmul.msk.f32.gmra.mxu1 %vm229_vm2, %v5121_v44  ;;  %4237 = vmatmul.msk.f32.gmra.mxu2 %vm229_vm2, %v5121_v44 }
  0xc6   :  { %4245 = vmatmul.msk.f32.gmra.mxu3 %vm229_vm2, %v5121_v44 }
 0x110   :  { %v5129_v45 = vpop.f32.mrf.mxu2 }
 0x111   :  { %v5131_v46 = vpop.f32.mrf.mxu3 }
 0x112   :  { %v5226_v36 = vadd.f32 %v4542_v62, %v5131_v46 }
 0x118   :  { %v5133_v47 = vpop.f32.mrf.mxu2 }
 0x119   :  { %v360_v48 = vpop.f32.mrf.mxu3 }
 0x11a   :  { %v5216_v31 = vadd.f32 %v4542_v62, %v360_v48 }
 0x11c   :  { %v737_v46 = vmul.f32 %v5159_v4, %v5216_v31  ;;  %v568_v48 = vmul.f32 %v5164_v6, %v5216_v31 }
 0x120   :  { %v5135_v49 = vpop.f32.mrf.mxu2 }
 0x121   :  { %v363_v50 = vpop.f32.mrf.mxu3 }
 0x122   :  { %v5202_v22 = vadd.f32 %v4542_v62, %v363_v50  ;;  %v271_v50 = vpop.f32.mrf.mxu1 }
 0x124   :  { %v738_v37 = vmul.f32 %v5159_v4, %v5202_v22  ;;  %v569_v39 = vmul.f32 %v5164_v6, %v5202_v22 }
 0x128   :  { %v5137_v51 = vpop.f32.mrf.mxu2 }
 0x129   :  { %v366_v52 = vpop.f32.mrf.mxu3  ;;  %v5240_v43 = vadd.f32 %v5147_v61, %v5137_v51  ;;  %v736_v51 = vmul.f32 %v5159_v4, %v5226_v36 }
 0x12a   :  { %v5194_v19 = vadd.f32 %v4542_v62, %v366_v52  ;;  %v5249_v52 = vsel %vm118_vm9, 1.0, %v4957_v3 }
 0x12c   :  { %v739_v33 = vmul.f32 %v5159_v4, %v5194_v19  ;;  %v570_v34 = vmul.f32 %v5164_v6, %v5194_v19 }
 0x130   :  { %v326_v53 = vpop.f32.mrf.mxu2 }
 0x131   :  { %v369_v54 = vpop.f32.mrf.mxu3  ;;  %v5209_v27 = vadd.f32 %v5147_v61, %v326_v53  ;;  %v567_v53 = vmul.f32 %v5164_v6, %v5226_v36 }
 0x132   :  { %v5181_v13 = vadd.f32 %v4542_v62, %v369_v54 }
 0x133   :  { %v385_v40 = vmul.f32 %v5164_v6, %v5209_v27  ;;  %v579_v42 = vmul.f32 %v5159_v4, %v5209_v27 }
 0x134   :  { %v740_v24 = vmul.f32 %v5159_v4, %v5181_v13  ;;  %v571_v25 = vmul.f32 %v5164_v6, %v5181_v13 }
 0x138   :  { %v329_v55 = vpop.f32.mrf.mxu2 }
 0x139   :  { %v372_v56 = vpop.f32.mrf.mxu3  ;;  %v5188_v16 = vadd.f32 %v5147_v61, %v329_v55 }
 0x13a   :  { %v5173_v10 = vadd.f32 %v4542_v62, %v372_v56  ;;  %v5261_v56 = vadd.f32 %v5147_v61, %v5135_v49 }
 0x13b   :  { %v386_v28 = vmul.f32 %v5164_v6, %v5188_v16  ;;  %v580_v30 = vmul.f32 %v5159_v4, %v5188_v16 }
 0x13c   :  { %v741_v20 = vmul.f32 %v5159_v4, %v5173_v10  ;;  %v572_v21 = vmul.f32 %v5164_v6, %v5173_v10 }
 0x140   :  { %v332_v58 = vpop.f32.mrf.mxu2 }
 0x141   :  { %v375_v60 = vpop.f32.mrf.mxu3  ;;  %v5167_v7 = vadd.f32 %v5147_v61, %v332_v58  ;;  %v384_v58 = vmul.f32 %v5164_v6, %v5240_v43 }
 0x142   :  { %v5156_v2 = vadd.f32 %v4542_v62, %v375_v60  ;;  %v578_v60 = vmul.f32 %v5159_v4, %v5240_v43 }
 0x143   :  { %v387_v17 = vmul.f32 %v5164_v6, %v5167_v7  ;;  %v581_v18 = vmul.f32 %v5159_v4, %v5167_v7  ;;  %v1122_v49 = vmul.f32 %v5249_v52, %v5167_v7 }
 0x144   :  { %v742_v14 = vmul.f32 %v5159_v4, %v5156_v2  ;;  %v573_v15 = vmul.f32 %v5164_v6, %v5156_v2 }
 0x148   :  { %v335_v63 = vpop.f32.mrf.mxu2 }
 0x149   :  { %v5154_v0 = vadd.f32 %v5147_v61, %v335_v63  ;;  %v378_v1 = vpop.f32.mrf.mxu3  ;;  %v1282_v63 = vmul.f32 %v5249_v52, %v5173_v10 }
 0x14a   :  { %v5161_v5 = vadd.f32 %v4542_v62, %v378_v1  ;;  %v1283_v62 = vmul.f32 %v5249_v52, %v5156_v2  ;;  %v5278_v1 = vadd.f32 %v5147_v61, %v5133_v47  ;;  %v1121_v47 = vmul.f32 %v5249_v52, %v5188_v16 }
 0x14b   :  { %v582_v8 = vmul.f32 %v5159_v4, %v5154_v0  ;;  %v388_v9 = vmul.f32 %v5164_v6, %v5154_v0  ;;  %v1123_v54 = vmul.f32 %v5249_v52, %v5154_v0 }
 0x14c   :  { %v743_v11 = vmul.f32 %v5159_v4, %v5161_v5  ;;  %v574_v12 = vmul.f32 %v5164_v6, %v5161_v5  ;;  %v1284_v55 = vmul.f32 %v5249_v52, %v5161_v5 }
 0x14d   :  { %4246 = vmatpush.xpose.msk.msrb.mxu0 %vm229_vm2, %v388_v9  ;;  %4262 = vmatpush.xpose.msk.msra.mxu1 %vm229_vm2, %v582_v8  ;;  %v383_v8 = vmul.f32 %v5164_v6, %v5261_v56  ;;  %v577_v9 = vmul.f32 %v5159_v4, %v5261_v56 }
 0x14e   :  { %776 = vmatpush.msra.mxu2 %v743_v11  ;;  %841 = vmatpush.msra.mxu3 %v574_v12  ;;  %v1281_v11 = vmul.f32 %v5249_v52, %v5181_v13  ;;  %v1280_v12 = vmul.f32 %v5249_v52, %v5194_v19 }
 0x150   :  { %777 = vmatpush.msra.mxu2 %v742_v14  ;;  %842 = vmatpush.msra.mxu3 %v573_v15  ;;  %v5297_v14 = vadd.f32 %v5147_v61, %v5129_v45  ;;  %v274_v15 = vpop.f32.mrf.mxu1  ;;  %v5311_v45 = vld [vmem:[%s7401_s5] ss:$0 sm:$0xff]  ;;  %v1120_v61 = vmul.f32 %v5249_v52, %v5209_v27 }
 0x151   :  { %4247 = vmatpush.xpose.msk.msrb.mxu0 %vm229_vm2, %v387_v17  ;;  %4263 = vmatpush.xpose.msk.msra.mxu1 %vm229_vm2, %v581_v18  ;;  %v382_v17 = vmul.f32 %v5164_v6, %v5278_v1  ;;  %v576_v18 = vmul.f32 %v5159_v4, %v5278_v1 }
 0x152   :  { %778 = vmatpush.msra.mxu2 %v741_v20  ;;  %843 = vmatpush.msra.mxu3 %v572_v21  ;;  %v1279_v20 = vmul.f32 %v5249_v52, %v5202_v22  ;;  %v1278_v21 = vmul.f32 %v5249_v52, %v5216_v31 }
 0x154   :  { %779 = vmatpush.msra.mxu2 %v740_v24  ;;  %844 = vmatpush.msra.mxu3 %v571_v25  ;;  %v5318_v24 = vsel %vm113_vm12, 1.0, %v4957_v3  ;;  %v381_v25 = vmul.f32 %v5164_v6, %v5297_v14  ;;  %v1277_v3 = vmul.f32 %v5249_v52, %v5226_v36 }
 0x155   :  { %4248 = vmatpush.xpose.msk.msrb.mxu0 %vm229_vm2, %v386_v28  ;;  %4264 = vmatpush.xpose.msk.msra.mxu1 %vm229_vm2, %v580_v30  ;;  %v575_v28 = vmul.f32 %v5159_v4, %v5297_v14  ;;  %v881_v30 = vmul.f32 %v5318_v24, %v5154_v0  ;;  %v1041_v0 = vmul.f32 %v5318_v24, %v5156_v2 }
 0x156   :  { %780 = vmatpush.msra.mxu2 %v739_v33  ;;  %845 = vmatpush.msra.mxu3 %v570_v34  ;;  %v1042_v33 = vmul.f32 %v5318_v24, %v5161_v5  ;;  %v5334_v34 = vadd.f32 %v5311_v45, %v271_v50  ;;  %v1119_v5 = vmul.f32 %v5249_v52, %v5240_v43 }
 0x157   :  { %v1039_v2 = vmul.f32 %v5318_v24, %v5181_v13  ;;  %v1037_v13 = vmul.f32 %v5318_v24, %v5202_v22  ;;  %v1035_v50 = vmul.f32 %v5318_v24, %v5226_v36  ;;  %v875_v36 = vmul.f32 %v5318_v24, %v5278_v1 }
 0x158   :  { %781 = vmatpush.msra.mxu2 %v738_v37  ;;  %846 = vmatpush.msra.mxu3 %v569_v39  ;;  %v880_v37 = vmul.f32 %v5318_v24, %v5167_v7  ;;  %v277_v39 = vpop.f32.mrf.mxu1  ;;  %v1038_v7 = vmul.f32 %v5318_v24, %v5194_v19  ;;  %v1036_v19 = vmul.f32 %v5318_v24, %v5216_v31 }
 0x159   :  { %4249 = vmatpush.xpose.msk.msrb.mxu0 %vm229_vm2, %v385_v40  ;;  %4265 = vmatpush.xpose.msk.msra.mxu1 %vm229_vm2, %v579_v42  ;;  %v1040_v40 = vmul.f32 %v5318_v24, %v5173_v10  ;;  %v1118_v42 = vmul.f32 %v5249_v52, %v5261_v56  ;;  %v5361_v10 = vadd.f32 %v5311_v45, %v274_v15 }
 0x15a   :  { %782 = vmatpush.msra.mxu2 %v737_v46  ;;  %847 = vmatpush.msra.mxu3 %v568_v48  ;;  %v879_v46 = vmul.f32 %v5318_v24, %v5188_v16  ;;  %v1117_v48 = vmul.f32 %v5249_v52, %v5278_v1  ;;  %v878_v16 = vmul.f32 %v5318_v24, %v5209_v27 }
 0x15b   :  { %v5386_v27 = vadd.f32 %v5311_v45, %v277_v39  ;;  %v876_v31 = vmul.f32 %v5318_v24, %v5261_v56 }
 0x15c   :  { %783 = vmatpush.msra.mxu2 %v736_v51  ;;  %848 = vmatpush.msra.mxu3 %v567_v53  ;;  %v1116_v51 = vmul.f32 %v5249_v52, %v5297_v14  ;;  %v877_v53 = vmul.f32 %v5318_v24, %v5240_v43 }
 0x15d   :  { %4250 = vmatpush.xpose.msk.msrb.mxu0 %vm229_vm2, %v384_v58  ;;  %4266 = vmatpush.xpose.msk.msra.mxu1 %vm229_vm2, %v578_v60 }
 0x15e   :  { %4318 = vmatpush.xpose.msk.msrb.mxu2 %vm229_vm2, %v1123_v54  ;;  %1317 = vmatpush.msrb.mxu3 %v1284_v55  ;;  %v874_v55 = vmul.f32 %v5318_v24, %v5297_v14  ;;  %v4958_v14 = vmov -1e+30  }
 0x160   :  { %1318 = vmatpush.msrb.mxu3 %v1283_v62  ;;  %v280_v22 = vpop.f32.mrf.mxu1 }
 0x161   :  { %4251 = vmatpush.xpose.msk.msrb.mxu0 %vm229_vm2, %v383_v8  ;;  %4267 = vmatpush.xpose.msk.msra.mxu1 %vm229_vm2, %v577_v9  ;;  %v5399_v54 = vadd.f32 %v5311_v45, %v280_v22  ;;  %v59_v8 = vshrl.u32 %v58_v57, 7 }
 0x162   :  { %4319 = vmatpush.xpose.msk.msrb.mxu2 %vm229_vm2, %v1122_v49  ;;  %1319 = vmatpush.msrb.mxu3 %v1282_v63 }
 0x163   :  { %v69_v9 = vsub.s32 %v59_v8, %v5140_v59  ;;  %v63_v39 = vadd.s32 32, %v59_v8 }
 0x164   :  { %1320 = vmatpush.msrb.mxu3 %v1281_v11 }
 0x165   :  { %4252 = vmatpush.xpose.msk.msrb.mxu0 %vm229_vm2, %v382_v17  ;;  %4268 = vmatpush.xpose.msk.msra.mxu1 %vm229_vm2, %v576_v18  ;;  %v77_v11 = vand.u32 7, %v69_v9  ;;  %v61_v18 = vadd.s32 16, %v59_v8  ;;  %v66_v9 = vadd.s32 56, %v59_v8 }
 0x166   :  { %4320 = vmatpush.xpose.msk.msrb.mxu2 %vm229_vm2, %v1121_v47  ;;  %1321 = vmatpush.msrb.mxu3 %v1280_v12  ;;  %v60_v47 = vadd.s32 8, %v59_v8 }
 0x167   :  { %vm85_vm13 = vcmp.eq.s32.totalorder %v77_v11, 0 }
 0x168   :  { %1322 = vmatpush.msrb.mxu3 %v1279_v20  ;;  %v283_v43 = vpop.f32.mrf.mxu1  ;;  %v70_v12 = vsub.s32 %v60_v47, %v5140_v59  ;;  %v5457_v15 = vsel %vm85_vm13, 0.0, %v4958_v14 }
 0x169   :  { %4253 = vmatpush.xpose.msk.msrb.mxu0 %vm229_vm2, %v381_v25  ;;  %4269 = vmatpush.xpose.msk.msra.mxu1 %vm229_vm2, %v575_v28  ;;  %v5410_v56 = vadd.f32 %v5311_v45, %v283_v43  ;;  %v62_v28 = vadd.s32 24, %v59_v8 }
 0x16a   :  { %4321 = vmatpush.xpose.msk.msrb.mxu2 %vm229_vm2, %v1120_v61  ;;  %1323 = vmatpush.msrb.mxu3 %v1278_v21  ;;  %v78_v17 = vand.u32 7, %v70_v12  ;;  %v71_v61 = vsub.s32 %v61_v18, %v5140_v59 }
 0x16c   :  { %1324 = vmatpush.msrb.mxu3 %v1277_v3  ;;  %4254 = vmatmul.msk.f32.vlgmr.msrb.gmra.mxu0 %vm229_vm2, %v5334_v34  ;;  %vm86_vm15 = vcmp.eq.s32.totalorder %v78_v17, 0  ;;  %v79_v25 = vand.u32 7, %v71_v61  ;;  %v76_v17 = vsub.s32 %v66_v9, %v5140_v59 }
 0x16d   :  { %4294 = vmatpush.xpose.msk.msra.mxu0 %vm229_vm2, %v881_v30  ;;  %1075 = vmatpush.msrb.mxu1 %v1042_v33  ;;  %v5466_v21 = vsel %vm86_vm15, 0.0, %v4958_v14 }
 0x16e   :  { %4270 = vmatmul.msk.f32.vlgmr.msra.gmra.mxu1 %vm229_vm2, %v5334_v34  ;;  %4322 = vmatpush.xpose.msk.msrb.mxu2 %vm229_vm2, %v1119_v5  ;;  %vm87_vm0 = vcmp.eq.s32.totalorder %v79_v25, 0 }
 0x16f   :  { %1076 = vmatpush.msrb.mxu1 %v1041_v0  ;;  %v72_v0 = vsub.s32 %v62_v28, %v5140_v59  ;;  %v5472_v5 = vsel %vm87_vm0, 0.0, %v4958_v14 }
 0x170   :  { %v286_v58 = vpop.f32.mrf.mxu1 }
 0x171   :  { %4295 = vmatpush.xpose.msk.msra.mxu0 %vm229_vm2, %v880_v37  ;;  %1077 = vmatpush.msrb.mxu1 %v1040_v40  ;;  %v5417_v60 = vadd.f32 %v5311_v45, %v286_v58  ;;  %v80_v37 = vand.u32 7, %v72_v0 }
 0x172   :  { %4323 = vmatpush.xpose.msk.msrb.mxu2 %vm229_vm2, %v1118_v42 }
 0x173   :  { %1078 = vmatpush.msrb.mxu1 %v1039_v2  ;;  %vm88_vm1 = vcmp.eq.s32.totalorder %v80_v37, 0 }
 0x174   :  { %4255 = vmatmul.msk.f32.gmra.mxu0 %vm229_vm2, %v5361_v10 }
 0x175   :  { %4296 = vmatpush.xpose.msk.msra.mxu0 %vm229_vm2, %v879_v46  ;;  %1079 = vmatpush.msrb.mxu1 %v1038_v7  ;;  %v73_v46 = vsub.s32 %v63_v39, %v5140_v59  ;;  %v5478_v7 = vsel %vm88_vm1, 0.0, %v4958_v14 }
 0x176   :  { %4271 = vmatmul.msk.f32.gmra.mxu1 %vm229_vm2, %v5361_v10  ;;  %4324 = vmatpush.xpose.msk.msrb.mxu2 %vm229_vm2, %v1117_v48  ;;  %v64_v48 = vadd.s32 40, %v59_v8 }
 0x177   :  { %1080 = vmatpush.msrb.mxu1 %v1037_v13  ;;  %v81_v13 = vand.u32 7, %v73_v46 }
 0x178   :  { %v289_v62 = vpop.f32.mrf.mxu1 }
 0x179   :  { %4297 = vmatpush.xpose.msk.msra.mxu0 %vm229_vm2, %v878_v16  ;;  %1081 = vmatpush.msrb.mxu1 %v1036_v19  ;;  %v5424_v49 = vadd.f32 %v5311_v45, %v289_v62  ;;  %vm89_vm3 = vcmp.eq.s32.totalorder %v81_v13, 0 }
 0x17a   :  { %4325 = vmatpush.xpose.msk.msrb.mxu2 %vm229_vm2, %v1116_v51  ;;  %v5484_v51 = vsel %vm89_vm3, 0.0, %v4958_v14 }
 0x17b   :  { %1082 = vmatpush.msrb.mxu1 %v1035_v50  ;;  %v74_v50 = vsub.s32 %v64_v48, %v5140_v59 }
 0x17c   :  { %4256 = vmatmul.msk.f32.gmra.mxu0 %vm229_vm2, %v5386_v27 }
 0x17d   :  { %4298 = vmatpush.xpose.msk.msra.mxu0 %vm229_vm2, %v877_v53  ;;  %v82_v53 = vand.u32 7, %v74_v50 }
 0x17e   :  { %4272 = vmatmul.msk.f32.gmra.mxu1 %vm229_vm2, %v5386_v27 }
 0x17f   :  { %vm90_vm4 = vcmp.eq.s32.totalorder %v82_v53, 0 }
 0x180   :  { %v292_v63 = vpop.f32.mrf.mxu1  ;;  %v5490_v62 = vsel %vm90_vm4, 0.0, %v4958_v14 }
 0x181   :  { %4299 = vmatpush.xpose.msk.msra.mxu0 %vm229_vm2, %v876_v31  ;;  %v5431_v1 = vadd.f32 %v5311_v45, %v292_v63  ;;  %v65_v31 = vadd.s32 48, %v59_v8 }
 0x183   :  { %v75_v58 = vsub.s32 %v65_v31, %v5140_v59 }
 0x184   :  { %4257 = vmatmul.msk.f32.gmra.mxu0 %vm229_vm2, %v5399_v54 }
 0x185   :  { %4300 = vmatpush.xpose.msk.msra.mxu0 %vm229_vm2, %v875_v36  ;;  %v83_v63 = vand.u32 7, %v75_v58 }
 0x186   :  { %4273 = vmatmul.msk.f32.gmra.mxu1 %vm229_vm2, %v5399_v54 }
 0x187   :  { %vm91_vm5 = vcmp.eq.s32.totalorder %v83_v63, 0 }
 0x188   :  { %v5496_v18 = vsel %vm91_vm5, 0.0, %v4958_v14 }
 0x189   :  { %4301 = vmatpush.xpose.msk.msra.mxu0 %vm229_vm2, %v874_v55 }
 0x18c   :  { %4258 = vmatmul.msk.f32.gmra.mxu0 %vm229_vm2, %v5410_v56 }
 0x18e   :  { %4274 = vmatmul.msk.f32.gmra.mxu1 %vm229_vm2, %v5410_v56 }
 0x194   :  { %4259 = vmatmul.msk.f32.gmra.mxu0 %vm229_vm2, %v5417_v60 }
 0x196   :  { %4275 = vmatmul.msk.f32.gmra.mxu1 %vm229_vm2, %v5417_v60 }
 0x19c   :  { %4260 = vmatmul.msk.f32.gmra.mxu0 %vm229_vm2, %v5424_v49 }
 0x19e   :  { %4276 = vmatmul.msk.f32.gmra.mxu1 %vm229_vm2, %v5424_v49 }
 0x1a4   :  { %4261 = vmatmul.msk.f32.gmra.mxu0 %vm229_vm2, %v5431_v1 }
 0x1a6   :  { %4277 = vmatmul.msk.f32.gmra.mxu1 %vm229_vm2, %v5431_v1 }
 0x1ac   :  { %4302 = vmatmul.msk.f32.vlgmr.msra.gmra.mxu0 %vm229_vm2, %v5334_v34 }
 0x1b4   :  { %4303 = vmatmul.msk.f32.gmra.mxu0 %vm229_vm2, %v5361_v10 }
 0x1bc   :  { %4304 = vmatmul.msk.f32.gmra.mxu0 %vm229_vm2, %v5386_v27 }
 0x1c4   :  { %4305 = vmatmul.msk.f32.gmra.mxu0 %vm229_vm2, %v5399_v54 }
 0x1cc   :  { %4306 = vmatmul.msk.f32.gmra.mxu0 %vm229_vm2, %v5410_v56 }
 0x1d4   :  { %4307 = vmatmul.msk.f32.gmra.mxu0 %vm229_vm2, %v5417_v60 }
 0x1dc   :  { %4308 = vmatmul.msk.f32.gmra.mxu0 %vm229_vm2, %v5424_v49 }
 0x1e4   :  { %4309 = vmatmul.msk.f32.gmra.mxu0 %vm229_vm2, %v5431_v1 }
 0x1eb   :  { %v624_v57 = vpop.f32.mrf.mxu1 }
 0x1ec   :  { %v5460_v20 = vadd.f32 %v624_v57, %v5457_v15  ;;  %v84_v57 = vand.u32 7, %v76_v17 }
 0x1ee   :  { %v648_v45 = vsel %vm478_vm14, %v5460_v20, -inf  ;;  %vm92_vm6 = vcmp.eq.s32.totalorder %v84_v57, 0 }
 0x1ef   :  { %649 = vmax.xlane.f32.xlu0 %v648_v45  ;;  %v5501_v8 = vsel %vm92_vm6, 0.0, %v4958_v14 }
 0x1f3   :  { %v627_v30 = vpop.f32.mrf.mxu1 }
 0x1f4   :  { %v628_v33 = vadd.f32 %v627_v30, %v5466_v21 }
 0x1f6   :  { %v651_v3 = vsel %vm478_vm14, %v628_v33, -inf }
 0x1f7   :  { %652 = vmax.xlane.f32.xlu0 %v651_v3 }
 0x1fb   :  { %v630_v40 = vpop.f32.mrf.mxu1 }
 0x1fc   :  { %v631_v2 = vadd.f32 %v630_v40, %v5472_v5 }
 0x1fe   :  { %v654_v42 = vsel %vm478_vm14, %v631_v2, -inf }
 0x1ff   :  { %655 = vmax.xlane.f32.xlu1 %v654_v42  ;;  %v454_v42 = vpop.f32.mrf.mxu0 }
 0x203   :  { %v633_v16 = vpop.f32.mrf.mxu1 }
 0x204   :  { %v634_v19 = vadd.f32 %v633_v16, %v5478_v7 }
 0x206   :  { %v657_v22 = vsel %vm478_vm14, %v634_v19, -inf }
 0x207   :  { %658 = vmax.xlane.f32.xlu1 %v657_v22  ;;  %v457_v53 = vpop.f32.mrf.mxu0 }
 0x20b   :  { %v636_v36 = vpop.f32.mrf.mxu1 }
 0x20c   :  { %v637_v43 = vadd.f32 %v636_v36, %v5484_v51 }
 0x20e   :  { %v660_v55 = vsel %vm478_vm14, %v637_v43, -inf }
 0x20f   :  { %661 = vmax.xlane.f32.xlu2 %v660_v55 }
 0x213   :  { %v639_v11 = vpop.f32.mrf.mxu1 }
 0x214   :  { %v640_v47 = vadd.f32 %v639_v11, %v5490_v62 }
 0x216   :  { %v663_v12 = vsel %vm478_vm14, %v640_v47, -inf }
 0x217   :  { %664 = vmax.xlane.f32.xlu2 %v663_v12 }
 0x21b   :  { %v642_v45 = vpop.f32.mrf.mxu1 }
 0x21c   :  { %v643_v61 = vadd.f32 %v642_v45, %v5496_v18 }
 0x21e   :  { %v666_v25 = vsel %vm478_vm14, %v643_v61, -inf }
 0x21f   :  { %667 = vmax.xlane.f32.xlu0 %v666_v25 }
 0x223   :  { %v645_v28 = vpop.f32.mrf.mxu1 }
 0x224   :  { %v646_v30 = vadd.f32 %v645_v28, %v5501_v8 }
 0x226   :  { %v669_v59 = vsel %vm478_vm14, %v646_v30, -inf }
 0x227   :  { %670 = vmax.xlane.f32.xlu2 %v669_v59 }
 0x262   :  { %v650_v3 = vpop.xlane.xlu0 %649 }
 0x263   :  { %v672_v0 = vsub.f32 %v5460_v20, %v650_v3 }
 0x265   :  { %v680_v37 = vmul.f32 1.442695, %v672_v0 }
 0x267   :  { %4563 = vpow2.f32 %v680_v37 }
 0x26a   :  { %v653_v39 = vpop.xlane.xlu0 %652 }
 0x26b   :  { %v673_v40 = vsub.f32 %v628_v33, %v653_v39 }
 0x26d   :  { %v5506_v46 = vpop.eup %4563  ;;  %v682_v13 = vmul.f32 1.442695, %v673_v40 }
 0x26e   :  { %v696_v14 = vsel %vm478_vm14, %v5506_v46, 0.0 }
 0x26f   :  { %4565 = vpow2.f32 %v682_v13  ;;  %697 = vadd.xlane.f32.xlu1 %v696_v14 }
 0x272   :  { %v656_v48 = vpop.xlane.xlu1 %655 }
 0x273   :  { %v674_v16 = vsub.f32 %v631_v2, %v656_v48  ;;  %v460_v2 = vpop.f32.mrf.mxu0 }
 0x275   :  { %v5510_v22 = vpop.eup %4565  ;;  %v684_v50 = vmul.f32 1.442695, %v674_v16 }
 0x276   :  { %v699_v20 = vsel %vm478_vm14, %v5510_v22, 0.0 }
 0x277   :  { %4567 = vpow2.f32 %v684_v50  ;;  %700 = vadd.xlane.f32.xlu0 %v699_v20 }
 0x27a   :  { %v659_v33 = vpop.xlane.xlu1 %658 }
 0x27b   :  { %v675_v31 = vsub.f32 %v634_v19, %v659_v33  ;;  %v463_v19 = vpop.f32.mrf.mxu0  ;;  %v5540_v33 = vadd.f32 %v457_v53, %v5466_v21  ;;  %v5554_v53 = vadd.f32 %v460_v2, %v5472_v5 }
 0x27d   :  { %v5514_v36 = vpop.eup %4567  ;;  %v686_v55 = vmul.f32 1.442695, %v675_v31 }
 0x27e   :  { %v702_v58 = vsel %vm478_vm14, %v5514_v36, 0.0 }
 0x27f   :  { %4569 = vpow2.f32 %v686_v55  ;;  %703 = vadd.xlane.f32.xlu1 %v702_v58  ;;  %v482_v55 = vsel %vm478_vm14, %v5540_v33, -inf }
 0x282   :  { %v662_v63 = vpop.xlane.xlu2 %661 }
 0x283   :  { %v676_v9 = vsub.f32 %v637_v43, %v662_v63  ;;  %v466_v0 = vpop.f32.mrf.mxu0 }
 0x285   :  { %v5518_v11 = vpop.eup %4569  ;;  %v688_v12 = vmul.f32 1.442695, %v676_v9  ;;  %v5557_v9 = vadd.f32 %v466_v0, %v5484_v51 }
 0x286   :  { %v705_v17 = vsel %vm478_vm14, %v5518_v11, 0.0 }
 0x287   :  { %4571 = vpow2.f32 %v688_v12  ;;  %706 = vadd.xlane.f32.xlu2 %v705_v17  ;;  %v485_v17 = vsel %vm478_vm14, %v5554_v53, -inf }
 0x28a   :  { %v665_v57 = vpop.xlane.xlu2 %664 }
 0x28b   :  { %v677_v45 = vsub.f32 %v640_v47, %v665_v57  ;;  %v5531_v47 = vadd.f32 %v454_v42, %v5457_v15  ;;  %v469_v50 = vpop.f32.mrf.mxu0  ;;  %v5543_v42 = vadd.f32 %v463_v19, %v5478_v7  ;;  %v491_v19 = vsel %vm478_vm14, %v5557_v9, -inf }
 0x28c   :  { %v5569_v2 = vadd.f32 %v469_v50, %v5490_v62 }
 0x28d   :  { %v5522_v25 = vpop.eup %4571  ;;  %v690_v28 = vmul.f32 1.442695, %v677_v45  ;;  %v479_v20 = vsel %vm478_vm14, %v5531_v47, -inf  ;;  %v488_v58 = vsel %vm478_vm14, %v5543_v42, -inf }
 0x28e   :  { %v708_v59 = vsel %vm478_vm14, %v5522_v25, 0.0  ;;  %v494_v45 = vsel %vm478_vm14, %v5569_v2, -inf }
 0x28f   :  { %4573 = vpow2.f32 %v690_v28  ;;  %709 = vadd.xlane.f32.xlu0 %v708_v59 }
 0x292   :  { %v668_v43 = vpop.xlane.xlu0 %667 }
 0x293   :  { %v678_v3 = vsub.f32 %v643_v61, %v668_v43  ;;  %v472_v63 = vpop.f32.mrf.mxu0 }
 0x294   :  { %v5560_v12 = vadd.f32 %v472_v63, %v5496_v18 }
 0x295   :  { %v5526_v37 = vpop.eup %4573  ;;  %v692_v39 = vmul.f32 1.442695, %v678_v3 }
 0x296   :  { %v711_v40 = vsel %vm478_vm14, %v5526_v37, 0.0  ;;  %v497_v57 = vsel %vm478_vm14, %v5560_v12, -inf }
 0x297   :  { %4575 = vpow2.f32 %v692_v39  ;;  %712 = vadd.xlane.f32.xlu1 %v711_v40 }
 0x29a   :  { %v671_v13 = vpop.xlane.xlu2 %670 }
 0x29b   :  { %v679_v14 = vsub.f32 %v646_v30, %v671_v13  ;;  %v475_v28 = vpop.f32.mrf.mxu0 }
 0x29c   :  { %v5574_v59 = vadd.f32 %v475_v28, %v5501_v8 }
 0x29d   :  { %v5533_v48 = vpop.eup %4575  ;;  %v694_v16 = vmul.f32 1.442695, %v679_v14 }
 0x29e   :  { %v714_v61 = vsel %vm478_vm14, %v5533_v48, 0.0  ;;  %v500_v43 = vsel %vm478_vm14, %v5574_v59, -inf }
 0x29f   :  { %4577 = vpow2.f32 %v694_v16  ;;  %715 = vadd.xlane.f32.xlu2 %v714_v61  ;;  %480 = vmax.xlane.f32.xlu1 %v479_v20 }
 0x2a5   :  { %v5545_v30 = vpop.eup %4577 }
 0x2a6   :  { %v717_v31 = vsel %vm478_vm14, %v5545_v30, 0.0 }
 0x2a7   :  { %718 = vadd.xlane.f32.xlu0 %v717_v31  ;;  %483 = vmax.xlane.f32.xlu2 %v482_v55 }
 0x2a8   :  { %489 = vmax.xlane.f32.xlu1 %v488_v58 }
 0x2af   :  { %486 = vmax.xlane.f32.xlu0 %v485_v17  ;;  %492 = vmax.xlane.f32.xlu2 %v491_v19 }
 0x2b0   :  { %498 = vmax.xlane.f32.xlu1 %v497_v57 }
 0x2b7   :  { %495 = vmax.xlane.f32.xlu0 %v494_v45 }
 0x2bf   :  { %501 = vmax.xlane.f32.xlu0 %v500_v43 }
 0x2e2   :  { %v698_v3 = vpop.xlane.xlu1 %697 }
 0x2e3   :  { %4579 = vrcp.f32 %v698_v3 }
 0x2e9   :  { %v4580_v0 = vpop.eup %4579 }
 0x2ea   :  { %v728_v39 = vmul.f32 %v4580_v0, %v5506_v46  ;;  %v701_v40 = vpop.xlane.xlu0 %700  ;;  %v923_v0 = vpop.f32.mrf.mxu0 }
 0x2eb   :  { %4581 = vrcp.f32 %v701_v40 }
 0x2ec   :  { %4278 = vmatmul.msk.f32.vlgmr.msra.gmra.mxu2 %vm478_vm14, %v728_v39 }
 0x2f1   :  { %v4582_v13 = vpop.eup %4581 }
 0x2f2   :  { %v704_v14 = vpop.xlane.xlu1 %703  ;;  %v729_v16 = vmul.f32 %v4582_v13, %v5510_v22 }
 0x2f3   :  { %4583 = vrcp.f32 %v704_v14 }
 0x2f4   :  { %4279 = vmatmul.msk.f32.gmra.mxu2 %vm478_vm14, %v729_v16 }
 0x2f9   :  { %v4584_v50 = vpop.eup %4583 }
 0x2fa   :  { %v707_v61 = vpop.xlane.xlu2 %706  ;;  %v730_v20 = vmul.f32 %v4584_v50, %v5514_v36 }
 0x2fb   :  { %4585 = vrcp.f32 %v707_v61  ;;  %v926_v61 = vpop.f32.mrf.mxu0 }
 0x2fc   :  { %4280 = vmatmul.msk.f32.gmra.mxu2 %vm478_vm14, %v730_v20 }
 0x301   :  { %v4586_v31 = vpop.eup %4585 }
 0x302   :  { %v710_v46 = vpop.xlane.xlu0 %709  ;;  %v731_v55 = vmul.f32 %v4586_v31, %v5518_v11 }
 0x303   :  { %4587 = vrcp.f32 %v710_v46 }
 0x304   :  { %4281 = vmatmul.msk.f32.gmra.mxu2 %vm478_vm14, %v731_v55 }
 0x309   :  { %v4588_v58 = vpop.eup %4587 }
 0x30a   :  { %v713_v63 = vpop.xlane.xlu1 %712  ;;  %v732_v22 = vmul.f32 %v4588_v58, %v5522_v25  ;;  %v5607_v58 = vadd.f32 %v923_v0, %v5457_v15 }
 0x30b   :  { %4589 = vrcp.f32 %v713_v63 }
 0x30c   :  { %4282 = vmatmul.msk.f32.gmra.mxu2 %vm478_vm14, %v732_v22  ;;  %v947_v22 = vsel %vm478_vm14, %v5607_v58, -inf }
 0x311   :  { %v4590_v17 = vpop.eup %4589 }
 0x312   :  { %v716_v19 = vpop.xlane.xlu2 %715  ;;  %v481_v36 = vpop.xlane.xlu1 %480  ;;  %v733_v57 = vmul.f32 %v4590_v17, %v5526_v37 }
 0x313   :  { %4591 = vrcp.f32 %v716_v19  ;;  %v503_v45 = vsub.f32 %v5531_v47, %v481_v36  ;;  %v929_v17 = vpop.f32.mrf.mxu0  ;;  %v5619_v36 = vadd.f32 %v926_v61, %v5466_v21 }
 0x314   :  { %4283 = vmatmul.msk.f32.gmra.mxu2 %vm478_vm14, %v733_v57 }
 0x315   :  { %v511_v11 = vmul.f32 1.442695, %v503_v45  ;;  %v950_v45 = vsel %vm478_vm14, %v5619_v36, -inf }
 0x317   :  { %4593 = vpow2.f32 %v511_v11 }
 0x319   :  { %v4592_v28 = vpop.eup %4591 }
 0x31a   :  { %v719_v43 = vpop.xlane.xlu0 %718  ;;  %v484_v3 = vpop.xlane.xlu2 %483  ;;  %v734_v25 = vmul.f32 %v4592_v28, %v5533_v48 }
 0x31b   :  { %4595 = vrcp.f32 %v719_v43  ;;  %v504_v39 = vsub.f32 %v5540_v33, %v484_v3  ;;  %v490_v14 = vpop.xlane.xlu1 %489  ;;  %v932_v28 = vpop.f32.mrf.mxu0  ;;  %v5631_v3 = vadd.f32 %v929_v17, %v5472_v5 }
 0x31c   :  { %4284 = vmatmul.msk.f32.gmra.mxu2 %vm478_vm14, %v734_v25  ;;  %v506_v20 = vsub.f32 %v5543_v42, %v490_v14 }
 0x31d   :  { %v5594_v40 = vpop.eup %4593  ;;  %v513_v37 = vmul.f32 1.442695, %v504_v39 }
 0x31e   :  { %v527_v47 = vsel %vm478_vm14, %v5594_v40, 0.0  ;;  %v517_v55 = vmul.f32 1.442695, %v506_v20 }
 0x31f   :  { %4597 = vpow2.f32 %v513_v37  ;;  %528 = vadd.xlane.f32.xlu2 %v527_v47  ;;  %v5643_v47 = vadd.f32 %v932_v28, %v5478_v7 }
 0x321   :  { %v4596_v13 = vpop.eup %4595 }
 0x322   :  { %v487_v16 = vpop.xlane.xlu0 %486  ;;  %v735_v50 = vmul.f32 %v4596_v13, %v5545_v30  ;;  %v493_v30 = vpop.xlane.xlu2 %492 }
 0x323   :  { %v505_v48 = vsub.f32 %v5554_v53, %v487_v16  ;;  %v507_v63 = vsub.f32 %v5557_v9, %v493_v30  ;;  %v499_v25 = vpop.xlane.xlu1 %498  ;;  %v935_v16 = vpop.f32.mrf.mxu0 }
 0x324   :  { %4285 = vmatmul.msk.f32.gmra.mxu2 %vm478_vm14, %v735_v50  ;;  %v5655_v61 = vadd.f32 %v935_v16, %v5484_v51 }
 0x325   :  { %v5601_v33 = vpop.eup %4597  ;;  %v515_v31 = vmul.f32 1.442695, %v505_v48  ;;  %v519_v19 = vmul.f32 1.442695, %v507_v63 }
 0x326   :  { %v530_v46 = vsel %vm478_vm14, %v5601_v33, 0.0 }
 0x327   :  { %4599 = vpow2.f32 %v515_v31  ;;  %531 = vadd.xlane.f32.xlu1 %v530_v46 }
 0x328   :  { %4601 = vpow2.f32 %v517_v55 }
 0x329   :  { %4603 = vpow2.f32 %v519_v19 }
 0x32a   :  { %v496_v57 = vpop.xlane.xlu0 %495 }
 0x32b   :  { %v508_v9 = vsub.f32 %v5569_v2, %v496_v57  ;;  %v953_v2 = vsel %vm478_vm14, %v5631_v3, -inf }
 0x32c   :  { %4326 = vmatmul.msk.f32.vlgmr.msrb.gmra.mxu2 %vm229_vm2, %v5334_v34 }
 0x32d   :  { %v5611_v53 = vpop.eup %4599  ;;  %v521_v43 = vmul.f32 1.442695, %v508_v9 }
 0x32e   :  { %v533_v42 = vsel %vm478_vm14, %v5611_v53, 0.0  ;;  %v5621_v34 = vpop.eup %4601 }
 0x32f   :  { %534 = vadd.xlane.f32.xlu0 %v533_v42  ;;  %948 = vmax.xlane.f32.xlu1 %v947_v22  ;;  %v536_v11 = vsel %vm478_vm14, %v5621_v34, 0.0  ;;  %v5633_v0 = vpop.eup %4603  ;;  %4605 = vpow2.f32 %v521_v43 }
 0x330   :  { %v539_v39 = vsel %vm478_vm14, %v5633_v0, 0.0 }
 0x332   :  { %v502_v13 = vpop.xlane.xlu0 %501 }
 0x334   :  { %4327 = vmatmul.msk.f32.gmra.mxu2 %vm229_vm2, %v5361_v10  ;;  %v509_v10 = vsub.f32 %v5560_v12, %v499_v25  ;;  %v956_v12 = vsel %vm478_vm14, %v5643_v47, -inf }
 0x335   :  { %v5645_v14 = vpop.eup %4605 }
 0x336   :  { %v523_v37 = vmul.f32 1.442695, %v509_v10  ;;  %v542_v50 = vsel %vm478_vm14, %v5645_v14, 0.0 }
 0x337   :  { %951 = vmax.xlane.f32.xlu1 %v950_v45  ;;  %537 = vadd.xlane.f32.xlu0 %v536_v11 }
 0x338   :  { %4607 = vpow2.f32 %v523_v37 }
 0x33c   :  { %4328 = vmatmul.msk.f32.gmra.mxu2 %vm229_vm2, %v5386_v27  ;;  %v510_v27 = vsub.f32 %v5574_v59, %v502_v13  ;;  %v959_v59 = vsel %vm478_vm14, %v5655_v61, -inf }
 0x33e   :  { %v525_v48 = vmul.f32 1.442695, %v510_v27  ;;  %v5657_v20 = vpop.eup %4607 }
 0x33f   :  { %954 = vmax.xlane.f32.xlu1 %v953_v2  ;;  %540 = vadd.xlane.f32.xlu0 %v539_v39  ;;  %v545_v31 = vsel %vm478_vm14, %v5657_v20, 0.0 }
 0x340   :  { %4609 = vpow2.f32 %v525_v48 }
 0x344   :  { %4329 = vmatmul.msk.f32.gmra.mxu2 %vm229_vm2, %v5399_v54  ;;  %v938_v54 = vpop.f32.mrf.mxu0 }
 0x345   :  { %v5666_v46 = vadd.f32 %v938_v54, %v5490_v62 }
 0x346   :  { %v5668_v55 = vpop.eup %4609 }
 0x347   :  { %957 = vmax.xlane.f32.xlu1 %v956_v12  ;;  %543 = vadd.xlane.f32.xlu0 %v542_v50  ;;  %v548_v30 = vsel %vm478_vm14, %v5668_v55, 0.0 }
 0x34c   :  { %4330 = vmatmul.msk.f32.gmra.mxu2 %vm229_vm2, %v5410_v56  ;;  %v962_v56 = vsel %vm478_vm14, %v5666_v46, -inf  ;;  %v941_v63 = vpop.f32.mrf.mxu0 }
 0x34d   :  { %v5677_v42 = vadd.f32 %v941_v63, %v5496_v18 }
 0x34f   :  { %960 = vmax.xlane.f32.xlu1 %v959_v59  ;;  %546 = vadd.xlane.f32.xlu0 %v545_v31  ;;  %v965_v22 = vsel %vm478_vm14, %v5677_v42, -inf }
 0x354   :  { %4331 = vmatmul.msk.f32.gmra.mxu2 %vm229_vm2, %v5417_v60 }
 0x357   :  { %963 = vmax.xlane.f32.xlu1 %v962_v56  ;;  %549 = vadd.xlane.f32.xlu0 %v548_v30 }
 0x35c   :  { %4332 = vmatmul.msk.f32.gmra.mxu2 %vm229_vm2, %v5424_v49 }
 0x35f   :  { %966 = vmax.xlane.f32.xlu0 %v965_v22 }
 0x364   :  { %4333 = vmatmul.msk.f32.gmra.mxu2 %vm229_vm2, %v5431_v1 }
 0x36f   :  { %v5685_v60 = vpop.f32.mrf.mxu2 }
 0x377   :  { %v5687_v17 = vpop.f32.mrf.mxu2 }
 0x37f   :  { %v5689_v19 = vpop.f32.mrf.mxu2 }
 0x387   :  { %v5691_v57 = vpop.f32.mrf.mxu2 }
 0x38f   :  { %v5693_v9 = vpop.f32.mrf.mxu2 }
 0x392   :  { %v529_v45 = vpop.xlane.xlu2 %528 }
 0x393   :  { %4611 = vrcp.f32 %v529_v45 }
 0x397   :  { %v5695_v49 = vpop.f32.mrf.mxu2 }
 0x399   :  { %v4612_v11 = vpop.eup %4611 }
 0x39a   :  { %v559_v28 = vmul.f32 %v4612_v11, %v5594_v40  ;;  %v532_v43 = vpop.xlane.xlu1 %531 }
 0x39b   :  { %4613 = vrcp.f32 %v532_v43 }
 0x39c   :  { %4286 = vmatmul.msk.f32.vlgmr.msra.gmra.mxu3 %vm478_vm14, %v559_v28 }
 0x39f   :  { %v5699_v1 = vpop.f32.mrf.mxu2 }
 0x3a1   :  { %v4614_v25 = vpop.eup %4613 }
 0x3a2   :  { %v535_v10 = vpop.xlane.xlu0 %534  ;;  %v560_v2 = vmul.f32 %v4614_v25, %v5601_v33 }
 0x3a3   :  { %4615 = vrcp.f32 %v535_v10 }
 0x3a4   :  { %4287 = vmatmul.msk.f32.gmra.mxu3 %vm478_vm14, %v560_v2 }
 0x3a7   :  { %v5703_v39 = vpop.f32.mrf.mxu2 }
 0x3a9   :  { %v4616_v37 = vpop.eup %4615 }
 0x3aa   :  { %v538_v13 = vpop.xlane.xlu0 %537  ;;  %v561_v16 = vmul.f32 %v4616_v37, %v5611_v53 }
 0x3ab   :  { %4617 = vrcp.f32 %v538_v13 }
 0x3ac   :  { %4288 = vmatmul.msk.f32.gmra.mxu3 %vm478_vm14, %v561_v16 }
 0x3af   :  { %v1165_v40 = vpop.f32.mrf.mxu2 }
 0x3b0   :  { %v5708_v27 = vadd.f32 %v1165_v40, %v5457_v15 }
 0x3b1   :  { %v4618_v12 = vpop.eup %4617 }
 0x3b2   :  { %v541_v50 = vpop.xlane.xlu0 %540  ;;  %v1189_v33 = vsel %vm478_vm14, %v5708_v27, -inf  ;;  %v562_v48 = vmul.f32 %v4618_v12, %v5621_v34 }
 0x3b3   :  { %4619 = vrcp.f32 %v541_v50  ;;  %1190 = vmax.xlane.f32.xlu2 %v1189_v33  ;;  %v949_v50 = vpop.xlane.xlu1 %948 }
 0x3b4   :  { %4289 = vmatmul.msk.f32.gmra.mxu3 %vm478_vm14, %v562_v48  ;;  %v971_v48 = vsub.f32 %v5607_v58, %v949_v50 }
 0x3b7   :  { %v1168_v54 = vpop.f32.mrf.mxu2 }
 0x3b8   :  { %v5715_v53 = vadd.f32 %v1168_v54, %v5466_v21 }
 0x3b9   :  { %v4620_v59 = vpop.eup %4619 }
 0x3ba   :  { %v544_v31 = vpop.xlane.xlu0 %543  ;;  %v1192_v56 = vsel %vm478_vm14, %v5715_v53, -inf  ;;  %v563_v30 = vmul.f32 %v4620_v59, %v5633_v0  ;;  %v979_v59 = vmul.f32 1.442695, %v971_v48 }
 0x3bb   :  { %4621 = vrcp.f32 %v544_v31  ;;  %1193 = vmax.xlane.f32.xlu2 %v1192_v56  ;;  %v952_v31 = vpop.xlane.xlu1 %951 }
 0x3bc   :  { %4290 = vmatmul.msk.f32.gmra.mxu3 %vm478_vm14, %v563_v30 }
 0x3bf   :  { %v1171_v34 = vpop.f32.mrf.mxu2 }
 0x3c0   :  { %v5722_v63 = vadd.f32 %v1171_v34, %v5472_v5 }
 0x3c1   :  { %v4622_v22 = vpop.eup %4621 }
 0x3c2   :  { %v547_v45 = vpop.xlane.xlu0 %546  ;;  %v1195_v11 = vsel %vm478_vm14, %v5722_v63, -inf  ;;  %v564_v28 = vmul.f32 %v4622_v22, %v5645_v14 }
 0x3c3   :  { %4623 = vrcp.f32 %v547_v45  ;;  %1196 = vmax.xlane.f32.xlu2 %v1195_v11 }
 0x3c4   :  { %4291 = vmatmul.msk.f32.gmra.mxu3 %vm478_vm14, %v564_v28 }
 0x3c7   :  { %v1174_v0 = vpop.f32.mrf.mxu2 }
 0x3c8   :  { %v5729_v43 = vadd.f32 %v1174_v0, %v5478_v7 }
 0x3c9   :  { %v4624_v25 = vpop.eup %4623 }
 0x3ca   :  { %v550_v10 = vpop.xlane.xlu0 %549  ;;  %v1198_v2 = vsel %vm478_vm14, %v5729_v43, -inf  ;;  %v565_v37 = vmul.f32 %v4624_v25, %v5657_v20 }
 0x3cb   :  { %4625 = vrcp.f32 %v550_v10  ;;  %1199 = vmax.xlane.f32.xlu2 %v1198_v2 }
 0x3cc   :  { %4292 = vmatmul.msk.f32.gmra.mxu3 %vm478_vm14, %v565_v37  ;;  %4627 = vpow2.f32 %v979_v59  ;;  %v955_v37 = vpop.xlane.xlu1 %954  ;;  %v944_v59 = vpop.f32.mrf.mxu0 }
 0x3cd   :  { %v973_v50 = vsub.f32 %v5631_v3, %v955_v37 }
 0x3cf   :  { %v1177_v14 = vpop.f32.mrf.mxu2 }
 0x3d0   :  { %v5736_v13 = vadd.f32 %v1177_v14, %v5484_v51 }
 0x3d1   :  { %v4626_v16 = vpop.eup %4625 }
 0x3d2   :  { %v1201_v40 = vsel %vm478_vm14, %v5736_v13, -inf  ;;  %v566_v12 = vmul.f32 %v4626_v16, %v5668_v55  ;;  %v972_v55 = vsub.f32 %v5619_v36, %v952_v31  ;;  %v5754_v45 = vpop.eup %4627  ;;  %v983_v31 = vmul.f32 1.442695, %v973_v50 }
 0x3d3   :  { %1202 = vmax.xlane.f32.xlu2 %v1201_v40  ;;  %v995_v0 = vsel %vm478_vm14, %v5754_v45, 0.0 }
 0x3d4   :  { %4293 = vmatmul.msk.f32.gmra.mxu3 %vm478_vm14, %v566_v12  ;;  %v981_v22 = vmul.f32 1.442695, %v972_v55  ;;  %v958_v48 = vpop.xlane.xlu1 %957 }
 0x3d5   :  { %v974_v3 = vsub.f32 %v5643_v47, %v958_v48 }
 0x3d6   :  { %4629 = vpow2.f32 %v981_v22 }
 0x3d7   :  { %v1180_v33 = vpop.f32.mrf.mxu2 }
 0x3d8   :  { %v5743_v20 = vadd.f32 %v1180_v33, %v5490_v62 }
 0x3da   :  { %v1204_v54 = vsel %vm478_vm14, %v5743_v20, -inf }
 0x3db   :  { %1205 = vmax.xlane.f32.xlu2 %v1204_v54 }
 0x3dc   :  { %v5763_v36 = vpop.eup %4629 }
 0x3dd   :  { %v998_v25 = vsel %vm478_vm14, %v5763_v36, 0.0 }
 0x3df   :  { %v1183_v56 = vpop.f32.mrf.mxu2 }
 0x3e0   :  { %v5749_v30 = vadd.f32 %v1183_v56, %v5496_v18 }
 0x3e2   :  { %v1207_v34 = vsel %vm478_vm14, %v5749_v30, -inf }
 0x3e3   :  { %1208 = vmax.xlane.f32.xlu2 %v1207_v34 }
 0x3e7   :  { %v1186_v58 = vpop.f32.mrf.mxu2 }
 0x3e8   :  { %v5757_v11 = vadd.f32 %v1186_v58, %v5501_v8 }
 0x3ea   :  { %v1210_v28 = vsel %vm478_vm14, %v5757_v11, -inf }
 0x3eb   :  { %1211 = vmax.xlane.f32.xlu0 %v1210_v28  ;;  %996 = vadd.xlane.f32.xlu2 %v995_v0  ;;  %v961_v28 = vpop.xlane.xlu1 %960  ;;  %v985_v0 = vmul.f32 1.442695, %v974_v3  ;;  %v967_v3 = vpop.xlane.xlu0 %966 }
 0x3ec   :  { %v975_v47 = vsub.f32 %v5655_v61, %v961_v28 }
 0x3f3   :  { %999 = vadd.xlane.f32.xlu0 %v998_v25  ;;  %v964_v50 = vpop.xlane.xlu1 %963 }
 0x3f4   :  { %v976_v61 = vsub.f32 %v5666_v46, %v964_v50  ;;  %v977_v46 = vsub.f32 %v5677_v42, %v967_v3 }
 0x426   :  { %v1191_v10 = vpop.xlane.xlu2 %1190 }
 0x427   :  { %v1213_v2 = vsub.f32 %v5708_v27, %v1191_v10  ;;  %v5775_v27 = vadd.f32 %v944_v59, %v5501_v8 }
 0x429   :  { %v1221_v14 = vmul.f32 1.442695, %v1213_v2  ;;  %v968_v22 = vsel %vm478_vm14, %v5775_v27, -inf }
 0x42b   :  { %4631 = vpow2.f32 %v1221_v14 }
 0x42e   :  { %v1194_v16 = vpop.xlane.xlu2 %1193 }
 0x42f   :  { %v1214_v40 = vsub.f32 %v5715_v53, %v1194_v16 }
 0x431   :  { %v5769_v12 = vpop.eup %4631  ;;  %v1223_v33 = vmul.f32 1.442695, %v1214_v40  ;;  %v987_v40 = vmul.f32 1.442695, %v975_v47 }
 0x432   :  { %v1237_v54 = vsel %vm478_vm14, %v5769_v12, 0.0 }
 0x433   :  { %4633 = vpow2.f32 %v1223_v33  ;;  %1238 = vadd.xlane.f32.xlu1 %v1237_v54 }
 0x434   :  { %4635 = vpow2.f32 %v983_v31 }
 0x436   :  { %v1197_v56 = vpop.xlane.xlu2 %1196 }
 0x437   :  { %v1215_v55 = vsub.f32 %v5722_v63, %v1197_v56 }
 0x439   :  { %v5778_v53 = vpop.eup %4633  ;;  %v1225_v34 = vmul.f32 1.442695, %v1215_v55  ;;  %v989_v55 = vmul.f32 1.442695, %v976_v61 }
 0x43a   :  { %v1240_v58 = vsel %vm478_vm14, %v5778_v53, 0.0  ;;  %v5785_v10 = vpop.eup %4635 }
 0x43b   :  { %4637 = vpow2.f32 %v1225_v34  ;;  %969 = vmax.xlane.f32.xlu1 %v968_v22  ;;  %1241 = vadd.xlane.f32.xlu2 %v1240_v58  ;;  %v1001_v16 = vsel %vm478_vm14, %v5785_v10, 0.0 }
 0x43c   :  { %4639 = vpow2.f32 %v985_v0 }
 0x43e   :  { %v1200_v25 = vpop.xlane.xlu2 %1199 }
 0x43f   :  { %v1216_v63 = vsub.f32 %v5729_v43, %v1200_v25 }
 0x441   :  { %v5788_v2 = vpop.eup %4637  ;;  %v1227_v37 = vmul.f32 1.442695, %v1216_v63  ;;  %v991_v63 = vmul.f32 1.442695, %v977_v46 }
 0x442   :  { %v1243_v14 = vsel %vm478_vm14, %v5788_v2, 0.0  ;;  %v5795_v48 = vpop.eup %4639 }
 0x443   :  { %4641 = vpow2.f32 %v1227_v37  ;;  %1244 = vadd.xlane.f32.xlu1 %v1243_v14  ;;  %1002 = vadd.xlane.f32.xlu2 %v1001_v16  ;;  %v1004_v56 = vsel %vm478_vm14, %v5795_v48, 0.0 }
 0x444   :  { %4643 = vpow2.f32 %v987_v40 }
 0x446   :  { %v1203_v33 = vpop.xlane.xlu2 %1202 }
 0x447   :  { %v1217_v43 = vsub.f32 %v5736_v13, %v1203_v33 }
 0x449   :  { %v5798_v54 = vpop.eup %4641  ;;  %v1229_v59 = vmul.f32 1.442695, %v1217_v43 }
 0x44a   :  { %v1246_v31 = vsel %vm478_vm14, %v5798_v54, 0.0  ;;  %v5805_v22 = vpop.eup %4643 }
 0x44b   :  { %4645 = vpow2.f32 %v1229_v59  ;;  %1247 = vadd.xlane.f32.xlu0 %v1246_v31  ;;  %1005 = vadd.xlane.f32.xlu1 %v1004_v56  ;;  %v1007_v25 = vsel %vm478_vm14, %v5805_v22, 0.0 }
 0x44c   :  { %4647 = vpow2.f32 %v989_v55 }
 0x44e   :  { %v1206_v34 = vpop.xlane.xlu2 %1205 }
 0x44f   :  { %v1218_v13 = vsub.f32 %v5743_v20, %v1206_v34 }
 0x451   :  { %v5808_v58 = vpop.eup %4645  ;;  %v1231_v28 = vmul.f32 1.442695, %v1218_v13 }
 0x452   :  { %v1249_v0 = vsel %vm478_vm14, %v5808_v58, 0.0  ;;  %v5815_v37 = vpop.eup %4647 }
 0x453   :  { %4649 = vpow2.f32 %v1231_v28  ;;  %1250 = vadd.xlane.f32.xlu2 %v1249_v0  ;;  %1008 = vadd.xlane.f32.xlu0 %v1007_v25  ;;  %v1010_v40 = vsel %vm478_vm14, %v5815_v37, 0.0 }
 0x454   :  { %4651 = vpow2.f32 %v991_v63 }
 0x456   :  { %v1209_v47 = vpop.xlane.xlu2 %1208 }
 0x457   :  { %v1219_v20 = vsub.f32 %v5749_v30, %v1209_v47 }
 0x459   :  { %v5818_v14 = vpop.eup %4649  ;;  %v1233_v42 = vmul.f32 1.442695, %v1219_v20 }
 0x45a   :  { %v1252_v16 = vsel %vm478_vm14, %v5818_v14, 0.0  ;;  %v5824_v43 = vpop.eup %4651 }
 0x45b   :  { %4653 = vpow2.f32 %v1233_v42  ;;  %1253 = vadd.xlane.f32.xlu1 %v1252_v16  ;;  %1011 = vadd.xlane.f32.xlu2 %v1010_v40  ;;  %v1013_v31 = vsel %vm478_vm14, %v5824_v43, 0.0 }
 0x45e   :  { %v1212_v50 = vpop.xlane.xlu0 %1211  ;;  %v997_v33 = vpop.xlane.xlu2 %996 }
 0x45f   :  { %v1220_v61 = vsub.f32 %v5757_v11, %v1212_v50  ;;  %4655 = vrcp.f32 %v997_v33 }
 0x461   :  { %v5827_v30 = vpop.eup %4653  ;;  %v1235_v59 = vmul.f32 1.442695, %v1220_v61 }
 0x462   :  { %v1255_v56 = vsel %vm478_vm14, %v5827_v30, 0.0 }
 0x463   :  { %4657 = vpow2.f32 %v1235_v59  ;;  %1014 = vadd.xlane.f32.xlu1 %v1013_v31  ;;  %1256 = vadd.xlane.f32.xlu0 %v1255_v56 }
 0x465   :  { %v4656_v55 = vpop.eup %4655 }
 0x466   :  { %v1027_v3 = vmul.f32 %v4656_v55, %v5754_v45  ;;  %v1000_v34 = vpop.xlane.xlu0 %999 }
 0x467   :  { %4659 = vrcp.f32 %v1000_v34 }
 0x468   :  { %4310 = vmatmul.msk.f32.vlgmr.msrb.gmra.mxu1 %vm478_vm14, %v1027_v3 }
 0x469   :  { %v5835_v11 = vpop.eup %4657 }
 0x46a   :  { %v1258_v13 = vsel %vm478_vm14, %v5835_v11, 0.0 }
 0x46b   :  { %1259 = vadd.xlane.f32.xlu2 %v1258_v13 }
 0x46d   :  { %v4660_v46 = vpop.eup %4659 }
 0x46e   :  { %v1028_v28 = vmul.f32 %v4660_v46, %v5763_v36 }
 0x470   :  { %4311 = vmatmul.msk.f32.gmra.mxu1 %vm478_vm14, %v1028_v28 }
 0x4a6   :  { %v1239_v0 = vpop.xlane.xlu1 %1238 }
 0x4a7   :  { %4661 = vrcp.f32 %v1239_v0 }
 0x4ad   :  { %v4662_v25 = vpop.eup %4661 }
 0x4ae   :  { %v1269_v45 = vmul.f32 %v4662_v25, %v5769_v12  ;;  %v1242_v63 = vpop.xlane.xlu2 %1241  ;;  %v970_v47 = vpop.xlane.xlu1 %969 }
 0x4af   :  { %4663 = vrcp.f32 %v1242_v63  ;;  %v978_v20 = vsub.f32 %v5775_v27, %v970_v47  ;;  %v226_v63 = vld [vmem:[#allocation2 + $0x78] sm:$0xff] }
 0x4b0   :  { %4334 = vmatmul.msk.f32.vlgmr.msrb.gmra.mxu3 %vm478_vm14, %v1269_v45  ;;  %1396 = vmatpush.msrb.mxu0 %v226_v63 }
 0x4b1   :  { %v993_v42 = vmul.f32 1.442695, %v978_v20 }
 0x4b3   :  { %4665 = vpow2.f32 %v993_v42 }
 0x4b5   :  { %v4664_v16 = vpop.eup %4663 }
 0x4b6   :  { %v1003_v40 = vpop.xlane.xlu2 %1002  ;;  %v1245_v50 = vpop.xlane.xlu1 %1244  ;;  %v1270_v36 = vmul.f32 %v4664_v16, %v5778_v53 }
 0x4b7   :  { %4667 = vrcp.f32 %v1003_v40 }
 0x4b8   :  { %4669 = vrcp.f32 %v1245_v50  ;;  %4335 = vmatmul.msk.f32.gmra.mxu3 %vm478_vm14, %v1270_v36 }
 0x4b9   :  { %v5846_v33 = vpop.eup %4665 }
 0x4ba   :  { %v1016_v12 = vsel %vm478_vm14, %v5846_v33, 0.0 }
 0x4bb   :  { %1017 = vadd.xlane.f32.xlu0 %v1016_v12 }
 0x4bd   :  { %v4668_v27 = vpop.eup %4667 }
 0x4be   :  { %v4670_v61 = vpop.eup %4669  ;;  %v1248_v59 = vpop.xlane.xlu0 %1247  ;;  %v1029_v56 = vmul.f32 %v4668_v27, %v5785_v10 }
 0x4bf   :  { %v1006_v31 = vpop.xlane.xlu1 %1005  ;;  %4671 = vrcp.f32 %v1248_v59  ;;  %v1271_v55 = vmul.f32 %v4670_v61, %v5788_v2  ;;  %v850_v61 = vpop.f32.mrf.mxu3 }
 0x4c0   :  { %4673 = vrcp.f32 %v1006_v31  ;;  %4312 = vmatmul.msk.f32.gmra.mxu1 %vm478_vm14, %v1029_v56 }
 0x4c1   :  { %4336 = vmatmul.msk.f32.gmra.mxu3 %vm478_vm14, %v1271_v55 }
 0x4c5   :  { %v4672_v53 = vpop.eup %4671 }
 0x4c6   :  { %v4674_v3 = vpop.eup %4673  ;;  %v1251_v34 = vpop.xlane.xlu2 %1250  ;;  %v1272_v46 = vmul.f32 %v4672_v53, %v5798_v54  ;;  %v225_v54 = vld [vmem:[#allocation2 + $0x70] sm:$0xff]  ;;  %v224_v53 = vld [vmem:[#allocation2 + $0x68] sm:$0xff] }
 0x4c7   :  { %v1009_v13 = vpop.xlane.xlu0 %1008  ;;  %4675 = vrcp.f32 %v1251_v34  ;;  %v1030_v28 = vmul.f32 %v4674_v3, %v5795_v48  ;;  %1397 = vmatpush.msrb.mxu0 %v225_v54  ;;  %v853_v59 = vpop.f32.mrf.mxu3  ;;  %v223_v3 = vld [vmem:[#allocation2 + $0x60] sm:$0xff] }
 0x4c8   :  { %4677 = vrcp.f32 %v1009_v13  ;;  %v854_v63 = vadd.f32 %v853_v59, %v5687_v17 }
 0x4c9   :  { %4313 = vmatmul.msk.f32.gmra.mxu1 %vm478_vm14, %v1030_v28  ;;  %4337 = vmatmul.msk.f32.gmra.mxu3 %vm478_vm14, %v1272_v46  ;;  %v851_v28 = vadd.f32 %v850_v61, %v5685_v60 }
 0x4ca   :  { %1398 = vmatpush.msrb.mxu0 %v224_v53 }
 0x4cc   :  { %1399 = vmatpush.msrb.mxu0 %v223_v3 }
 0x4cd   :  { %v4676_v10 = vpop.eup %4675 }
 0x4ce   :  { %v4678_v2 = vpop.eup %4677  ;;  %v1012_v0 = vpop.xlane.xlu2 %1011  ;;  %v1273_v45 = vmul.f32 %v4676_v10, %v5808_v58 }
 0x4cf   :  { %v1254_v25 = vpop.xlane.xlu1 %1253  ;;  %4679 = vrcp.f32 %v1012_v0  ;;  %v1031_v47 = vmul.f32 %v4678_v2, %v5805_v22  ;;  %v856_v31 = vpop.f32.mrf.mxu3 }
 0x4d0   :  { %4681 = vrcp.f32 %v1254_v25  ;;  %v857_v60 = vadd.f32 %v856_v31, %v5689_v19 }
 0x4d1   :  { %4314 = vmatmul.msk.f32.gmra.mxu1 %vm478_vm14, %v1031_v47  ;;  %4338 = vmatmul.msk.f32.gmra.mxu3 %vm478_vm14, %v1273_v45 }
 0x4d5   :  { %v4680_v48 = vpop.eup %4679 }
 0x4d6   :  { %v4682_v20 = vpop.eup %4681  ;;  %v1257_v42 = vpop.xlane.xlu0 %1256  ;;  %v1032_v40 = vmul.f32 %v4680_v48, %v5815_v37 }
 0x4d7   :  { %v1015_v16 = vpop.xlane.xlu1 %1014  ;;  %4683 = vrcp.f32 %v1257_v42  ;;  %v1274_v58 = vmul.f32 %v4682_v20, %v5818_v14  ;;  %v859_v56 = vpop.f32.mrf.mxu3 }
 0x4d8   :  { %4685 = vrcp.f32 %v1015_v16 }
 0x4d9   :  { %4315 = vmatmul.msk.f32.gmra.mxu1 %vm478_vm14, %v1032_v40  ;;  %4339 = vmatmul.msk.f32.gmra.mxu3 %vm478_vm14, %v1274_v58 }
 0x4dd   :  { %v4684_v22 = vpop.eup %4683 }
 0x4de   :  { %v4686_v50 = vpop.eup %4685  ;;  %v1260_v36 = vpop.xlane.xlu2 %1259  ;;  %v1275_v12 = vmul.f32 %v4684_v22, %v5827_v30 }
 0x4df   :  { %4687 = vrcp.f32 %v1260_v36  ;;  %v1033_v27 = vmul.f32 %v4686_v50, %v5824_v43  ;;  %v862_v55 = vpop.f32.mrf.mxu3 }
 0x4e1   :  { %4316 = vmatmul.msk.f32.gmra.mxu1 %vm478_vm14, %v1033_v27  ;;  %4340 = vmatmul.msk.f32.gmra.mxu3 %vm478_vm14, %v1275_v12  ;;  %v863_v12 = vadd.f32 %v862_v55, %v5693_v9  ;;  %v4543_v9 = vld [vmem:[%s7401_s5 + $0x3] ss:$0 sm:$0xff] }
 0x4e5   :  { %v4688_v37 = vpop.eup %4687  ;;  %v1084_v13 = vpop.f32.mrf.mxu1 }
 0x4e6   :  { %v1276_v14 = vmul.f32 %v4688_v37, %v5835_v11  ;;  %v1108_v10 = vadd.f32 %v1084_v13, %v851_v28 }
 0x4e7   :  { %v865_v30 = vpop.f32.mrf.mxu3 }
 0x4e9   :  { %4341 = vmatmul.msk.f32.gmra.mxu3 %vm478_vm14, %v1276_v14  ;;  %v866_v14 = vadd.f32 %v865_v30, %v5695_v49 }
 0x4ed   :  { %v1087_v25 = vpop.f32.mrf.mxu1 }
 0x4ee   :  { %v1109_v47 = vadd.f32 %v1087_v25, %v854_v63 }
 0x4ef   :  { %v868_v43 = vpop.f32.mrf.mxu3 }
 0x4f7   :  { %v871_v34 = vpop.f32.mrf.mxu3 }
 0x4f8   :  { %v872_v49 = vadd.f32 %v871_v34, %v5703_v39 }
 0x52e   :  { %v1018_v46 = vpop.xlane.xlu0 %1017 }
 0x52f   :  { %4689 = vrcp.f32 %v1018_v46 }
 0x533   :  { %v1326_v11 = vpop.f32.mrf.mxu3 }
 0x534   :  { %v1350_v2 = vadd.f32 %v1326_v11, %v1108_v10 }
 0x535   :  { %v4690_v0 = vpop.eup %4689 }
 0x536   :  { %4342 = vmatmul.msk.f32.vlgmr.msrb.gmra.mxu0 %vm229_vm2, %v1350_v2  ;;  %v1034_v45 = vmul.f32 %v4690_v0, %v5846_v33  ;;  %v860_v33 = vadd.f32 %v859_v56, %v5691_v57  ;;  %v869_v56 = vadd.f32 %v868_v43, %v5699_v1 }
 0x538   :  { %4317 = vmatmul.msk.f32.gmra.mxu1 %vm478_vm14, %v1034_v45 }
 0x53b   :  { %v1329_v54 = vpop.f32.mrf.mxu3 }
 0x53c   :  { %v1351_v48 = vadd.f32 %v1329_v54, %v1109_v47 }
 0x53d   :  { %v1090_v20 = vpop.f32.mrf.mxu1 }
 0x53e   :  { %4343 = vmatmul.msk.f32.gmra.mxu0 %vm229_vm2, %v1351_v48  ;;  %v1110_v42 = vadd.f32 %v1090_v20, %v857_v60 }
 0x544   :  { %v1332_v16 = vpop.f32.mrf.mxu3 }
 0x545   :  { %v1352_v40 = vadd.f32 %v1332_v16, %v1110_v42 }
 0x546   :  { %v1093_v58 = vpop.f32.mrf.mxu1 }
 0x547   :  { %4344 = vmatmul.msk.f32.gmra.mxu0 %vm229_vm2, %v1352_v40  ;;  %v1111_v22 = vadd.f32 %v1093_v58, %v860_v33 }
 0x54c   :  { %v1335_v17 = vpop.f32.mrf.mxu3 }
 0x54d   :  { %v1353_v50 = vadd.f32 %v1335_v17, %v1111_v22 }
 0x54e   :  { %v1096_v36 = vpop.f32.mrf.mxu1 }
 0x54f   :  { %4345 = vmatmul.msk.f32.gmra.mxu0 %vm229_vm2, %v1353_v50  ;;  %v1112_v27 = vadd.f32 %v1096_v36, %v863_v12  ;;  %v4959_v12 = vmov 32.0  }
 0x550   :  { %4691 = vrcp.f32 %v4959_v12 }
 0x554   :  { %v1338_v37 = vpop.f32.mrf.mxu3 }
 0x555   :  { %v1354_v61 = vadd.f32 %v1338_v37, %v1112_v27 }
 0x556   :  { %v1099_v19 = vpop.f32.mrf.mxu1 }
 0x557   :  { %4346 = vmatmul.msk.f32.gmra.mxu0 %vm229_vm2, %v1354_v61  ;;  %v1113_v59 = vadd.f32 %v1099_v19, %v866_v14 }
 0x55c   :  { %v1341_v31 = vpop.f32.mrf.mxu3 }
 0x55d   :  { %v1355_v53 = vadd.f32 %v1341_v31, %v1113_v59 }
 0x55e   :  { %v1102_v57 = vpop.f32.mrf.mxu1 }
 0x55f   :  { %4347 = vmatmul.msk.f32.gmra.mxu0 %vm229_vm2, %v1355_v53  ;;  %v1114_v3 = vadd.f32 %v1102_v57, %v869_v56 }
 0x564   :  { %v1344_v13 = vpop.f32.mrf.mxu3 }
 0x565   :  { %v1356_v46 = vadd.f32 %v1344_v13, %v1114_v3 }
 0x567   :  { %4348 = vmatmul.msk.f32.gmra.mxu0 %vm229_vm2, %v1356_v46 }
 0x56c   :  { %v1347_v2 = vpop.f32.mrf.mxu3 }
 0x5b3   :  { %v1401_v55 = vpop.f32.mrf.mxu0 }
 0x5b4   :  { %v1402_v30 = vadd.f32 %v4543_v9, %v1401_v55 }
 0x5b5   :  { %v1105_v28 = vpop.f32.mrf.mxu1 }
 0x5b6   :  { %v1115_v10 = vadd.f32 %v1105_v28, %v872_v49  ;;  %v1425_v11 = vadd.f32 %v1402_v30, %v5044_v23 }
 0x5b8   :  { %v1357_v0 = vadd.f32 %v1347_v2, %v1115_v10  ;;  %v1435_v1 = vsel %vm229_vm2, %v1425_v11, 0.0 }
 0x5b9   :  { %1436 = vadd.xlane.f32.xlu1 %v1435_v1 }
 0x5ba   :  { %4349 = vmatmul.msk.f32.gmra.mxu0 %vm229_vm2, %v1357_v0 }
 0x5bb   :  { %v1404_v43 = vpop.f32.mrf.mxu0 }
 0x5bc   :  { %v1405_v25 = vadd.f32 %v4543_v9, %v1404_v43 }
 0x5be   :  { %v1426_v45 = vadd.f32 %v1405_v25, %v5055_v26 }
 0x5c0   :  { %v1438_v63 = vsel %vm229_vm2, %v1426_v45, 0.0 }
 0x5c1   :  { %1439 = vadd.xlane.f32.xlu2 %v1438_v63 }
 0x5c4   :  { %v1407_v39 = vpop.f32.mrf.mxu0 }
 0x5c5   :  { %v1408_v34 = vadd.f32 %v4543_v9, %v1407_v39 }
 0x5c7   :  { %v1427_v47 = vadd.f32 %v1408_v34, %v5066_v29 }
 0x5c9   :  { %v1441_v23 = vsel %vm229_vm2, %v1427_v47, 0.0 }
 0x5ca   :  { %1442 = vadd.xlane.f32.xlu0 %v1441_v23 }
 0x5cc   :  { %v1410_v54 = vpop.f32.mrf.mxu0 }
 0x5cd   :  { %v1411_v48 = vadd.f32 %v4543_v9, %v1410_v54 }
 0x5cf   :  { %v1428_v20 = vadd.f32 %v1411_v48, %v5077_v32 }
 0x5d1   :  { %v1444_v60 = vsel %vm229_vm2, %v1428_v20, 0.0 }
 0x5d2   :  { %1445 = vadd.xlane.f32.xlu1 %v1444_v60 }
 0x5d4   :  { %v1413_v42 = vpop.f32.mrf.mxu0 }
 0x5d5   :  { %v1414_v16 = vadd.f32 %v4543_v9, %v1413_v42 }
 0x5d7   :  { %v1429_v26 = vadd.f32 %v1414_v16, %v5088_v35  ;;  %v4692_v35 = vpop.eup %4691 }
 0x5d8   :  { %v1460_v27 = vmul.f32 32.0, %v4692_v35  ;;  %vm1464_vm7 = vweird.f32 %v4692_v35 }
 0x5d9   :  { %v1447_v40 = vsel %vm229_vm2, %v1429_v26, 0.0 }
 0x5da   :  { %1448 = vadd.xlane.f32.xlu2 %v1447_v40  ;;  %v1461_v37 = vsub.f32 1.0, %v1460_v27 }
 0x5dc   :  { %v1416_v58 = vpop.f32.mrf.mxu0  ;;  %v1462_v61 = vmul.f32 %v4692_v35, %v1461_v37 }
 0x5dd   :  { %v1417_v33 = vadd.f32 %v4543_v9, %v1416_v58 }
 0x5de   :  { %v1463_v19 = vadd.f32 %v4692_v35, %v1462_v61 }
 0x5df   :  { %v1430_v29 = vadd.f32 %v1417_v33, %v5099_v38 }
 0x5e0   :  { %v5907_v14 = vsel %vm1464_vm7, %v4692_v35, %v1463_v19 }
 0x5e1   :  { %v1450_v22 = vsel %vm229_vm2, %v1430_v29, 0.0 }
 0x5e2   :  { %1451 = vadd.xlane.f32.xlu0 %v1450_v22 }
 0x5e4   :  { %v1419_v17 = vpop.f32.mrf.mxu0 }
 0x5e5   :  { %v1420_v50 = vadd.f32 %v4543_v9, %v1419_v17  ;;  %v1637_v17 = vld [vmem:[%s7399_s3 + $0x8] sm:$0xff] }
 0x5e7   :  { %v1431_v32 = vadd.f32 %v1420_v50, %v5110_v41  ;;  %v1636_v50 = vld [vmem:[%s7399_s3] sm:$0xff] }
 0x5e9   :  { %v1453_v36 = vsel %vm229_vm2, %v1431_v32, 0.0 }
 0x5ea   :  { %1454 = vadd.xlane.f32.xlu2 %v1453_v36 }
 0x62c   :  { %v1437_v38 = vpop.xlane.xlu1 %1436 }
 0x62d   :  { %v1466_v59 = vmul.f32 %v5907_v14, %v1437_v38 }
 0x62f   :  { %v5910_v31 = vsub.f32 %v1425_v11, %v1466_v59 }
 0x631   :  { %v1482_v41 = vmul.f32 %v5910_v31, %v5910_v31 }
 0x633   :  { %v1490_v53 = vsel %vm229_vm2, %v1482_v41, 0.0 }
 0x634   :  { %v1440_v57 = vpop.xlane.xlu2 %1439  ;;  %1491 = vadd.xlane.f32.xlu1 %v1490_v53 }
 0x635   :  { %v1467_v56 = vmul.f32 %v5907_v14, %v1440_v57 }
 0x637   :  { %v5916_v3 = vsub.f32 %v1426_v45, %v1467_v56  ;;  %v1422_v13 = vpop.f32.mrf.mxu0 }
 0x638   :  { %v1423_v46 = vadd.f32 %v4543_v9, %v1422_v13 }
 0x639   :  { %v1483_v55 = vmul.f32 %v5916_v3, %v5916_v3 }
 0x63a   :  { %v1432_v49 = vadd.f32 %v1423_v46, %v5121_v44  ;;  %v1639_v44 = vld [vmem:[%s7399_s3 + $0x18] sm:$0xff] }
 0x63b   :  { %v1493_v30 = vsel %vm229_vm2, %v1483_v55, 0.0  ;;  %1678 = vmatpush.msra.mxu1 %v1639_v44  ;;  %v5982_v44 = vld [vmem:[%s7401_s5 + $0x7] ss:$0 sm:$0xff] }
 0x63c   :  { %1494 = vadd.xlane.f32.xlu0 %v1493_v30  ;;  %v1456_v28 = vsel %vm229_vm2, %v1432_v49, 0.0 }
 0x63d   :  { %v1443_v10 = vpop.xlane.xlu0 %1442  ;;  %1457 = vadd.xlane.f32.xlu1 %v1456_v28 }
 0x63e   :  { %v1468_v11 = vmul.f32 %v5907_v14, %v1443_v10 }
 0x640   :  { %v5924_v2 = vsub.f32 %v1427_v47, %v1468_v11 }
 0x642   :  { %v1484_v0 = vmul.f32 %v5924_v2, %v5924_v2 }
 0x644   :  { %v1496_v9 = vsel %vm229_vm2, %v1484_v0, 0.0  ;;  %v5977_v0 = vld [vmem:[%s7401_s5 + $0x6] ss:$0 sm:$0xff] }
 0x645   :  { %1497 = vadd.xlane.f32.xlu2 %v1496_v9  ;;  %v1446_v1 = vpop.xlane.xlu1 %1445 }
 0x646   :  { %v1469_v43 = vmul.f32 %v5907_v14, %v1446_v1 }
 0x648   :  { %v5933_v25 = vsub.f32 %v1428_v20, %v1469_v43 }
 0x64a   :  { %v1485_v45 = vmul.f32 %v5933_v25, %v5933_v25 }
 0x64c   :  { %v1499_v63 = vsel %vm229_vm2, %v1485_v45, 0.0 }
 0x64d   :  { %v1449_v39 = vpop.xlane.xlu2 %1448  ;;  %1500 = vadd.xlane.f32.xlu0 %v1499_v63 }
 0x64e   :  { %v1470_v34 = vmul.f32 %v5907_v14, %v1449_v39 }
 0x650   :  { %v5939_v47 = vsub.f32 %v1429_v26, %v1470_v34 }
 0x652   :  { %v1486_v23 = vmul.f32 %v5939_v47, %v5939_v47 }
 0x654   :  { %v1502_v54 = vsel %vm229_vm2, %v1486_v23, 0.0 }
 0x655   :  { %v1452_v48 = vpop.xlane.xlu0 %1451  ;;  %1503 = vadd.xlane.f32.xlu1 %v1502_v54 }
 0x656   :  { %v1471_v20 = vmul.f32 %v5907_v14, %v1452_v48 }
 0x658   :  { %v5945_v60 = vsub.f32 %v1430_v29, %v1471_v20  ;;  %v1638_v29 = vld [vmem:[%s7399_s3 + $0x10] sm:$0xff] }
 0x659   :  { %1679 = vmatpush.msra.mxu1 %v1638_v29 }
 0x65a   :  { %v1487_v42 = vmul.f32 %v5945_v60, %v5945_v60 }
 0x65b   :  { %1680 = vmatpush.msra.mxu1 %v1637_v17 }
 0x65c   :  { %v1505_v16 = vsel %vm229_vm2, %v1487_v42, 0.0 }
 0x65d   :  { %1506 = vadd.xlane.f32.xlu2 %v1505_v16  ;;  %v1455_v40 = vpop.xlane.xlu2 %1454  ;;  %1681 = vmatpush.msra.mxu1 %v1636_v50 }
 0x65e   :  { %v1472_v26 = vmul.f32 %v5907_v14, %v1455_v40 }
 0x660   :  { %v5951_v58 = vsub.f32 %v1431_v32, %v1472_v26 }
 0x662   :  { %v1488_v33 = vmul.f32 %v5951_v58, %v5951_v58 }
 0x664   :  { %v1508_v22 = vsel %vm229_vm2, %v1488_v33, 0.0 }
 0x665   :  { %1509 = vadd.xlane.f32.xlu0 %v1508_v22 }
 0x6a7   :  { %v1492_v32 = vpop.xlane.xlu1 %1491 }
 0x6a8   :  { %v1514_v36 = vmul.f32 %v1492_v32, %v5907_v14 }
 0x6aa   :  { %v1522_v12 = vadd.f32 1e-05, %v1514_v36 }
 0x6ac   :  { %4693 = vrsqrt.f32 %v1522_v12  ;;  %vm1536_vm9 = vweird.f32 %v1522_v12 }
 0x6af   :  { %v1495_v35 = vpop.xlane.xlu0 %1494 }
 0x6b0   :  { %v1515_v27 = vmul.f32 %v1495_v35, %v5907_v14  ;;  %v1458_v37 = vpop.xlane.xlu1 %1457 }
 0x6b1   :  { %v1473_v61 = vmul.f32 %v5907_v14, %v1458_v37 }
 0x6b2   :  { %v4694_v19 = vpop.eup %4693  ;;  %v1523_v38 = vadd.f32 1e-05, %v1515_v27 }
 0x6b3   :  { %v1531_v59 = vmul.f32 %v4694_v19, %v1522_v12  ;;  %v5968_v41 = vsub.f32 %v1432_v49, %v1473_v61  ;;  %vm1537_vm8 = vweird.f32 %v4694_v19 }
 0x6b4   :  { %4695 = vrsqrt.f32 %v1523_v38  ;;  %vm1538_vm10 = vmor %vm1536_vm9, %vm1537_vm8  ;;  %vm1546_vm12 = vweird.f32 %v1523_v38 }
 0x6b5   :  { %v1532_v53 = vmul.f32 %v4694_v19, %v1531_v59  ;;  %v1489_v57 = vmul.f32 %v5968_v41, %v5968_v41 }
 0x6b7   :  { %v1533_v56 = vmul.f32 0.5, %v1532_v53  ;;  %v1511_v13 = vsel %vm229_vm2, %v1489_v57, 0.0 }
 0x6b8   :  { %v1498_v46 = vpop.xlane.xlu2 %1497  ;;  %1512 = vadd.xlane.f32.xlu1 %v1511_v13 }
 0x6b9   :  { %v1534_v55 = vsub.f32 1.5, %v1533_v56  ;;  %v1516_v30 = vmul.f32 %v1498_v46, %v5907_v14 }
 0x6ba   :  { %v4696_v28 = vpop.eup %4695 }
 0x6bb   :  { %v1535_v10 = vmul.f32 %v4694_v19, %v1534_v55  ;;  %v1541_v11 = vmul.f32 %v4696_v28, %v1523_v38  ;;  %v1524_v49 = vadd.f32 1e-05, %v1516_v30  ;;  %vm1547_vm11 = vweird.f32 %v4696_v28 }
 0x6bc   :  { %vm1548_vm13 = vmor %vm1546_vm12, %vm1547_vm11 }
 0x6bd   :  { %v1539_v9 = vsel %vm1538_vm10, %v4694_v19, %v1535_v10  ;;  %v1542_v1 = vmul.f32 %v4696_v28, %v1541_v11  ;;  %4697 = vrsqrt.f32 %v1524_v49  ;;  %vm1556_vm0 = vweird.f32 %v1524_v49 }
 0x6be   :  { %v1610_v43 = vmul.f32 %v1539_v9, %v5910_v31 }
 0x6bf   :  { %v1543_v45 = vmul.f32 0.5, %v1542_v1 }
 0x6c0   :  { %v1619_v63 = vmul.f32 %v5977_v0, %v1610_v43  ;;  %v1501_v39 = vpop.xlane.xlu0 %1500 }
 0x6c1   :  { %v1544_v34 = vsub.f32 1.5, %v1543_v45  ;;  %v1517_v23 = vmul.f32 %v1501_v39, %v5907_v14 }
 0x6c2   :  { %v5988_v54 = vadd.f32 %v5982_v44, %v1619_v63 }
 0x6c3   :  { %v4698_v48 = vpop.eup %4697  ;;  %v1545_v20 = vmul.f32 %v4696_v28, %v1544_v34  ;;  %v1525_v42 = vadd.f32 1e-05, %v1517_v23 }
 0x6c4   :  { %v1551_v16 = vmul.f32 %v4698_v48, %v1524_v49  ;;  %4350 = vmatmul.msk.f32.vlgmr.msra.gmra.mxu1 %vm229_vm2, %v5988_v54  ;;  %vm1557_vm15 = vweird.f32 %v4698_v48 }
 0x6c5   :  { %v1549_v31 = vsel %vm1548_vm13, %v4696_v28, %v1545_v20  ;;  %4699 = vrsqrt.f32 %v1525_v42  ;;  %vm1558_vm1 = vmor %vm1556_vm0, %vm1557_vm15  ;;  %vm1566_vm4 = vweird.f32 %v1525_v42 }
 0x6c6   :  { %v1611_v40 = vmul.f32 %v1549_v31, %v5916_v3  ;;  %v1552_v26 = vmul.f32 %v4698_v48, %v1551_v16 }
 0x6c8   :  { %v1553_v33 = vmul.f32 0.5, %v1552_v26  ;;  %v1504_v22 = vpop.xlane.xlu1 %1503  ;;  %v1620_v29 = vmul.f32 %v5977_v0, %v1611_v40 }
 0x6c9   :  { %v1518_v17 = vmul.f32 %v1504_v22, %v5907_v14 }
 0x6ca   :  { %v1554_v50 = vsub.f32 1.5, %v1553_v33  ;;  %v5996_v32 = vadd.f32 %v5982_v44, %v1620_v29 }
 0x6cb   :  { %v4700_v36 = vpop.eup %4699  ;;  %v1526_v12 = vadd.f32 1e-05, %v1518_v17 }
 0x6cc   :  { %v1555_v35 = vmul.f32 %v4698_v48, %v1554_v50  ;;  %v1561_v27 = vmul.f32 %v4700_v36, %v1525_v42  ;;  %4351 = vmatmul.msk.f32.gmra.mxu1 %vm229_vm2, %v5996_v32  ;;  %vm1567_vm3 = vweird.f32 %v4700_v36 }
 0x6cd   :  { %4701 = vrsqrt.f32 %v1526_v12  ;;  %vm1568_vm5 = vmor %vm1566_vm4, %vm1567_vm3  ;;  %vm1576_vm7 = vweird.f32 %v1526_v12 }
 0x6ce   :  { %v1559_v3 = vsel %vm1558_vm1, %v4698_v48, %v1555_v35  ;;  %v1562_v37 = vmul.f32 %v4700_v36, %v1561_v27 }
 0x6cf   :  { %v1612_v61 = vmul.f32 %v1559_v3, %v5924_v2  ;;  %v1722_v2 = vld [vmem:[%s7400_s4 + $0x38] sm:$0xff] }
 0x6d0   :  { %v1563_v19 = vmul.f32 0.5, %v1562_v37  ;;  %v1507_v38 = vpop.xlane.xlu2 %1506  ;;  %1757 = vmatpush.msra.mxu2 %v1722_v2 }
 0x6d1   :  { %v1519_v59 = vmul.f32 %v1507_v38, %v5907_v14  ;;  %v1621_v53 = vmul.f32 %v5977_v0, %v1612_v61  ;;  %v1721_v38 = vld [vmem:[%s7400_s4 + $0x30] sm:$0xff] }
 0x6d2   :  { %v1564_v57 = vsub.f32 1.5, %v1563_v19  ;;  %1758 = vmatpush.msra.mxu2 %v1721_v38  ;;  %v4547_v38 = vld [vmem:[%s7401_s5 + $0x5] ss:$0 sm:$0xff] }
 0x6d3   :  { %v4702_v56 = vpop.eup %4701  ;;  %v1527_v13 = vadd.f32 1e-05, %v1519_v59  ;;  %v6004_v46 = vadd.f32 %v5982_v44, %v1621_v53  ;;  %v1720_v59 = vld [vmem:[%s7400_s4 + $0x28] sm:$0xff]  ;;  %v1718_v53 = vld [vmem:[%s7400_s4 + $0x18] sm:$0xff] }
 0x6d4   :  { %v1565_v55 = vmul.f32 %v4700_v36, %v1564_v57  ;;  %v1571_v30 = vmul.f32 %v4702_v56, %v1526_v12  ;;  %vm1577_vm6 = vweird.f32 %v4702_v56  ;;  %1759 = vmatpush.msra.mxu2 %v1720_v59  ;;  %v1717_v57 = vld [vmem:[%s7400_s4 + $0x10] sm:$0xff] }
 0x6d5   :  { %4703 = vrsqrt.f32 %v1527_v13  ;;  %4352 = vmatmul.msk.f32.gmra.mxu1 %vm229_vm2, %v6004_v46  ;;  %vm1578_vm8 = vmor %vm1576_vm7, %vm1577_vm6  ;;  %vm1586_vm10 = vweird.f32 %v1527_v13 }
 0x6d6   :  { %v1569_v28 = vsel %vm1568_vm5, %v4700_v36, %v1565_v55  ;;  %v1572_v10 = vmul.f32 %v4702_v56, %v1571_v30 }
 0x6d7   :  { %v1613_v11 = vmul.f32 %v1569_v28, %v5933_v25 }
 0x6d8   :  { %v1573_v49 = vmul.f32 0.5, %v1572_v10  ;;  %v1510_v9 = vpop.xlane.xlu0 %1509 }
 0x6d9   :  { %v1520_v1 = vmul.f32 %v1510_v9, %v5907_v14  ;;  %v1622_v43 = vmul.f32 %v5977_v0, %v1613_v11 }
 0x6da   :  { %v1574_v45 = vsub.f32 1.5, %v1573_v49 }
 0x6db   :  { %v4704_v63 = vpop.eup %4703  ;;  %v1528_v39 = vadd.f32 1e-05, %v1520_v1  ;;  %v6015_v34 = vadd.f32 %v5982_v44, %v1622_v43  ;;  %v4546_v1 = vld [vmem:[%s7401_s5 + $0x4] ss:$0 sm:$0xff] }
 0x6dc   :  { %v1575_v23 = vmul.f32 %v4702_v56, %v1574_v45  ;;  %v1581_v48 = vmul.f32 %v4704_v63, %v1527_v13  ;;  %vm1587_vm9 = vweird.f32 %v4704_v63  ;;  %v1715_v13 = vld [vmem:[%s7400_s4] sm:$0xff] }
 0x6dd   :  { %4705 = vrsqrt.f32 %v1528_v39  ;;  %4353 = vmatmul.msk.f32.gmra.mxu1 %vm229_vm2, %v6015_v34  ;;  %vm1588_vm11 = vmor %vm1586_vm10, %vm1587_vm9  ;;  %vm1596_vm13 = vweird.f32 %v1528_v39 }
 0x6de   :  { %v1579_v25 = vsel %vm1578_vm8, %v4702_v56, %v1575_v23  ;;  %v1582_v20 = vmul.f32 %v4704_v63, %v1581_v48  ;;  %v1716_v56 = vld [vmem:[%s7400_s4 + $0x8] sm:$0xff] }
 0x6df   :  { %v1614_v42 = vmul.f32 %v1579_v25, %v5939_v47 }
 0x6e0   :  { %v1583_v16 = vmul.f32 0.5, %v1582_v20 }
 0x6e1   :  { %v1623_v31 = vmul.f32 %v5977_v0, %v1614_v42 }
 0x6e2   :  { %v1584_v40 = vsub.f32 1.5, %v1583_v16 }
 0x6e3   :  { %v4706_v26 = vpop.eup %4705  ;;  %v6022_v33 = vadd.f32 %v5982_v44, %v1623_v31 }
 0x6e4   :  { %v1585_v22 = vmul.f32 %v4704_v63, %v1584_v40  ;;  %v1591_v29 = vmul.f32 %v4706_v26, %v1528_v39  ;;  %vm1597_vm12 = vweird.f32 %v4706_v26 }
 0x6e5   :  { %4354 = vmatmul.msk.f32.gmra.mxu1 %vm229_vm2, %v6022_v33  ;;  %vm1598_vm15 = vmor %vm1596_vm13, %vm1597_vm12 }
 0x6e6   :  { %v1589_v17 = vsel %vm1588_vm11, %v4704_v63, %v1585_v22  ;;  %v1592_v50 = vmul.f32 %v4706_v26, %v1591_v29 }
 0x6e7   :  { %v1615_v47 = vmul.f32 %v1589_v17, %v5945_v60 }
 0x6e8   :  { %v1593_v36 = vmul.f32 0.5, %v1592_v50 }
 0x6e9   :  { %v1624_v12 = vmul.f32 %v5977_v0, %v1615_v47 }
 0x6ea   :  { %v1594_v35 = vsub.f32 1.5, %v1593_v36 }
 0x6eb   :  { %v6029_v27 = vadd.f32 %v5982_v44, %v1624_v12 }
 0x6ec   :  { %v1595_v3 = vmul.f32 %v4706_v26, %v1594_v35 }
 0x6ed   :  { %4355 = vmatmul.msk.f32.gmra.mxu1 %vm229_vm2, %v6029_v27 }
 0x6ee   :  { %v1599_v37 = vsel %vm1598_vm15, %v4706_v26, %v1595_v3 }
 0x6ef   :  { %v1616_v61 = vmul.f32 %v1599_v37, %v5951_v58  ;;  %v1719_v58 = vld [vmem:[%s7400_s4 + $0x20] sm:$0xff] }
 0x6f0   :  { %1760 = vmatpush.msra.mxu2 %v1719_v58 }
 0x6f1   :  { %v1625_v19 = vmul.f32 %v5977_v0, %v1616_v61 }
 0x6f2   :  { %1761 = vmatpush.msra.mxu2 %v1718_v53 }
 0x6f3   :  { %v6036_v60 = vadd.f32 %v5982_v44, %v1625_v19 }
 0x6f4   :  { %1762 = vmatpush.msra.mxu2 %v1717_v57 }
 0x6f5   :  { %4356 = vmatmul.msk.f32.gmra.mxu1 %vm229_vm2, %v6036_v60 }
 0x6f6   :  { %1763 = vmatpush.msra.mxu2 %v1716_v56 }
 0x6f8   :  { %1764 = vmatpush.msra.mxu2 %v1715_v13 }
 0x72b   :  { %v1513_v55 = vpop.xlane.xlu1 %1512 }
 0x72c   :  { %v1521_v30 = vmul.f32 %v1513_v55, %v5907_v14 }
 0x72e   :  { %v1529_v2 = vadd.f32 1e-05, %v1521_v30 }
 0x730   :  { %4707 = vrsqrt.f32 %v1529_v2  ;;  %vm1606_vm1 = vweird.f32 %v1529_v2 }
 0x736   :  { %v4708_v28 = vpop.eup %4707 }
 0x737   :  { %v1601_v10 = vmul.f32 %v4708_v28, %v1529_v2  ;;  %vm1607_vm0 = vweird.f32 %v4708_v28 }
 0x738   :  { %vm1608_vm3 = vmor %vm1606_vm1, %vm1607_vm0 }
 0x739   :  { %v1602_v11 = vmul.f32 %v4708_v28, %v1601_v10 }
 0x73b   :  { %v1603_v49 = vmul.f32 0.5, %v1602_v11 }
 0x73d   :  { %v1604_v9 = vsub.f32 1.5, %v1603_v49 }
 0x73f   :  { %v1605_v43 = vmul.f32 %v4708_v28, %v1604_v9 }
 0x741   :  { %v1609_v45 = vsel %vm1608_vm3, %v4708_v28, %v1605_v43  ;;  %v1683_v63 = vpop.f32.mrf.mxu1 }
 0x742   :  { %v1617_v39 = vmul.f32 %v1609_v45, %v5968_v41  ;;  %v1684_v23 = vadd.f32 %v4546_v1, %v1683_v63 }
 0x744   :  { %v1707_v48 = vmax.f32 %v1684_v23, 0.0  ;;  %v1626_v25 = vmul.f32 %v5977_v0, %v1617_v39 }
 0x746   :  { %4358 = vmatmul.msk.f32.vlgmr.msra.gmra.mxu2 %vm478_vm14, %v1707_v48  ;;  %v6069_v20 = vadd.f32 %v5982_v44, %v1626_v25 }
 0x748   :  { %4357 = vmatmul.msk.f32.gmra.mxu1 %vm229_vm2, %v6069_v20 }
 0x749   :  { %v1686_v42 = vpop.f32.mrf.mxu1 }
 0x74a   :  { %v1687_v16 = vadd.f32 %v4546_v1, %v1686_v42 }
 0x74c   :  { %v1708_v31 = vmax.f32 %v1687_v16, 0.0 }
 0x74e   :  { %4359 = vmatmul.msk.f32.gmra.mxu2 %vm478_vm14, %v1708_v31 }
 0x752   :  { %v1689_v40 = vpop.f32.mrf.mxu1 }
 0x753   :  { %v1690_v26 = vadd.f32 %v4546_v1, %v1689_v40 }
 0x755   :  { %v1709_v41 = vmax.f32 %v1690_v26, 0.0 }
 0x757   :  { %4360 = vmatmul.msk.f32.gmra.mxu2 %vm478_vm14, %v1709_v41 }
 0x75a   :  { %v1692_v22 = vpop.f32.mrf.mxu1 }
 0x75b   :  { %v1693_v0 = vadd.f32 %v4546_v1, %v1692_v22 }
 0x75d   :  { %v1710_v29 = vmax.f32 %v1693_v0, 0.0 }
 0x75f   :  { %4361 = vmatmul.msk.f32.gmra.mxu2 %vm478_vm14, %v1710_v29 }
 0x762   :  { %v1695_v44 = vpop.f32.mrf.mxu1 }
 0x763   :  { %v1696_v17 = vadd.f32 %v4546_v1, %v1695_v44 }
 0x765   :  { %v1711_v50 = vmax.f32 %v1696_v17, 0.0 }
 0x767   :  { %4362 = vmatmul.msk.f32.gmra.mxu2 %vm478_vm14, %v1711_v50 }
 0x76a   :  { %v1698_v47 = vpop.f32.mrf.mxu1 }
 0x76b   :  { %v1699_v36 = vadd.f32 %v4546_v1, %v1698_v47 }
 0x76d   :  { %v1712_v12 = vmax.f32 %v1699_v36, 0.0 }
 0x76f   :  { %4363 = vmatmul.msk.f32.gmra.mxu2 %vm478_vm14, %v1712_v12 }
 0x772   :  { %v1701_v35 = vpop.f32.mrf.mxu1 }
 0x773   :  { %v1702_v3 = vadd.f32 %v4546_v1, %v1701_v35 }
 0x775   :  { %v1713_v37 = vmax.f32 %v1702_v3, 0.0 }
 0x777   :  { %4364 = vmatmul.msk.f32.gmra.mxu2 %vm478_vm14, %v1713_v37 }
 0x7c5   :  { %v1704_v61 = vpop.f32.mrf.mxu1 }
 0x7c6   :  { %v1705_v19 = vadd.f32 %v4546_v1, %v1704_v61 }
 0x7c8   :  { %v1714_v59 = vmax.f32 %v1705_v19, 0.0 }
 0x7c9   :  { %v1766_v58 = vpop.f32.mrf.mxu2 }
 0x7ca   :  { %v1767_v53 = vadd.f32 %v4547_v38, %v1766_v58  ;;  %4365 = vmatmul.msk.f32.gmra.mxu2 %vm478_vm14, %v1714_v59 }
 0x7cc   :  { %v1790_v57 = vadd.f32 %v1767_v53, %v5988_v54 }
 0x7ce   :  { %v1800_v56 = vsel %vm229_vm2, %v1790_v57, 0.0 }
 0x7cf   :  { %1801 = vadd.xlane.f32.xlu2 %v1800_v56 }
 0x7d1   :  { %v1769_v13 = vpop.f32.mrf.mxu2 }
 0x7d2   :  { %v1770_v55 = vadd.f32 %v4547_v38, %v1769_v13 }
 0x7d4   :  { %v1791_v30 = vadd.f32 %v1770_v55, %v5996_v32 }
 0x7d6   :  { %v1803_v2 = vsel %vm229_vm2, %v1791_v30, 0.0 }
 0x7d7   :  { %1804 = vadd.xlane.f32.xlu0 %v1803_v2 }
 0x7da   :  { %v1772_v28 = vpop.f32.mrf.mxu2 }
 0x7db   :  { %v1773_v10 = vadd.f32 %v4547_v38, %v1772_v28 }
 0x7dd   :  { %v1792_v11 = vadd.f32 %v1773_v10, %v6004_v46 }
 0x7df   :  { %v1806_v49 = vsel %vm229_vm2, %v1792_v11, 0.0 }
 0x7e0   :  { %1807 = vadd.xlane.f32.xlu1 %v1806_v49 }
 0x7e2   :  { %v1775_v9 = vpop.f32.mrf.mxu2 }
 0x7e3   :  { %v1776_v1 = vadd.f32 %v4547_v38, %v1775_v9 }
 0x7e5   :  { %v1793_v54 = vadd.f32 %v1776_v1, %v6015_v34 }
 0x7e7   :  { %v1809_v43 = vsel %vm229_vm2, %v1793_v54, 0.0 }
 0x7e8   :  { %1810 = vadd.xlane.f32.xlu2 %v1809_v43 }
 0x7ea   :  { %v1778_v45 = vpop.f32.mrf.mxu2 }
 0x7eb   :  { %v1779_v63 = vadd.f32 %v4547_v38, %v1778_v45  ;;  %v1998_v45 = vld [vmem:[#allocation2 + $0x98] sm:$0xff] }
 0x7ec   :  { %2052 = vmatpush.msra.mxu3 %v1998_v45 }
 0x7ed   :  { %v1794_v32 = vadd.f32 %v1779_v63, %v6022_v33  ;;  %v2003_v63 = vld [vmem:[#allocation2 + $0xb8] sm:$0xff] }
 0x7ee   :  { %2095 = vmatpush.msra.mxu0 %v2003_v63 }
 0x7ef   :  { %v1812_v39 = vsel %vm229_vm2, %v1794_v32, 0.0 }
 0x7f0   :  { %1813 = vadd.xlane.f32.xlu0 %v1812_v39  ;;  %v1997_v39 = vld [vmem:[#allocation2 + $0x90] sm:$0xff] }
 0x7f1   :  { %2053 = vmatpush.msra.mxu3 %v1997_v39 }
 0x7f2   :  { %v1781_v23 = vpop.f32.mrf.mxu2 }
 0x7f3   :  { %v1782_v48 = vadd.f32 %v4547_v38, %v1781_v23  ;;  %v2002_v23 = vld [vmem:[#allocation2 + $0xb0] sm:$0xff] }
 0x7f4   :  { %2096 = vmatpush.msra.mxu0 %v2002_v23 }
 0x7f5   :  { %v1795_v46 = vadd.f32 %v1782_v48, %v6029_v27  ;;  %v2007_v48 = vld [vmem:[#allocation2 + $0xd0] sm:$0xff] }
 0x7f7   :  { %v1815_v25 = vsel %vm229_vm2, %v1795_v46, 0.0 }
 0x7f8   :  { %1816 = vadd.xlane.f32.xlu1 %v1815_v25  ;;  %v2001_v25 = vld [vmem:[#allocation2 + $0xa8] sm:$0xff] }
 0x7f9   :  { %2097 = vmatpush.msra.mxu0 %v2001_v25 }
 0x7fa   :  { %v1784_v42 = vpop.f32.mrf.mxu2 }
 0x7fb   :  { %v1785_v16 = vadd.f32 %v4547_v38, %v1784_v42  ;;  %v2006_v42 = vld [vmem:[#allocation2 + $0xc8] sm:$0xff] }
 0x7fd   :  { %v1796_v34 = vadd.f32 %v1785_v16, %v6036_v60  ;;  %v1995_v16 = vld [vmem:[#allocation2 + $0x80] sm:$0xff] }
 0x7ff   :  { %v1818_v31 = vsel %vm229_vm2, %v1796_v34, 0.0 }
 0x800   :  { %1819 = vadd.xlane.f32.xlu0 %v1818_v31  ;;  %v2005_v31 = vld [vmem:[#allocation2 + $0xc0] sm:$0xff] }
 0x842   :  { %v1802_v40 = vpop.xlane.xlu2 %1801 }
 0x843   :  { %v1824_v33 = vmul.f32 %v1802_v40, %v5907_v14 }
 0x845   :  { %v6098_v26 = vsub.f32 %v1790_v57, %v1824_v33 }
 0x847   :  { %v1840_v41 = vmul.f32 %v6098_v26, %v6098_v26 }
 0x849   :  { %v1848_v27 = vsel %vm229_vm2, %v1840_v41, 0.0 }
 0x84a   :  { %v1805_v22 = vpop.xlane.xlu0 %1804  ;;  %1849 = vadd.xlane.f32.xlu2 %v1848_v27 }
 0x84b   :  { %v1825_v0 = vmul.f32 %v1805_v22, %v5907_v14 }
 0x84d   :  { %v6104_v29 = vsub.f32 %v1791_v30, %v1825_v0  ;;  %v1787_v60 = vpop.f32.mrf.mxu2 }
 0x84e   :  { %v1788_v44 = vadd.f32 %v4547_v38, %v1787_v60 }
 0x84f   :  { %v1841_v17 = vmul.f32 %v6104_v29, %v6104_v29 }
 0x850   :  { %v6109_v50 = vadd.f32 %v1788_v44, %v6069_v20 }
 0x851   :  { %v1851_v47 = vsel %vm229_vm2, %v1841_v17, 0.0 }
 0x852   :  { %1852 = vadd.xlane.f32.xlu1 %v1851_v47  ;;  %v1821_v36 = vsel %vm229_vm2, %v6109_v50, 0.0 }
 0x853   :  { %v1808_v12 = vpop.xlane.xlu1 %1807  ;;  %1822 = vadd.xlane.f32.xlu2 %v1821_v36 }
 0x854   :  { %v1826_v35 = vmul.f32 %v1808_v12, %v5907_v14 }
 0x856   :  { %v6115_v3 = vsub.f32 %v1792_v11, %v1826_v35 }
 0x858   :  { %v1842_v37 = vmul.f32 %v6115_v3, %v6115_v3 }
 0x85a   :  { %v1854_v61 = vsel %vm229_vm2, %v1842_v37, 0.0 }
 0x85b   :  { %v1811_v19 = vpop.xlane.xlu2 %1810  ;;  %1855 = vadd.xlane.f32.xlu0 %v1854_v61 }
 0x85c   :  { %v1827_v20 = vmul.f32 %v1811_v19, %v5907_v14 }
 0x85e   :  { %v6121_v38 = vsub.f32 %v1793_v54, %v1827_v20 }
 0x860   :  { %v1843_v59 = vmul.f32 %v6121_v38, %v6121_v38 }
 0x862   :  { %v1857_v58 = vsel %vm229_vm2, %v1843_v59, 0.0 }
 0x863   :  { %1858 = vadd.xlane.f32.xlu1 %v1857_v58  ;;  %v1814_v53 = vpop.xlane.xlu0 %1813 }
 0x864   :  { %v1828_v57 = vmul.f32 %v1814_v53, %v5907_v14 }
 0x866   :  { %v6127_v56 = vsub.f32 %v1794_v32, %v1828_v57  ;;  %v2008_v32 = vld [vmem:[#allocation2 + $0xd8] sm:$0xff] }
 0x867   :  { %2138 = vmatpush.msrb.mxu1 %v2008_v32 }
 0x868   :  { %v1844_v13 = vmul.f32 %v6127_v56, %v6127_v56 }
 0x869   :  { %2139 = vmatpush.msrb.mxu1 %v2007_v48 }
 0x86a   :  { %v1860_v55 = vsel %vm229_vm2, %v1844_v13, 0.0  ;;  %v6157_v13 = vld [vmem:[%s7401_s5 + $0x8] ss:$0 sm:$0xff] }
 0x86b   :  { %1861 = vadd.xlane.f32.xlu2 %v1860_v55  ;;  %v1817_v30 = vpop.xlane.xlu1 %1816  ;;  %2140 = vmatpush.msrb.mxu1 %v2006_v42 }
 0x86c   :  { %v1829_v2 = vmul.f32 %v1817_v30, %v5907_v14 }
 0x86d   :  { %2141 = vmatpush.msrb.mxu1 %v2005_v31 }
 0x86e   :  { %v6133_v28 = vsub.f32 %v1795_v46, %v1829_v2  ;;  %v1996_v46 = vld [vmem:[#allocation2 + $0x88] sm:$0xff] }
 0x86f   :  { %2054 = vmatpush.msra.mxu3 %v1996_v46  ;;  %v6162_v2 = vld [vmem:[%s7401_s5 + $0x9] ss:$0 sm:$0xff] }
 0x870   :  { %v1845_v10 = vmul.f32 %v6133_v28, %v6133_v28 }
 0x871   :  { %2055 = vmatpush.msra.mxu3 %v1995_v16 }
 0x872   :  { %v1863_v11 = vsel %vm229_vm2, %v1845_v10, 0.0 }
 0x873   :  { %v1820_v49 = vpop.xlane.xlu0 %1819  ;;  %1864 = vadd.xlane.f32.xlu0 %v1863_v11 }
 0x874   :  { %v1830_v9 = vmul.f32 %v1820_v49, %v5907_v14 }
 0x876   :  { %v6139_v1 = vsub.f32 %v1796_v34, %v1830_v9  ;;  %v2000_v34 = vld [vmem:[#allocation2 + $0xa0] sm:$0xff] }
 0x877   :  { %2098 = vmatpush.msra.mxu0 %v2000_v34 }
 0x878   :  { %v1846_v54 = vmul.f32 %v6139_v1, %v6139_v1 }
 0x87a   :  { %v1866_v43 = vsel %vm229_vm2, %v1846_v54, 0.0 }
 0x87b   :  { %1867 = vadd.xlane.f32.xlu1 %v1866_v43 }
 0x8bd   :  { %v1850_v40 = vpop.xlane.xlu2 %1849 }
 0x8be   :  { %v1872_v33 = vmul.f32 %v1850_v40, %v5907_v14 }
 0x8c0   :  { %v1880_v41 = vadd.f32 1e-05, %v1872_v33 }
 0x8c2   :  { %4709 = vrsqrt.f32 %v1880_v41  ;;  %vm1894_vm5 = vweird.f32 %v1880_v41 }
 0x8c5   :  { %v1853_v27 = vpop.xlane.xlu1 %1852 }
 0x8c6   :  { %v1873_v22 = vmul.f32 %v1853_v27, %v5907_v14  ;;  %v1823_v0 = vpop.xlane.xlu2 %1822 }
 0x8c7   :  { %v1831_v60 = vmul.f32 %v1823_v0, %v5907_v14 }
 0x8c8   :  { %v4710_v44 = vpop.eup %4709  ;;  %v1881_v17 = vadd.f32 1e-05, %v1873_v22 }
 0x8c9   :  { %v1889_v47 = vmul.f32 %v4710_v44, %v1880_v41  ;;  %v6148_v36 = vsub.f32 %v6109_v50, %v1831_v60  ;;  %vm1895_vm4 = vweird.f32 %v4710_v44 }
 0x8ca   :  { %4711 = vrsqrt.f32 %v1881_v17  ;;  %vm1896_vm6 = vmor %vm1894_vm5, %vm1895_vm4  ;;  %vm1904_vm8 = vweird.f32 %v1881_v17 }
 0x8cb   :  { %v1890_v12 = vmul.f32 %v4710_v44, %v1889_v47  ;;  %v1847_v35 = vmul.f32 %v6148_v36, %v6148_v36 }
 0x8cd   :  { %v1891_v37 = vmul.f32 0.5, %v1890_v12  ;;  %v1869_v61 = vsel %vm229_vm2, %v1847_v35, 0.0 }
 0x8ce   :  { %v1856_v19 = vpop.xlane.xlu0 %1855  ;;  %1870 = vadd.xlane.f32.xlu2 %v1869_v61 }
 0x8cf   :  { %v1892_v20 = vsub.f32 1.5, %v1891_v37  ;;  %v1874_v59 = vmul.f32 %v1856_v19, %v5907_v14 }
 0x8d0   :  { %v4712_v58 = vpop.eup %4711 }
 0x8d1   :  { %v1893_v53 = vmul.f32 %v4710_v44, %v1892_v20  ;;  %v1899_v57 = vmul.f32 %v4712_v58, %v1881_v17  ;;  %v1882_v50 = vadd.f32 1e-05, %v1874_v59  ;;  %vm1905_vm7 = vweird.f32 %v4712_v58 }
 0x8d2   :  { %vm1906_vm9 = vmor %vm1904_vm8, %vm1905_vm7 }
 0x8d3   :  { %v1897_v55 = vsel %vm1896_vm6, %v4710_v44, %v1893_v53  ;;  %v1900_v30 = vmul.f32 %v4712_v58, %v1899_v57  ;;  %4713 = vrsqrt.f32 %v1882_v50  ;;  %vm1914_vm11 = vweird.f32 %v1882_v50 }
 0x8d4   :  { %v1968_v10 = vmul.f32 %v1897_v55, %v6098_v26 }
 0x8d5   :  { %v1901_v11 = vmul.f32 0.5, %v1900_v30 }
 0x8d6   :  { %v1977_v49 = vmul.f32 %v6157_v13, %v1968_v10  ;;  %v1859_v9 = vpop.xlane.xlu1 %1858 }
 0x8d7   :  { %v1902_v54 = vsub.f32 1.5, %v1901_v11  ;;  %v1875_v43 = vmul.f32 %v1859_v9, %v5907_v14 }
 0x8d8   :  { %v6168_v45 = vadd.f32 %v6162_v2, %v1977_v49 }
 0x8d9   :  { %v4714_v63 = vpop.eup %4713  ;;  %v1903_v32 = vmul.f32 %v4712_v58, %v1902_v54  ;;  %v1883_v39 = vadd.f32 1e-05, %v1875_v43 }
 0x8da   :  { %v1909_v23 = vmul.f32 %v4714_v63, %v1882_v50  ;;  %4366 = vmatmul.msk.f32.vlgmr.msra.gmra.mxu3 %vm229_vm2, %v6168_v45  ;;  %4374 = vmatmul.msk.f32.vlgmr.msra.gmra.mxu0 %vm229_vm2, %v6168_v45  ;;  %vm1915_vm10 = vweird.f32 %v4714_v63 }
 0x8db   :  { %v1907_v26 = vsel %vm1906_vm9, %v4712_v58, %v1903_v32  ;;  %4715 = vrsqrt.f32 %v1883_v39  ;;  %4382 = vmatmul.msk.f32.vlgmr.msrb.gmra.mxu1 %vm229_vm2, %v6168_v45  ;;  %vm1916_vm12 = vmor %vm1914_vm11, %vm1915_vm10  ;;  %vm1924_vm15 = vweird.f32 %v1883_v39 }
 0x8dc   :  { %v1969_v48 = vmul.f32 %v1907_v26, %v6104_v29  ;;  %v1910_v46 = vmul.f32 %v4714_v63, %v1909_v23 }
 0x8de   :  { %v1911_v25 = vmul.f32 0.5, %v1910_v46  ;;  %v1862_v42 = vpop.xlane.xlu2 %1861  ;;  %v1978_v16 = vmul.f32 %v6157_v13, %v1969_v48 }
 0x8df   :  { %v1876_v34 = vmul.f32 %v1862_v42, %v5907_v14 }
 0x8e0   :  { %v1912_v31 = vsub.f32 1.5, %v1911_v25  ;;  %v6180_v40 = vadd.f32 %v6162_v2, %v1978_v16 }
 0x8e1   :  { %v4716_v33 = vpop.eup %4715  ;;  %v1884_v41 = vadd.f32 1e-05, %v1876_v34 }
 0x8e2   :  { %v1913_v27 = vmul.f32 %v4714_v63, %v1912_v31  ;;  %v1919_v22 = vmul.f32 %v4716_v33, %v1883_v39  ;;  %4367 = vmatmul.msk.f32.gmra.mxu3 %vm229_vm2, %v6180_v40  ;;  %4375 = vmatmul.msk.f32.gmra.mxu0 %vm229_vm2, %v6180_v40  ;;  %vm1925_vm13 = vweird.f32 %v4716_v33 }
 0x8e3   :  { %4717 = vrsqrt.f32 %v1884_v41  ;;  %4383 = vmatmul.msk.f32.gmra.mxu1 %vm229_vm2, %v6180_v40  ;;  %vm1926_vm0 = vmor %vm1924_vm15, %vm1925_vm13  ;;  %vm1934_vm3 = vweird.f32 %v1884_v41 }
 0x8e4   :  { %v1917_v29 = vsel %vm1916_vm12, %v4714_v63, %v1913_v27  ;;  %v1920_v0 = vmul.f32 %v4716_v33, %v1919_v22 }
 0x8e5   :  { %v1970_v60 = vmul.f32 %v1917_v29, %v6115_v3 }
 0x8e6   :  { %v1921_v44 = vmul.f32 0.5, %v1920_v0  ;;  %v1865_v17 = vpop.xlane.xlu0 %1864 }
 0x8e7   :  { %v1877_v47 = vmul.f32 %v1865_v17, %v5907_v14  ;;  %v1979_v12 = vmul.f32 %v6157_v13, %v1970_v60 }
 0x8e8   :  { %v1922_v35 = vsub.f32 1.5, %v1921_v44 }
 0x8e9   :  { %v4718_v37 = vpop.eup %4717  ;;  %v1885_v61 = vadd.f32 1e-05, %v1877_v47  ;;  %v6192_v19 = vadd.f32 %v6162_v2, %v1979_v12 }
 0x8ea   :  { %v1923_v20 = vmul.f32 %v4716_v33, %v1922_v35  ;;  %v1929_v59 = vmul.f32 %v4718_v37, %v1884_v41  ;;  %vm1935_vm1 = vweird.f32 %v4718_v37 }
 0x8eb   :  { %4719 = vrsqrt.f32 %v1885_v61  ;;  %4368 = vmatmul.msk.f32.gmra.mxu3 %vm229_vm2, %v6192_v19  ;;  %4376 = vmatmul.msk.f32.gmra.mxu0 %vm229_vm2, %v6192_v19  ;;  %vm1936_vm4 = vmor %vm1934_vm3, %vm1935_vm1  ;;  %vm1944_vm6 = vweird.f32 %v1885_v61 }
 0x8ec   :  { %v1927_v3 = vsel %vm1926_vm0, %v4716_v33, %v1923_v20  ;;  %v1930_v58 = vmul.f32 %v4718_v37, %v1929_v59  ;;  %4384 = vmatmul.msk.f32.gmra.mxu1 %vm229_vm2, %v6192_v19 }
 0x8ed   :  { %v1971_v53 = vmul.f32 %v1927_v3, %v6121_v38 }
 0x8ee   :  { %v1931_v57 = vmul.f32 0.5, %v1930_v58  ;;  %v1868_v50 = vpop.xlane.xlu1 %1867 }
 0x8ef   :  { %v1878_v55 = vmul.f32 %v1868_v50, %v5907_v14  ;;  %v1980_v30 = vmul.f32 %v6157_v13, %v1971_v53 }
 0x8f0   :  { %v1932_v10 = vsub.f32 1.5, %v1931_v57 }
 0x8f1   :  { %v4720_v11 = vpop.eup %4719  ;;  %v1886_v49 = vadd.f32 1e-05, %v1878_v55  ;;  %v6204_v9 = vadd.f32 %v6162_v2, %v1980_v30 }
 0x8f2   :  { %v1933_v54 = vmul.f32 %v4718_v37, %v1932_v10  ;;  %v1939_v43 = vmul.f32 %v4720_v11, %v1885_v61  ;;  %vm1945_vm5 = vweird.f32 %v4720_v11 }
 0x8f3   :  { %4721 = vrsqrt.f32 %v1886_v49  ;;  %4369 = vmatmul.msk.f32.gmra.mxu3 %vm229_vm2, %v6204_v9  ;;  %4377 = vmatmul.msk.f32.gmra.mxu0 %vm229_vm2, %v6204_v9  ;;  %vm1946_vm7 = vmor %vm1944_vm6, %vm1945_vm5  ;;  %vm1954_vm9 = vweird.f32 %v1886_v49 }
 0x8f4   :  { %v1937_v38 = vsel %vm1936_vm4, %v4718_v37, %v1933_v54  ;;  %v1940_v63 = vmul.f32 %v4720_v11, %v1939_v43  ;;  %4385 = vmatmul.msk.f32.gmra.mxu1 %vm229_vm2, %v6204_v9 }
 0x8f5   :  { %v1972_v32 = vmul.f32 %v1937_v38, %v6127_v56 }
 0x8f6   :  { %v1941_v39 = vmul.f32 0.5, %v1940_v63 }
 0x8f7   :  { %v1981_v23 = vmul.f32 %v6157_v13, %v1972_v32  ;;  %v6266_v32 = vld [vmem:[%s7401_s5 + $0xb] ss:$0 sm:$0xff] }
 0x8f8   :  { %v1942_v26 = vsub.f32 1.5, %v1941_v39  ;;  %v4551_v39 = vld [vmem:[%s7401_s5 + $0xc] ss:$0 sm:$0xff] }
 0x8f9   :  { %v4722_v48 = vpop.eup %4721  ;;  %v6215_v46 = vadd.f32 %v6162_v2, %v1981_v23 }
 0x8fa   :  { %v1943_v25 = vmul.f32 %v4720_v11, %v1942_v26  ;;  %v1949_v42 = vmul.f32 %v4722_v48, %v1886_v49  ;;  %vm1955_vm8 = vweird.f32 %v4722_v48 }
 0x8fb   :  { %4370 = vmatmul.msk.f32.gmra.mxu3 %vm229_vm2, %v6215_v46  ;;  %4378 = vmatmul.msk.f32.gmra.mxu0 %vm229_vm2, %v6215_v46  ;;  %vm1956_vm10 = vmor %vm1954_vm9, %vm1955_vm8 }
 0x8fc   :  { %v1947_v56 = vsel %vm1946_vm7, %v4720_v11, %v1943_v25  ;;  %v1950_v16 = vmul.f32 %v4722_v48, %v1949_v42  ;;  %4386 = vmatmul.msk.f32.gmra.mxu1 %vm229_vm2, %v6215_v46 }
 0x8fd   :  { %v1973_v34 = vmul.f32 %v1947_v56, %v6133_v28 }
 0x8fe   :  { %v1951_v31 = vmul.f32 0.5, %v1950_v16 }
 0x8ff   :  { %v1982_v33 = vmul.f32 %v6157_v13, %v1973_v34 }
 0x900   :  { %v1952_v41 = vsub.f32 1.5, %v1951_v31 }
 0x901   :  { %v6226_v27 = vadd.f32 %v6162_v2, %v1982_v33 }
 0x902   :  { %v1953_v22 = vmul.f32 %v4722_v48, %v1952_v41 }
 0x903   :  { %4371 = vmatmul.msk.f32.gmra.mxu3 %vm229_vm2, %v6226_v27  ;;  %4379 = vmatmul.msk.f32.gmra.mxu0 %vm229_vm2, %v6226_v27 }
 0x904   :  { %v1957_v29 = vsel %vm1956_vm10, %v4722_v48, %v1953_v22  ;;  %4387 = vmatmul.msk.f32.gmra.mxu1 %vm229_vm2, %v6226_v27 }
 0x905   :  { %v1974_v28 = vmul.f32 %v1957_v29, %v6139_v1 }
 0x907   :  { %v1983_v0 = vmul.f32 %v6157_v13, %v1974_v28 }
 0x909   :  { %v6237_v60 = vadd.f32 %v6162_v2, %v1983_v0 }
 0x90b   :  { %4372 = vmatmul.msk.f32.gmra.mxu3 %vm229_vm2, %v6237_v60  ;;  %4380 = vmatmul.msk.f32.gmra.mxu0 %vm229_vm2, %v6237_v60 }
 0x90c   :  { %4388 = vmatmul.msk.f32.gmra.mxu1 %vm229_vm2, %v6237_v60 }
 0x941   :  { %v1871_v44 = vpop.xlane.xlu2 %1870 }
 0x942   :  { %v1879_v17 = vmul.f32 %v1871_v44, %v5907_v14 }
 0x944   :  { %v1887_v47 = vadd.f32 1e-05, %v1879_v17 }
 0x946   :  { %4723 = vrsqrt.f32 %v1887_v47  ;;  %vm1964_vm12 = vweird.f32 %v1887_v47 }
 0x94c   :  { %v4724_v1 = vpop.eup %4723 }
 0x94d   :  { %v1959_v12 = vmul.f32 %v4724_v1, %v1887_v47  ;;  %vm1965_vm11 = vweird.f32 %v4724_v1 }
 0x94e   :  { %vm1966_vm13 = vmor %vm1964_vm12, %vm1965_vm11 }
 0x94f   :  { %v1960_v35 = vmul.f32 %v4724_v1, %v1959_v12 }
 0x951   :  { %v1961_v37 = vmul.f32 0.5, %v1960_v35 }
 0x953   :  { %v1962_v61 = vsub.f32 1.5, %v1961_v37 }
 0x955   :  { %v1963_v20 = vmul.f32 %v4724_v1, %v1962_v61 }
 0x957   :  { %v1967_v59 = vsel %vm1966_vm13, %v4724_v1, %v1963_v20  ;;  %v6257_v57 = vpop.f32.mrf.mxu0 }
 0x958   :  { %v1975_v3 = vmul.f32 %v1967_v59, %v6148_v36  ;;  %v2143_v50 = vpop.f32.mrf.mxu1 }
 0x95a   :  { %v1984_v58 = vmul.f32 %v6157_v13, %v1975_v3 }
 0x95c   :  { %v6249_v53 = vadd.f32 %v6162_v2, %v1984_v58 }
 0x95e   :  { %4373 = vmatmul.msk.f32.gmra.mxu3 %vm229_vm2, %v6249_v53  ;;  %4381 = vmatmul.msk.f32.gmra.mxu0 %vm229_vm2, %v6249_v53 }
 0x95f   :  { %4389 = vmatmul.msk.f32.gmra.mxu1 %vm229_vm2, %v6249_v53  ;;  %v6259_v55 = vpop.f32.mrf.mxu0 }
 0x960   :  { %v2146_v36 = vpop.f32.mrf.mxu1 }
 0x961   :  { %v6327_v58 = vadd.f32 %v4551_v39, %v2146_v36 }
 0x968   :  { %v6261_v30 = vpop.f32.mrf.mxu0 }
 0x969   :  { %v2149_v13 = vpop.f32.mrf.mxu1 }
 0x96a   :  { %v6314_v35 = vadd.f32 %v4551_v39, %v2149_v13 }
 0x96c   :  { %v2523_v36 = vmul.f32 %v5159_v4, %v6314_v35 }
 0x970   :  { %v2109_v2 = vpop.f32.mrf.mxu0 }
 0x971   :  { %v2152_v10 = vpop.f32.mrf.mxu1 }
 0x972   :  { %v6306_v47 = vadd.f32 %v4551_v39, %v2152_v10 }
 0x974   :  { %v2524_v13 = vmul.f32 %v5159_v4, %v6306_v47  ;;  %v2355_v10 = vmul.f32 %v5164_v6, %v6306_v47 }
 0x978   :  { %v2112_v11 = vpop.f32.mrf.mxu0 }
 0x979   :  { %v2155_v49 = vpop.f32.mrf.mxu1  ;;  %v6321_v20 = vadd.f32 %v6266_v32, %v2112_v11  ;;  %v6335_v11 = vadd.f32 %v4551_v39, %v2143_v50  ;;  %v2522_v50 = vmul.f32 %v5159_v4, %v6327_v58 }
 0x97a   :  { %v6293_v22 = vadd.f32 %v4551_v39, %v2155_v49  ;;  %v2354_v49 = vmul.f32 %v5164_v6, %v6314_v35 }
 0x97c   :  { %v2525_v37 = vmul.f32 %v5159_v4, %v6293_v22  ;;  %v2356_v61 = vmul.f32 %v5164_v6, %v6293_v22 }
 0x980   :  { %v2115_v54 = vpop.f32.mrf.mxu0 }
 0x981   :  { %v2158_v43 = vpop.f32.mrf.mxu1  ;;  %v6300_v0 = vadd.f32 %v6266_v32, %v2115_v54  ;;  %v2171_v54 = vmul.f32 %v5164_v6, %v6321_v20 }
 0x982   :  { %v6285_v31 = vadd.f32 %v4551_v39, %v2158_v43  ;;  %v2364_v43 = vmul.f32 %v5159_v4, %v6321_v20 }
 0x983   :  { %v2172_v59 = vmul.f32 %v5164_v6, %v6300_v0  ;;  %v2365_v3 = vmul.f32 %v5159_v4, %v6300_v0 }
 0x984   :  { %v2526_v1 = vmul.f32 %v5159_v4, %v6285_v31  ;;  %v2357_v12 = vmul.f32 %v5164_v6, %v6285_v31 }
 0x988   :  { %v2118_v38 = vpop.f32.mrf.mxu0 }
 0x989   :  { %v2161_v63 = vpop.f32.mrf.mxu1  ;;  %v6279_v56 = vadd.f32 %v6266_v32, %v2118_v38  ;;  %v6346_v38 = vadd.f32 %v6266_v32, %v2109_v2  ;;  %v2352_v2 = vmul.f32 %v5164_v6, %v6335_v11 }
 0x98a   :  { %v6274_v25 = vadd.f32 %v4551_v39, %v2161_v63  ;;  %v2353_v63 = vmul.f32 %v5164_v6, %v6327_v58 }
 0x98b   :  { %v2173_v44 = vmul.f32 %v5164_v6, %v6279_v56  ;;  %v2366_v17 = vmul.f32 %v5159_v4, %v6279_v56 }
 0x98c   :  { %v2527_v29 = vmul.f32 %v5159_v4, %v6274_v25  ;;  %v2358_v28 = vmul.f32 %v5164_v6, %v6274_v25 }
 0x9db   :  { %v2121_v23 = vpop.f32.mrf.mxu0 }
 0x9dc   :  { %v6272_v26 = vadd.f32 %v6266_v32, %v2121_v23  ;;  %v2164_v48 = vpop.f32.mrf.mxu1 }
 0x9dd   :  { %v6276_v42 = vadd.f32 %v4551_v39, %v2164_v48  ;;  %v2521_v39 = vmul.f32 %v5159_v4, %v6335_v11 }
 0x9de   :  { %v2174_v16 = vmul.f32 %v5164_v6, %v6272_v26  ;;  %v2367_v34 = vmul.f32 %v5159_v4, %v6272_v26  ;;  %v2908_v23 = vmul.f32 %v5249_v52, %v6272_v26 }
 0x9df   :  { %v2528_v33 = vmul.f32 %v5159_v4, %v6276_v42  ;;  %v2359_v41 = vmul.f32 %v5164_v6, %v6276_v42  ;;  %v3069_v48 = vmul.f32 %v5249_v52, %v6276_v42 }
 0x9e0   :  { %4390 = vmatpush.xpose.msk.msrb.mxu2 %vm229_vm2, %v2174_v16  ;;  %4406 = vmatpush.xpose.msk.msrb.mxu3 %vm229_vm2, %v2367_v34  ;;  %v2057_v16 = vpop.f32.mrf.mxu3  ;;  %v6364_v34 = vadd.f32 %v6266_v32, %v6261_v30  ;;  %v2907_v30 = vmul.f32 %v5249_v52, %v6279_v56 }
 0x9e1   :  { %2561 = vmatpush.msrb.mxu0 %v2528_v33  ;;  %2626 = vmatpush.msra.mxu1 %v2359_v41  ;;  %v2170_v33 = vmul.f32 %v5164_v6, %v6346_v38  ;;  %v2363_v41 = vmul.f32 %v5159_v4, %v6346_v38 }
 0x9e3   :  { %2562 = vmatpush.msrb.mxu0 %v2527_v29  ;;  %2627 = vmatpush.msra.mxu1 %v2358_v28  ;;  %v3068_v29 = vmul.f32 %v5249_v52, %v6274_v25  ;;  %v3067_v28 = vmul.f32 %v5249_v52, %v6285_v31 }
 0x9e4   :  { %4391 = vmatpush.xpose.msk.msrb.mxu2 %vm229_vm2, %v2173_v44  ;;  %4407 = vmatpush.xpose.msk.msrb.mxu3 %vm229_vm2, %v2366_v17  ;;  %v6381_v44 = vadd.f32 %v6266_v32, %v6259_v55  ;;  %v2169_v17 = vmul.f32 %v5164_v6, %v6364_v34  ;;  %v2906_v55 = vmul.f32 %v5249_v52, %v6300_v0 }
 0x9e5   :  { %2563 = vmatpush.msrb.mxu0 %v2526_v1  ;;  %2628 = vmatpush.msra.mxu1 %v2357_v12  ;;  %v2362_v1 = vmul.f32 %v5159_v4, %v6364_v34  ;;  %v3066_v12 = vmul.f32 %v5249_v52, %v6293_v22 }
 0x9e7   :  { %2564 = vmatpush.msrb.mxu0 %v2525_v37  ;;  %2629 = vmatpush.msra.mxu1 %v2356_v61  ;;  %v3065_v37 = vmul.f32 %v5249_v52, %v6306_v47  ;;  %v6398_v61 = vadd.f32 %v6266_v32, %v6257_v57  ;;  %v6412_v57 = vld [vmem:[%s7401_s5 + $0xa] ss:$0 sm:$0xff]  ;;  %v2905_v32 = vmul.f32 %v5249_v52, %v6321_v20 }
 0x9e8   :  { %4392 = vmatpush.xpose.msk.msrb.mxu2 %vm229_vm2, %v2172_v59  ;;  %4408 = vmatpush.xpose.msk.msrb.mxu3 %vm229_vm2, %v2365_v3  ;;  %v2168_v59 = vmul.f32 %v5164_v6, %v6381_v44  ;;  %v2361_v3 = vmul.f32 %v5159_v4, %v6381_v44 }
 0x9e9   :  { %2565 = vmatpush.msrb.mxu0 %v2524_v13  ;;  %2630 = vmatpush.msra.mxu1 %v2355_v10  ;;  %v3064_v13 = vmul.f32 %v5249_v52, %v6314_v35  ;;  %v2060_v10 = vpop.f32.mrf.mxu3 }
 0x9eb   :  { %2566 = vmatpush.msrb.mxu0 %v2523_v36  ;;  %2631 = vmatpush.msra.mxu1 %v2354_v49  ;;  %v3063_v36 = vmul.f32 %v5249_v52, %v6327_v58  ;;  %v2167_v49 = vmul.f32 %v5164_v6, %v6398_v61  ;;  %v6432_v6 = vadd.f32 %v6412_v57, %v2057_v16 }
 0x9ec   :  { %4393 = vmatpush.xpose.msk.msrb.mxu2 %vm229_vm2, %v2171_v54  ;;  %4409 = vmatpush.xpose.msk.msrb.mxu3 %vm229_vm2, %v2364_v43  ;;  %v2360_v54 = vmul.f32 %v5159_v4, %v6398_v61  ;;  %v2666_v43 = vmul.f32 %v5318_v24, %v6272_v26  ;;  %v2826_v4 = vmul.f32 %v5318_v24, %v6274_v25 }
 0x9ed   :  { %2567 = vmatpush.msrb.mxu0 %v2522_v50  ;;  %2632 = vmatpush.msra.mxu1 %v2353_v63  ;;  %v2827_v50 = vmul.f32 %v5318_v24, %v6276_v42  ;;  %v3062_v63 = vmul.f32 %v5249_v52, %v6335_v11  ;;  %v2904_v26 = vmul.f32 %v5249_v52, %v6346_v38 }
 0x9ee   :  { %v2665_v42 = vmul.f32 %v5318_v24, %v6279_v56  ;;  %v2823_v56 = vmul.f32 %v5318_v24, %v6306_v47  ;;  %v2902_v16 = vmul.f32 %v5249_v52, %v6381_v44  ;;  %v2821_v47 = vmul.f32 %v5318_v24, %v6327_v58 }
 0x9ef   :  { %2568 = vmatpush.msrb.mxu0 %v2521_v39  ;;  %2633 = vmatpush.msra.mxu1 %v2352_v2  ;;  %v2825_v39 = vmul.f32 %v5318_v24, %v6285_v31  ;;  %v2824_v2 = vmul.f32 %v5318_v24, %v6293_v22  ;;  %v6459_v31 = vadd.f32 %v6412_v57, %v2060_v10 }
 0x9f0   :  { %4394 = vmatpush.xpose.msk.msrb.mxu2 %vm229_vm2, %v2170_v33  ;;  %4410 = vmatpush.xpose.msk.msrb.mxu3 %vm229_vm2, %v2363_v41  ;;  %v2822_v22 = vmul.f32 %v5318_v24, %v6314_v35  ;;  %v2820_v35 = vmul.f32 %v5318_v24, %v6335_v11  ;;  %v2901_v33 = vmul.f32 %v5249_v52, %v6398_v61 }
 0x9f1   :  { %4462 = vmatpush.xpose.msk.msra.mxu0 %vm229_vm2, %v2908_v23  ;;  %3102 = vmatpush.msrb.mxu1 %v3069_v48  ;;  %v2063_v25 = vpop.f32.mrf.mxu3  ;;  %v2903_v23 = vmul.f32 %v5249_v52, %v6364_v34  ;;  %v2664_v48 = vmul.f32 %v5318_v24, %v6300_v0  ;;  %v2663_v0 = vmul.f32 %v5318_v24, %v6321_v20 }
 0x9f2   :  { %v2662_v41 = vmul.f32 %v5318_v24, %v6346_v38  ;;  %v6484_v20 = vadd.f32 %v6412_v57, %v2063_v25  ;;  %v2661_v52 = vmul.f32 %v5318_v24, %v6364_v34  ;;  %v2660_v58 = vmul.f32 %v5318_v24, %v6381_v44 }
 0x9f3   :  { %3103 = vmatpush.msrb.mxu1 %v3068_v29  ;;  %v2659_v34 = vmul.f32 %v5318_v24, %v6398_v61 }
 0x9f4   :  { %4395 = vmatpush.xpose.msk.msrb.mxu2 %vm229_vm2, %v2169_v17  ;;  %4411 = vmatpush.xpose.msk.msrb.mxu3 %vm229_vm2, %v2362_v1 }
 0x9f5   :  { %4463 = vmatpush.xpose.msk.msra.mxu0 %vm229_vm2, %v2907_v30  ;;  %3104 = vmatpush.msrb.mxu1 %v3067_v28 }
 0x9f7   :  { %3105 = vmatpush.msrb.mxu1 %v3066_v12 }
 0x9f8   :  { %4396 = vmatpush.xpose.msk.msrb.mxu2 %vm229_vm2, %v2168_v59  ;;  %4412 = vmatpush.xpose.msk.msrb.mxu3 %vm229_vm2, %v2361_v3 }
 0x9f9   :  { %4464 = vmatpush.xpose.msk.msra.mxu0 %vm229_vm2, %v2906_v55  ;;  %3106 = vmatpush.msrb.mxu1 %v3065_v37  ;;  %v2066_v29 = vpop.f32.mrf.mxu3 }
 0x9fa   :  { %v6497_v11 = vadd.f32 %v6412_v57, %v2066_v29 }
 0x9fb   :  { %3107 = vmatpush.msrb.mxu1 %v3064_v13 }
 0x9fc   :  { %4397 = vmatpush.xpose.msk.msrb.mxu2 %vm229_vm2, %v2167_v49  ;;  %4413 = vmatpush.xpose.msk.msrb.mxu3 %vm229_vm2, %v2360_v54 }
 0x9fd   :  { %4465 = vmatpush.xpose.msk.msra.mxu0 %vm229_vm2, %v2905_v32  ;;  %3108 = vmatpush.msrb.mxu1 %v3063_v36 }
 0x9ff   :  { %3109 = vmatpush.msrb.mxu1 %v3062_v63  ;;  %4398 = vmatmul.msk.f32.vlgmr.msrb.gmra.mxu2 %vm229_vm2, %v6432_v6 }
 0xa00   :  { %4438 = vmatpush.xpose.msk.msra.mxu2 %vm229_vm2, %v2666_v43  ;;  %2860 = vmatpush.msra.mxu3 %v2827_v50 }
 0xa01   :  { %4414 = vmatmul.msk.f32.vlgmr.msrb.gmra.mxu3 %vm229_vm2, %v6432_v6  ;;  %4466 = vmatpush.xpose.msk.msra.mxu0 %vm229_vm2, %v2904_v26  ;;  %v2069_v38 = vpop.f32.mrf.mxu3 }
 0xa02   :  { %2861 = vmatpush.msra.mxu3 %v2826_v4  ;;  %v6508_v30 = vadd.f32 %v6412_v57, %v2069_v38 }
 0xa04   :  { %4439 = vmatpush.xpose.msk.msra.mxu2 %vm229_vm2, %v2665_v42  ;;  %2862 = vmatpush.msra.mxu3 %v2825_v39 }
 0xa05   :  { %4467 = vmatpush.xpose.msk.msra.mxu0 %vm229_vm2, %v2903_v23 }
 0xa06   :  { %2863 = vmatpush.msra.mxu3 %v2824_v2 }
 0xa07   :  { %4399 = vmatmul.msk.f32.gmra.mxu2 %vm229_vm2, %v6459_v31 }
 0xa08   :  { %4440 = vmatpush.xpose.msk.msra.mxu2 %vm229_vm2, %v2664_v48  ;;  %2864 = vmatpush.msra.mxu3 %v2823_v56 }
 0xa09   :  { %4415 = vmatmul.msk.f32.gmra.mxu3 %vm229_vm2, %v6459_v31  ;;  %4468 = vmatpush.xpose.msk.msra.mxu0 %vm229_vm2, %v2902_v16  ;;  %v2072_v28 = vpop.f32.mrf.mxu3 }
 0xa0a   :  { %2865 = vmatpush.msra.mxu3 %v2822_v22  ;;  %v6515_v44 = vadd.f32 %v6412_v57, %v2072_v28 }
 0xa0c   :  { %4441 = vmatpush.xpose.msk.msra.mxu2 %vm229_vm2, %v2663_v0  ;;  %2866 = vmatpush.msra.mxu3 %v2821_v47 }
 0xa0d   :  { %4469 = vmatpush.xpose.msk.msra.mxu0 %vm229_vm2, %v2901_v33 }
 0xa0e   :  { %2867 = vmatpush.msra.mxu3 %v2820_v35 }
 0xa0f   :  { %4400 = vmatmul.msk.f32.gmra.mxu2 %vm229_vm2, %v6484_v20 }
 0xa10   :  { %4442 = vmatpush.xpose.msk.msra.mxu2 %vm229_vm2, %v2662_v41 }
 0xa11   :  { %4416 = vmatmul.msk.f32.gmra.mxu3 %vm229_vm2, %v6484_v20  ;;  %v2075_v24 = vpop.f32.mrf.mxu3 }
 0xa12   :  { %v6522_v17 = vadd.f32 %v6412_v57, %v2075_v24 }
 0xa14   :  { %4443 = vmatpush.xpose.msk.msra.mxu2 %vm229_vm2, %v2661_v52 }
 0xa17   :  { %4401 = vmatmul.msk.f32.gmra.mxu2 %vm229_vm2, %v6497_v11 }
 0xa18   :  { %4444 = vmatpush.xpose.msk.msra.mxu2 %vm229_vm2, %v2660_v58 }
 0xa19   :  { %4417 = vmatmul.msk.f32.gmra.mxu3 %vm229_vm2, %v6497_v11  ;;  %v2078_v1 = vpop.f32.mrf.mxu3 }
 0xa1a   :  { %v6529_v12 = vadd.f32 %v6412_v57, %v2078_v1 }
 0xa1c   :  { %4445 = vmatpush.xpose.msk.msra.mxu2 %vm229_vm2, %v2659_v34 }
 0xa1f   :  { %4402 = vmatmul.msk.f32.gmra.mxu2 %vm229_vm2, %v6508_v30 }
 0xa21   :  { %4418 = vmatmul.msk.f32.gmra.mxu3 %vm229_vm2, %v6508_v30 }
 0xa27   :  { %4403 = vmatmul.msk.f32.gmra.mxu2 %vm229_vm2, %v6515_v44 }
 0xa29   :  { %4419 = vmatmul.msk.f32.gmra.mxu3 %vm229_vm2, %v6515_v44 }
 0xa2f   :  { %4404 = vmatmul.msk.f32.gmra.mxu2 %vm229_vm2, %v6522_v17 }
 0xa31   :  { %4420 = vmatmul.msk.f32.gmra.mxu3 %vm229_vm2, %v6522_v17 }
 0xa37   :  { %4405 = vmatmul.msk.f32.gmra.mxu2 %vm229_vm2, %v6529_v12 }
 0xa39   :  { %4421 = vmatmul.msk.f32.gmra.mxu3 %vm229_vm2, %v6529_v12 }
 0xa3f   :  { %4446 = vmatmul.msk.f32.vlgmr.msra.gmra.mxu2 %vm229_vm2, %v6432_v6 }
 0xa47   :  { %4447 = vmatmul.msk.f32.gmra.mxu2 %vm229_vm2, %v6459_v31 }
 0xa4f   :  { %4448 = vmatmul.msk.f32.gmra.mxu2 %vm229_vm2, %v6484_v20 }
 0xa57   :  { %4449 = vmatmul.msk.f32.gmra.mxu2 %vm229_vm2, %v6497_v11 }
 0xa5f   :  { %4450 = vmatmul.msk.f32.gmra.mxu2 %vm229_vm2, %v6508_v30 }
 0xa67   :  { %4451 = vmatmul.msk.f32.gmra.mxu2 %vm229_vm2, %v6515_v44 }
 0xa6f   :  { %4452 = vmatmul.msk.f32.gmra.mxu2 %vm229_vm2, %v6522_v17 }
 0xa77   :  { %4453 = vmatmul.msk.f32.gmra.mxu2 %vm229_vm2, %v6529_v12 }
 0xa82   :  { %v2240_v22 = vpop.f32.mrf.mxu2 }
 0xa84   :  { %v2409_v55 = vpop.f32.mrf.mxu3 }
 0xa85   :  { %v2410_v37 = vadd.f32 %v2409_v55, %v5457_v15 }
 0xa87   :  { %v2433_v61 = vsel %vm478_vm14, %v2410_v37, -inf }
 0xa88   :  { %2434 = vmax.xlane.f32.xlu0 %v2433_v61 }
 0xa8a   :  { %v2243_v47 = vpop.f32.mrf.mxu2 }
 0xa8c   :  { %v2412_v59 = vpop.f32.mrf.mxu3 }
 0xa8d   :  { %v2413_v3 = vadd.f32 %v2412_v59, %v5466_v21 }
 0xa8f   :  { %v2436_v13 = vsel %vm478_vm14, %v2413_v3, -inf }
 0xa90   :  { %2437 = vmax.xlane.f32.xlu1 %v2436_v13 }
 0xa92   :  { %v2246_v38 = vpop.f32.mrf.mxu2 }
 0xa94   :  { %v2415_v10 = vpop.f32.mrf.mxu3 }
 0xa95   :  { %v2416_v57 = vadd.f32 %v2415_v10, %v5472_v5 }
 0xa97   :  { %v2439_v32 = vsel %vm478_vm14, %v2416_v57, -inf }
 0xa98   :  { %2440 = vmax.xlane.f32.xlu2 %v2439_v32 }
 0xa9c   :  { %v2418_v36 = vpop.f32.mrf.mxu3 }
 0xa9d   :  { %v2419_v49 = vadd.f32 %v2418_v36, %v5478_v7 }
 0xa9f   :  { %v2442_v54 = vsel %vm478_vm14, %v2419_v49, -inf }
 0xaa0   :  { %2443 = vmax.xlane.f32.xlu0 %v2442_v54 }
 0xaa4   :  { %v2421_v43 = vpop.f32.mrf.mxu3 }
 0xaa5   :  { %v2422_v50 = vadd.f32 %v2421_v43, %v5484_v51 }
 0xaa7   :  { %v2445_v63 = vsel %vm478_vm14, %v2422_v50, -inf }
 0xaa8   :  { %2446 = vmax.xlane.f32.xlu1 %v2445_v63 }
 0xaac   :  { %v2424_v4 = vpop.f32.mrf.mxu3 }
 0xaad   :  { %v2425_v26 = vadd.f32 %v2424_v4, %v5490_v62 }
 0xaaf   :  { %v2448_v42 = vsel %vm478_vm14, %v2425_v26, -inf }
 0xab0   :  { %2449 = vmax.xlane.f32.xlu2 %v2448_v42 }
 0xab4   :  { %v2427_v39 = vpop.f32.mrf.mxu3 }
 0xab5   :  { %v2428_v25 = vadd.f32 %v2427_v39, %v5496_v18 }
 0xab7   :  { %v2451_v2 = vsel %vm478_vm14, %v2428_v25, -inf }
 0xab8   :  { %2452 = vmax.xlane.f32.xlu0 %v2451_v2 }
 0xabc   :  { %v2430_v23 = vpop.f32.mrf.mxu3 }
 0xabd   :  { %v2431_v48 = vadd.f32 %v2430_v23, %v5501_v8 }
 0xabf   :  { %v2454_v56 = vsel %vm478_vm14, %v2431_v48, -inf }
 0xac0   :  { %2455 = vmax.xlane.f32.xlu2 %v2454_v56 }
 0xafb   :  { %v2435_v16 = vpop.xlane.xlu0 %2434 }
 0xafc   :  { %v2457_v0 = vsub.f32 %v2410_v37, %v2435_v16  ;;  %v2249_v37 = vpop.f32.mrf.mxu2 }
 0xafe   :  { %v2465_v35 = vmul.f32 1.442695, %v2457_v0 }
 0xb00   :  { %4725 = vpow2.f32 %v2465_v35 }
 0xb03   :  { %v2438_v33 = vpop.xlane.xlu1 %2437 }
 0xb04   :  { %v2458_v41 = vsub.f32 %v2413_v3, %v2438_v33  ;;  %v2252_v32 = vpop.f32.mrf.mxu2 }
 0xb06   :  { %v6567_v29 = vpop.eup %4725  ;;  %v2467_v52 = vmul.f32 1.442695, %v2458_v41 }
 0xb07   :  { %v2481_v58 = vsel %vm478_vm14, %v6567_v29, 0.0 }
 0xb08   :  { %4727 = vpow2.f32 %v2467_v52  ;;  %2482 = vadd.xlane.f32.xlu1 %v2481_v58 }
 0xb0b   :  { %v2441_v34 = vpop.xlane.xlu2 %2440 }
 0xb0c   :  { %v2459_v28 = vsub.f32 %v2416_v57, %v2441_v34  ;;  %v2255_v39 = vpop.f32.mrf.mxu2 }
 0xb0e   :  { %v6571_v24 = vpop.eup %4727  ;;  %v2469_v1 = vmul.f32 1.442695, %v2459_v28 }
 0xb0f   :  { %v2484_v55 = vsel %vm478_vm14, %v6571_v24, 0.0 }
 0xb10   :  { %4729 = vpow2.f32 %v2469_v1  ;;  %2485 = vadd.xlane.f32.xlu0 %v2484_v55  ;;  %v6601_v55 = vadd.f32 %v2249_v37, %v5478_v7  ;;  %v6615_v37 = vadd.f32 %v2246_v38, %v5472_v5  ;;  %v6630_v38 = vadd.f32 %v2255_v39, %v5490_v62 }
 0xb13   :  { %v2444_v61 = vpop.xlane.xlu0 %2443 }
 0xb14   :  { %v2460_v59 = vsub.f32 %v2419_v49, %v2444_v61  ;;  %v2258_v33 = vpop.f32.mrf.mxu2  ;;  %v2273_v61 = vsel %vm478_vm14, %v6601_v55, -inf }
 0xb16   :  { %v6575_v3 = vpop.eup %4729  ;;  %v2471_v13 = vmul.f32 1.442695, %v2460_v59 }
 0xb17   :  { %v2487_v10 = vsel %vm478_vm14, %v6575_v3, 0.0 }
 0xb18   :  { %4731 = vpow2.f32 %v2471_v13  ;;  %2488 = vadd.xlane.f32.xlu1 %v2487_v10  ;;  %v6621_v10 = vadd.f32 %v2252_v32, %v5484_v51 }
 0xb1b   :  { %v2447_v57 = vpop.xlane.xlu1 %2446 }
 0xb1c   :  { %v2461_v36 = vsub.f32 %v2422_v50, %v2447_v57  ;;  %v2261_v1 = vpop.f32.mrf.mxu2 }
 0xb1e   :  { %v6579_v54 = vpop.eup %4731  ;;  %v2473_v43 = vmul.f32 1.442695, %v2461_v36  ;;  %v2270_v36 = vsel %vm478_vm14, %v6615_v37, -inf }
 0xb1f   :  { %v2490_v63 = vsel %vm478_vm14, %v6579_v54, 0.0 }
 0xb20   :  { %4733 = vpow2.f32 %v2473_v43  ;;  %2491 = vadd.xlane.f32.xlu2 %v2490_v63  ;;  %v2276_v63 = vsel %vm478_vm14, %v6621_v10, -inf }
 0xb23   :  { %v2450_v49 = vpop.xlane.xlu2 %2449 }
 0xb24   :  { %v2462_v4 = vsub.f32 %v2425_v26, %v2450_v49  ;;  %v6592_v26 = vadd.f32 %v2240_v22, %v5457_v15  ;;  %v6604_v22 = vadd.f32 %v2243_v47, %v5466_v21  ;;  %v6618_v47 = vadd.f32 %v2258_v33, %v5496_v18  ;;  %v2708_v57 = vpop.f32.mrf.mxu2 }
 0xb25   :  { %v6633_v49 = vadd.f32 %v2708_v57, %v5457_v15 }
 0xb26   :  { %v6583_v42 = vpop.eup %4733  ;;  %v2475_v2 = vmul.f32 1.442695, %v2462_v4  ;;  %v2267_v13 = vsel %vm478_vm14, %v6604_v22, -inf  ;;  %v2282_v43 = vsel %vm478_vm14, %v6618_v47, -inf  ;;  %v2279_v4 = vsel %vm478_vm14, %v6630_v38, -inf }
 0xb27   :  { %v2493_v23 = vsel %vm478_vm14, %v6583_v42, 0.0 }
 0xb28   :  { %4735 = vpow2.f32 %v2475_v2  ;;  %2494 = vadd.xlane.f32.xlu0 %v2493_v23  ;;  %v2732_v2 = vsel %vm478_vm14, %v6633_v49, -inf  ;;  %v6640_v23 = vadd.f32 %v2261_v1, %v5501_v8 }
 0xb2b   :  { %v2453_v50 = vpop.xlane.xlu0 %2452 }
 0xb2c   :  { %v2463_v56 = vsub.f32 %v2428_v25, %v2453_v50  ;;  %v2264_v25 = vsel %vm478_vm14, %v6592_v26, -inf  ;;  %v2711_v32 = vpop.f32.mrf.mxu2  ;;  %v2285_v50 = vsel %vm478_vm14, %v6640_v23, -inf }
 0xb2e   :  { %v6587_v16 = vpop.eup %4735  ;;  %v2477_v0 = vmul.f32 1.442695, %v2463_v56  ;;  %v6645_v56 = vadd.f32 %v2711_v32, %v5466_v21 }
 0xb2f   :  { %v2496_v35 = vsel %vm478_vm14, %v6587_v16, 0.0 }
 0xb30   :  { %4737 = vpow2.f32 %v2477_v0  ;;  %2497 = vadd.xlane.f32.xlu1 %v2496_v35  ;;  %v2735_v0 = vsel %vm478_vm14, %v6645_v56, -inf }
 0xb33   :  { %v2456_v41 = vpop.xlane.xlu2 %2455 }
 0xb34   :  { %v2464_v52 = vsub.f32 %v2431_v48, %v2456_v41  ;;  %v2714_v39 = vpop.f32.mrf.mxu2 }
 0xb35   :  { %v6650_v33 = vadd.f32 %v2714_v39, %v5472_v5 }
 0xb36   :  { %v6594_v58 = vpop.eup %4737  ;;  %v2479_v34 = vmul.f32 1.442695, %v2464_v52 }
 0xb37   :  { %v2499_v28 = vsel %vm478_vm14, %v6594_v58, 0.0  ;;  %v2738_v41 = vsel %vm478_vm14, %v6650_v33, -inf }
 0xb38   :  { %4739 = vpow2.f32 %v2479_v34  ;;  %2265 = vmax.xlane.f32.xlu1 %v2264_v25  ;;  %2500 = vadd.xlane.f32.xlu2 %v2499_v28 }
 0xb3c   :  { %v2717_v35 = vpop.f32.mrf.mxu2 }
 0xb3d   :  { %v6655_v52 = vadd.f32 %v2717_v35, %v5478_v7 }
 0xb3e   :  { %v6606_v48 = vpop.eup %4739 }
 0xb3f   :  { %v2502_v59 = vsel %vm478_vm14, %v6606_v48, 0.0  ;;  %v2741_v25 = vsel %vm478_vm14, %v6655_v52, -inf }
 0xb40   :  { %2274 = vmax.xlane.f32.xlu1 %v2273_v61  ;;  %2503 = vadd.xlane.f32.xlu0 %v2502_v59 }
 0xb41   :  { %2268 = vmax.xlane.f32.xlu2 %v2267_v13 }
 0xb44   :  { %v2720_v34 = vpop.f32.mrf.mxu2 }
 0xb45   :  { %v6660_v28 = vadd.f32 %v2720_v34, %v5484_v51 }
 0xb47   :  { %v2744_v61 = vsel %vm478_vm14, %v6660_v28, -inf }
 0xb48   :  { %2271 = vmax.xlane.f32.xlu0 %v2270_v36  ;;  %2283 = vmax.xlane.f32.xlu1 %v2282_v43 }
 0xb49   :  { %2277 = vmax.xlane.f32.xlu2 %v2276_v63 }
 0xb4c   :  { %v2723_v1 = vpop.f32.mrf.mxu2 }
 0xb4d   :  { %v6665_v59 = vadd.f32 %v2723_v1, %v5490_v62 }
 0xb4f   :  { %v2747_v57 = vsel %vm478_vm14, %v6665_v59, -inf }
 0xb50   :  { %2280 = vmax.xlane.f32.xlu0 %v2279_v4  ;;  %2733 = vmax.xlane.f32.xlu1 %v2732_v2 }
 0xb54   :  { %v2726_v36 = vpop.f32.mrf.mxu2 }
 0xb55   :  { %v6670_v63 = vadd.f32 %v2726_v36, %v5496_v18 }
 0xb57   :  { %v2750_v2 = vsel %vm478_vm14, %v6670_v63, -inf }
 0xb58   :  { %2286 = vmax.xlane.f32.xlu0 %v2285_v50 }
 0xb60   :  { %2736 = vmax.xlane.f32.xlu0 %v2735_v0 }
 0xb68   :  { %2739 = vmax.xlane.f32.xlu0 %v2738_v41 }
 0xb70   :  { %2742 = vmax.xlane.f32.xlu0 %v2741_v25 }
 0xb78   :  { %2745 = vmax.xlane.f32.xlu0 %v2744_v61 }
 0xb7b   :  { %v2483_v13 = vpop.xlane.xlu1 %2482 }
 0xb7c   :  { %4741 = vrcp.f32 %v2483_v13 }
 0xb80   :  { %2748 = vmax.xlane.f32.xlu0 %v2747_v57 }
 0xb82   :  { %v4742_v43 = vpop.eup %4741 }
 0xb83   :  { %v2513_v32 = vmul.f32 %v4742_v43, %v6567_v29  ;;  %v2486_v4 = vpop.xlane.xlu0 %2485 }
 0xb84   :  { %4743 = vrcp.f32 %v2486_v4 }
 0xb85   :  { %4422 = vmatmul.msk.f32.vlgmr.msrb.gmra.mxu0 %vm478_vm14, %v2513_v32 }
 0xb88   :  { %2751 = vmax.xlane.f32.xlu0 %v2750_v2 }
 0xb8a   :  { %v4744_v50 = vpop.eup %4743 }
 0xb8b   :  { %v2489_v39 = vpop.xlane.xlu1 %2488  ;;  %v2514_v0 = vmul.f32 %v4744_v50, %v6571_v24 }
 0xb8c   :  { %4745 = vrcp.f32 %v2489_v39 }
 0xb8d   :  { %4423 = vmatmul.msk.f32.gmra.mxu0 %vm478_vm14, %v2514_v0 }
 0xb92   :  { %v4746_v35 = vpop.eup %4745 }
 0xb93   :  { %v2492_v41 = vpop.xlane.xlu2 %2491  ;;  %v2515_v34 = vmul.f32 %v4746_v35, %v6575_v3 }
 0xb94   :  { %4747 = vrcp.f32 %v2492_v41 }
 0xb95   :  { %4424 = vmatmul.msk.f32.gmra.mxu0 %vm478_vm14, %v2515_v34 }
 0xb9a   :  { %v4748_v29 = vpop.eup %4747 }
 0xb9b   :  { %v2495_v25 = vpop.xlane.xlu0 %2494  ;;  %v2516_v1 = vmul.f32 %v4748_v29, %v6579_v54 }
 0xb9c   :  { %4749 = vrcp.f32 %v2495_v25 }
 0xb9d   :  { %4425 = vmatmul.msk.f32.gmra.mxu0 %vm478_vm14, %v2516_v1 }
 0xba2   :  { %v4750_v61 = vpop.eup %4749 }
 0xba3   :  { %v2498_v13 = vpop.xlane.xlu1 %2497  ;;  %v2517_v24 = vmul.f32 %v4750_v61, %v6583_v42 }
 0xba4   :  { %4751 = vrcp.f32 %v2498_v13 }
 0xba5   :  { %4426 = vmatmul.msk.f32.gmra.mxu0 %vm478_vm14, %v2517_v24 }
 0xbaa   :  { %v4752_v57 = vpop.eup %4751 }
 0xbab   :  { %v2266_v36 = vpop.xlane.xlu1 %2265  ;;  %v2501_v3 = vpop.xlane.xlu2 %2500  ;;  %v2518_v43 = vmul.f32 %v4752_v57, %v6587_v16 }
 0xbac   :  { %v2288_v32 = vsub.f32 %v6592_v26, %v2266_v36  ;;  %4753 = vrcp.f32 %v2501_v3 }
 0xbad   :  { %4427 = vmatmul.msk.f32.gmra.mxu0 %vm478_vm14, %v2518_v43 }
 0xbae   :  { %v2296_v54 = vmul.f32 1.442695, %v2288_v32 }
 0xbb0   :  { %4755 = vpow2.f32 %v2296_v54 }
 0xbb2   :  { %v4754_v4 = vpop.eup %4753 }
 0xbb3   :  { %v2275_v2 = vpop.xlane.xlu1 %2274  ;;  %v2504_v50 = vpop.xlane.xlu0 %2503  ;;  %v2519_v42 = vmul.f32 %v4754_v4, %v6594_v58 }
 0xbb4   :  { %v2269_v39 = vpop.xlane.xlu2 %2268  ;;  %4757 = vrcp.f32 %v2504_v50  ;;  %v2291_v61 = vsub.f32 %v6601_v55, %v2275_v2 }
 0xbb5   :  { %v2289_v0 = vsub.f32 %v6604_v22, %v2269_v39  ;;  %4428 = vmatmul.msk.f32.gmra.mxu0 %vm478_vm14, %v2519_v42 }
 0xbb6   :  { %v6690_v35 = vpop.eup %4755  ;;  %v2302_v24 = vmul.f32 1.442695, %v2291_v61 }
 0xbb7   :  { %v2298_v16 = vmul.f32 1.442695, %v2289_v0  ;;  %v2312_v26 = vsel %vm478_vm14, %v6690_v35, 0.0 }
 0xbb8   :  { %2313 = vadd.xlane.f32.xlu2 %v2312_v26 }
 0xbb9   :  { %4759 = vpow2.f32 %v2298_v16 }
 0xbba   :  { %v4758_v41 = vpop.eup %4757 }
 0xbbb   :  { %v2272_v34 = vpop.xlane.xlu0 %2271  ;;  %v2284_v29 = vpop.xlane.xlu1 %2283  ;;  %v2520_v25 = vmul.f32 %v4758_v41, %v6606_v48 }
 0xbbc   :  { %v2290_v58 = vsub.f32 %v6615_v37, %v2272_v34  ;;  %v2278_v3 = vpop.xlane.xlu2 %2277 }
 0xbbd   :  { %4429 = vmatmul.msk.f32.gmra.mxu0 %vm478_vm14, %v2520_v25  ;;  %v2292_v55 = vsub.f32 %v6621_v10, %v2278_v3 }
 0xbbe   :  { %v2300_v22 = vmul.f32 1.442695, %v2290_v58 }
 0xbbf   :  { %v6697_v1 = vpop.eup %4759  ;;  %v2304_v54 = vmul.f32 1.442695, %v2292_v55 }
 0xbc0   :  { %4761 = vpow2.f32 %v2300_v22  ;;  %v2315_v13 = vsel %vm478_vm14, %v6697_v1, 0.0 }
 0xbc1   :  { %2316 = vadd.xlane.f32.xlu2 %v2315_v13  ;;  %4763 = vpow2.f32 %v2302_v24 }
 0xbc3   :  { %v2281_v57 = vpop.xlane.xlu0 %2280  ;;  %v2734_v36 = vpop.xlane.xlu1 %2733 }
 0xbc4   :  { %v2756_v48 = vsub.f32 %v6633_v49, %v2734_v36 }
 0xbc5   :  { %4470 = vmatmul.msk.f32.vlgmr.msra.gmra.mxu0 %vm229_vm2, %v6432_v6  ;;  %v2293_v6 = vsub.f32 %v6630_v38, %v2281_v57  ;;  %v2294_v38 = vsub.f32 %v6618_v47, %v2284_v29 }
 0xbc6   :  { %v6705_v37 = vpop.eup %4761  ;;  %v2764_v43 = vmul.f32 1.442695, %v2756_v48 }
 0xbc7   :  { %v2318_v32 = vsel %vm478_vm14, %v6705_v37, 0.0  ;;  %v6710_v2 = vpop.eup %4763  ;;  %v2306_v42 = vmul.f32 1.442695, %v2293_v6  ;;  %v2308_v41 = vmul.f32 1.442695, %v2294_v38 }
 0xbc8   :  { %4765 = vpow2.f32 %v2764_v43  ;;  %v2321_v10 = vsel %vm478_vm14, %v6710_v2, 0.0 }
 0xbc9   :  { %2319 = vadd.xlane.f32.xlu2 %v2318_v32  ;;  %4767 = vpow2.f32 %v2304_v54 }
 0xbca   :  { %4769 = vpow2.f32 %v2306_v42 }
 0xbcb   :  { %v2287_v4 = vpop.xlane.xlu0 %2286 }
 0xbcc   :  { %v2295_v47 = vsub.f32 %v6640_v23, %v2287_v4 }
 0xbcd   :  { %4471 = vmatmul.msk.f32.gmra.mxu0 %vm229_vm2, %v6459_v31 }
 0xbce   :  { %v6714_v49 = vpop.eup %4765 }
 0xbcf   :  { %v2780_v50 = vsel %vm478_vm14, %v6714_v49, 0.0  ;;  %v6722_v16 = vpop.eup %4767 }
 0xbd0   :  { %2781 = vadd.xlane.f32.xlu0 %v2780_v50  ;;  %v2324_v26 = vsel %vm478_vm14, %v6722_v16, 0.0  ;;  %v6730_v58 = vpop.eup %4769 }
 0xbd1   :  { %2322 = vadd.xlane.f32.xlu2 %v2321_v10  ;;  %v2327_v22 = vsel %vm478_vm14, %v6730_v58, 0.0 }
 0xbd3   :  { %v2737_v39 = vpop.xlane.xlu0 %2736 }
 0xbd4   :  { %v2757_v0 = vsub.f32 %v6645_v56, %v2737_v39 }
 0xbd5   :  { %4472 = vmatmul.msk.f32.gmra.mxu0 %vm229_vm2, %v6484_v20 }
 0xbd6   :  { %v2766_v31 = vmul.f32 1.442695, %v2757_v0 }
 0xbd8   :  { %4771 = vpow2.f32 %v2766_v31 }
 0xbd9   :  { %2325 = vadd.xlane.f32.xlu2 %v2324_v26  ;;  %4773 = vpow2.f32 %v2308_v41 }
 0xbdb   :  { %v2740_v34 = vpop.xlane.xlu0 %2739 }
 0xbdc   :  { %v2758_v25 = vsub.f32 %v6650_v33, %v2740_v34  ;;  %v2310_v33 = vmul.f32 1.442695, %v2295_v47 }
 0xbdd   :  { %4473 = vmatmul.msk.f32.gmra.mxu0 %vm229_vm2, %v6497_v11 }
 0xbde   :  { %v6734_v56 = vpop.eup %4771  ;;  %v2768_v20 = vmul.f32 1.442695, %v2758_v25 }
 0xbdf   :  { %v2783_v29 = vsel %vm478_vm14, %v6734_v56, 0.0  ;;  %v6741_v61 = vpop.eup %4773 }
 0xbe0   :  { %4775 = vpow2.f32 %v2768_v20  ;;  %2784 = vadd.xlane.f32.xlu0 %v2783_v29  ;;  %v2330_v13 = vsel %vm478_vm14, %v6741_v61, 0.0 }
 0xbe1   :  { %2328 = vadd.xlane.f32.xlu2 %v2327_v22  ;;  %4777 = vpow2.f32 %v2310_v33 }
 0xbe3   :  { %v6769_v43 = vpop.xlane.xlu0 %2742 }
 0xbe5   :  { %4474 = vmatmul.msk.f32.gmra.mxu0 %vm229_vm2, %v6508_v30 }
 0xbe6   :  { %v6745_v11 = vpop.eup %4775 }
 0xbe7   :  { %v2786_v23 = vsel %vm478_vm14, %v6745_v11, 0.0  ;;  %v6751_v24 = vpop.eup %4777 }
 0xbe8   :  { %2787 = vadd.xlane.f32.xlu0 %v2786_v23  ;;  %v2333_v57 = vsel %vm478_vm14, %v6751_v24, 0.0 }
 0xbe9   :  { %2331 = vadd.xlane.f32.xlu2 %v2330_v13 }
 0xbeb   :  { %v6773_v55 = vpop.xlane.xlu0 %2745 }
 0xbed   :  { %4475 = vmatmul.msk.f32.gmra.mxu0 %vm229_vm2, %v6515_v44 }
 0xbf1   :  { %2334 = vadd.xlane.f32.xlu2 %v2333_v57 }
 0xbf5   :  { %4476 = vmatmul.msk.f32.gmra.mxu0 %vm229_vm2, %v6522_v17 }
 0xbfd   :  { %4477 = vmatmul.msk.f32.gmra.mxu0 %vm229_vm2, %v6529_v12  ;;  %v6777_v12 = vpop.xlane.xlu0 %2748 }
 0xc02   :  { %v6761_v30 = vpop.f32.mrf.mxu0 }
 0xc05   :  { %v6785_v39 = vpop.xlane.xlu0 %2751 }
 0xc0a   :  { %v6763_v36 = vpop.f32.mrf.mxu0 }
 0xc12   :  { %v6765_v3 = vpop.f32.mrf.mxu0 }
 0xc1a   :  { %v6767_v48 = vpop.f32.mrf.mxu0 }
 0xc22   :  { %v6771_v44 = vpop.f32.mrf.mxu0 }
 0xc2a   :  { %v6775_v32 = vpop.f32.mrf.mxu0 }
 0xc2b   :  { %v2314_v17 = vpop.xlane.xlu2 %2313 }
 0xc2c   :  { %4779 = vrcp.f32 %v2314_v17 }
 0xc32   :  { %v4780_v54 = vpop.eup %4779  ;;  %v6779_v4 = vpop.f32.mrf.mxu0 }
 0xc33   :  { %v2344_v6 = vmul.f32 %v4780_v54, %v6690_v35 }
 0xc34   :  { %v2317_v10 = vpop.xlane.xlu2 %2316 }
 0xc35   :  { %4781 = vrcp.f32 %v2317_v10  ;;  %4430 = vmatmul.msk.f32.vlgmr.msra.gmra.mxu1 %vm478_vm14, %v2344_v6 }
 0xc3a   :  { %v6783_v50 = vpop.f32.mrf.mxu0 }
 0xc3b   :  { %v4782_v42 = vpop.eup %4781 }
 0xc3c   :  { %v2320_v0 = vpop.xlane.xlu2 %2319  ;;  %v2345_v31 = vmul.f32 %v4782_v42, %v6697_v1 }
 0xc3d   :  { %4783 = vrcp.f32 %v2320_v0 }
 0xc3e   :  { %4431 = vmatmul.msk.f32.gmra.mxu1 %vm478_vm14, %v2345_v31 }
 0xc42   :  { %v2950_v38 = vpop.f32.mrf.mxu0 }
 0xc43   :  { %v4784_v26 = vpop.eup %4783  ;;  %v6790_v41 = vadd.f32 %v2950_v38, %v5457_v15  ;;  %v2782_v34 = vpop.xlane.xlu0 %2781 }
 0xc44   :  { %v2323_v35 = vpop.xlane.xlu2 %2322  ;;  %v2346_v25 = vmul.f32 %v4784_v26, %v6705_v37 }
 0xc45   :  { %4785 = vrcp.f32 %v2323_v35  ;;  %v2974_v20 = vsel %vm478_vm14, %v6790_v41, -inf }
 0xc46   :  { %4787 = vrcp.f32 %v2782_v34  ;;  %4432 = vmatmul.msk.f32.gmra.mxu1 %vm478_vm14, %v2346_v25  ;;  %2975 = vmax.xlane.f32.xlu1 %v2974_v20 }
 0xc4a   :  { %v2953_v1 = vpop.f32.mrf.mxu0 }
 0xc4b   :  { %v4786_v47 = vpop.eup %4785  ;;  %v6797_v29 = vadd.f32 %v2953_v1, %v5466_v21 }
 0xc4c   :  { %v4788_v22 = vpop.eup %4787  ;;  %v2326_v15 = vpop.xlane.xlu2 %2325  ;;  %v2347_v33 = vmul.f32 %v4786_v47, %v6710_v2 }
 0xc4d   :  { %v2812_v23 = vmul.f32 %v4788_v22, %v6714_v49  ;;  %4789 = vrcp.f32 %v2326_v15  ;;  %v2977_v37 = vsel %vm478_vm14, %v6797_v29, -inf }
 0xc4e   :  { %4433 = vmatmul.msk.f32.gmra.mxu1 %vm478_vm14, %v2347_v33  ;;  %2978 = vmax.xlane.f32.xlu1 %v2977_v37 }
 0xc4f   :  { %4454 = vmatmul.msk.f32.vlgmr.msra.gmra.mxu3 %vm478_vm14, %v2812_v23 }
 0xc52   :  { %v2956_v13 = vpop.f32.mrf.mxu0 }
 0xc53   :  { %v4790_v57 = vpop.eup %4789  ;;  %v6806_v21 = vadd.f32 %v2956_v13, %v5472_v5  ;;  %v2785_v17 = vpop.xlane.xlu0 %2784 }
 0xc54   :  { %v2329_v54 = vpop.xlane.xlu2 %2328  ;;  %4791 = vrcp.f32 %v2785_v17  ;;  %v2348_v2 = vmul.f32 %v4790_v57, %v6722_v16 }
 0xc55   :  { %4793 = vrcp.f32 %v2329_v54  ;;  %v2980_v49 = vsel %vm478_vm14, %v6806_v21, -inf }
 0xc56   :  { %4434 = vmatmul.msk.f32.gmra.mxu1 %vm478_vm14, %v2348_v2  ;;  %2981 = vmax.xlane.f32.xlu1 %v2980_v49 }
 0xc5a   :  { %v4792_v6 = vpop.eup %4791  ;;  %v2959_v10 = vpop.f32.mrf.mxu0 }
 0xc5b   :  { %v4794_v42 = vpop.eup %4793  ;;  %v6813_v0 = vadd.f32 %v2959_v10, %v5478_v7  ;;  %v2788_v5 = vpop.xlane.xlu0 %2787  ;;  %v2813_v31 = vmul.f32 %v4792_v6, %v6734_v56 }
 0xc5c   :  { %v2332_v38 = vpop.xlane.xlu2 %2331  ;;  %4795 = vrcp.f32 %v2788_v5  ;;  %v2349_v16 = vmul.f32 %v4794_v42, %v6730_v58  ;;  %v2760_v5 = vsub.f32 %v6660_v28, %v6773_v55 }
 0xc5d   :  { %4797 = vrcp.f32 %v2332_v38  ;;  %4455 = vmatmul.msk.f32.gmra.mxu3 %vm478_vm14, %v2813_v31  ;;  %v2983_v26 = vsel %vm478_vm14, %v6813_v0, -inf }
 0xc5e   :  { %4435 = vmatmul.msk.f32.gmra.mxu1 %vm478_vm14, %v2349_v16  ;;  %2984 = vmax.xlane.f32.xlu1 %v2983_v26  ;;  %v2772_v16 = vmul.f32 1.442695, %v2760_v5 }
 0xc62   :  { %v4796_v35 = vpop.eup %4795  ;;  %v2962_v34 = vpop.f32.mrf.mxu0 }
 0xc63   :  { %v4798_v7 = vpop.eup %4797  ;;  %v6822_v25 = vadd.f32 %v2962_v34, %v5484_v51  ;;  %v2814_v56 = vmul.f32 %v4796_v35, %v6745_v11 }
 0xc64   :  { %v2335_v20 = vpop.xlane.xlu2 %2334  ;;  %v2350_v58 = vmul.f32 %v4798_v7, %v6741_v61  ;;  %v2729_v61 = vpop.f32.mrf.mxu2 }
 0xc65   :  { %4799 = vrcp.f32 %v2335_v20  ;;  %4456 = vmatmul.msk.f32.gmra.mxu3 %vm478_vm14, %v2814_v56  ;;  %v2986_v1 = vsel %vm478_vm14, %v6822_v25, -inf  ;;  %v6838_v33 = vadd.f32 %v2729_v61, %v5501_v8 }
 0xc66   :  { %4436 = vmatmul.msk.f32.gmra.mxu1 %vm478_vm14, %v2350_v58  ;;  %2987 = vmax.xlane.f32.xlu1 %v2986_v1 }
 0xc6a   :  { %v2965_v47 = vpop.f32.mrf.mxu0 }
 0xc6b   :  { %v4800_v22 = vpop.eup %4799  ;;  %v6831_v15 = vadd.f32 %v2965_v47, %v5490_v62  ;;  %v2759_v62 = vsub.f32 %v6655_v52, %v6769_v43 }
 0xc6c   :  { %v2351_v51 = vmul.f32 %v4800_v22, %v6751_v24  ;;  %v2753_v24 = vsel %vm478_vm14, %v6838_v33, -inf }
 0xc6d   :  { %v2989_v11 = vsel %vm478_vm14, %v6831_v15, -inf  ;;  %v2770_v57 = vmul.f32 1.442695, %v2759_v62 }
 0xc6e   :  { %4437 = vmatmul.msk.f32.gmra.mxu1 %vm478_vm14, %v2351_v51  ;;  %2990 = vmax.xlane.f32.xlu1 %v2989_v11 }
 0xc6f   :  { %4801 = vpow2.f32 %v2770_v57 }
 0xc72   :  { %v2968_v23 = vpop.f32.mrf.mxu0 }
 0xc73   :  { %v6841_v37 = vadd.f32 %v2968_v23, %v5496_v18 }
 0xc75   :  { %v2992_v13 = vsel %vm478_vm14, %v6841_v37, -inf  ;;  %v6854_v2 = vpop.eup %4801 }
 0xc76   :  { %2754 = vmax.xlane.f32.xlu1 %v2753_v24  ;;  %2993 = vmax.xlane.f32.xlu2 %v2992_v13  ;;  %v2789_v52 = vsel %vm478_vm14, %v6854_v2, 0.0 }
 0xc7a   :  { %v2971_v17 = vpop.f32.mrf.mxu0 }
 0xc7b   :  { %v6850_v54 = vadd.f32 %v2971_v17, %v5501_v8 }
 0xc7d   :  { %v2995_v18 = vsel %vm478_vm14, %v6850_v54, -inf }
 0xc7e   :  { %2996 = vmax.xlane.f32.xlu2 %v2995_v18 }
 0xc86   :  { %2790 = vadd.xlane.f32.xlu2 %v2789_v52 }
 0xcb9   :  { %v2976_v43 = vpop.xlane.xlu1 %2975 }
 0xcba   :  { %v2998_v49 = vsub.f32 %v6790_v41, %v2976_v43 }
 0xcbc   :  { %v3006_v6 = vmul.f32 1.442695, %v2998_v49 }
 0xcbe   :  { %4803 = vpow2.f32 %v3006_v6 }
 0xcc1   :  { %v2979_v10 = vpop.xlane.xlu1 %2978 }
 0xcc2   :  { %v2999_v8 = vsub.f32 %v6797_v29, %v2979_v10  ;;  %v2761_v29 = vsub.f32 %v6665_v59, %v6777_v12 }
 0xcc4   :  { %v6860_v42 = vpop.eup %4803  ;;  %v3008_v31 = vmul.f32 1.442695, %v2999_v8  ;;  %v2774_v55 = vmul.f32 1.442695, %v2761_v29 }
 0xcc5   :  { %v3022_v38 = vsel %vm478_vm14, %v6860_v42, 0.0 }
 0xcc6   :  { %4805 = vpow2.f32 %v3008_v31  ;;  %3023 = vadd.xlane.f32.xlu1 %v3022_v38 }
 0xcc7   :  { %4807 = vpow2.f32 %v2772_v16 }
 0xcc9   :  { %v2982_v26 = vpop.xlane.xlu1 %2981 }
 0xcca   :  { %v3000_v41 = vsub.f32 %v6806_v21, %v2982_v26  ;;  %v2762_v21 = vsub.f32 %v6670_v63, %v6785_v39 }
 0xccc   :  { %v6867_v35 = vpop.eup %4805  ;;  %v3010_v34 = vmul.f32 1.442695, %v3000_v41  ;;  %v2776_v47 = vmul.f32 1.442695, %v2762_v21 }
 0xccd   :  { %v3025_v28 = vsel %vm478_vm14, %v6867_v35, 0.0  ;;  %v6873_v56 = vpop.eup %4807 }
 0xcce   :  { %4809 = vpow2.f32 %v3010_v34  ;;  %3026 = vadd.xlane.f32.xlu1 %v3025_v28  ;;  %v2792_v59 = vsel %vm478_vm14, %v6873_v56, 0.0 }
 0xccf   :  { %4811 = vpow2.f32 %v2774_v55 }
 0xcd1   :  { %v2985_v7 = vpop.xlane.xlu1 %2984 }
 0xcd2   :  { %v3001_v20 = vsub.f32 %v6813_v0, %v2985_v7 }
 0xcd4   :  { %v6876_v58 = vpop.eup %4809  ;;  %v3012_v1 = vmul.f32 1.442695, %v3001_v20 }
 0xcd5   :  { %v3028_v12 = vsel %vm478_vm14, %v6876_v58, 0.0  ;;  %v6884_v51 = vpop.eup %4811 }
 0xcd6   :  { %4813 = vpow2.f32 %v3012_v1  ;;  %2793 = vadd.xlane.f32.xlu1 %v2792_v59  ;;  %3029 = vadd.xlane.f32.xlu0 %v3028_v12  ;;  %v2795_v39 = vsel %vm478_vm14, %v6884_v51, 0.0 }
 0xcd7   :  { %4815 = vpow2.f32 %v2776_v47 }
 0xcd9   :  { %v2988_v22 = vpop.xlane.xlu1 %2987 }
 0xcda   :  { %v3002_v0 = vsub.f32 %v6822_v25, %v2988_v22 }
 0xcdc   :  { %v6887_v11 = vpop.eup %4813  ;;  %v3014_v63 = vmul.f32 1.442695, %v3002_v0 }
 0xcdd   :  { %v3031_v61 = vsel %vm478_vm14, %v6887_v11, 0.0  ;;  %v6893_v62 = vpop.eup %4815 }
 0xcde   :  { %4817 = vpow2.f32 %v3014_v63  ;;  %2796 = vadd.xlane.f32.xlu0 %v2795_v39  ;;  %3032 = vadd.xlane.f32.xlu2 %v3031_v61  ;;  %v2798_v57 = vsel %vm478_vm14, %v6893_v62, 0.0 }
 0xce1   :  { %v2991_v23 = vpop.xlane.xlu1 %2990 }
 0xce2   :  { %v3003_v24 = vsub.f32 %v6831_v15, %v2991_v23 }
 0xce4   :  { %v6896_v13 = vpop.eup %4817  ;;  %v3016_v25 = vmul.f32 1.442695, %v3003_v24 }
 0xce5   :  { %v3034_v17 = vsel %vm478_vm14, %v6896_v13, 0.0 }
 0xce6   :  { %4819 = vpow2.f32 %v3016_v25  ;;  %2799 = vadd.xlane.f32.xlu2 %v2798_v57  ;;  %3035 = vadd.xlane.f32.xlu1 %v3034_v17 }
 0xce9   :  { %v2994_v18 = vpop.xlane.xlu2 %2993  ;;  %v2755_v52 = vpop.xlane.xlu1 %2754 }
 0xcea   :  { %v3004_v43 = vsub.f32 %v6841_v37, %v2994_v18  ;;  %v2763_v49 = vsub.f32 %v6838_v33, %v2755_v52 }
 0xcec   :  { %v6904_v6 = vpop.eup %4819  ;;  %v3018_v15 = vmul.f32 1.442695, %v3004_v43  ;;  %v2778_v10 = vmul.f32 1.442695, %v2763_v49  ;;  %v2012_v43 = vld [vmem:[#allocation2 + $0xf0] sm:$0xff] }
 0xced   :  { %v3037_v8 = vsel %vm478_vm14, %v6904_v6, 0.0 }
 0xcee   :  { %4821 = vpow2.f32 %v3018_v15  ;;  %3038 = vadd.xlane.f32.xlu0 %v3037_v8 }
 0xcef   :  { %4823 = vpow2.f32 %v2778_v10 }
 0xcf1   :  { %v2997_v5 = vpop.xlane.xlu2 %2996 }
 0xcf2   :  { %v3005_v31 = vsub.f32 %v6850_v54, %v2997_v5 }
 0xcf4   :  { %v6909_v38 = vpop.eup %4821  ;;  %v3020_v16 = vmul.f32 1.442695, %v3005_v31  ;;  %v2635_v31 = vpop.f32.mrf.mxu1 }
 0xcf5   :  { %v6911_v26 = vpop.eup %4823  ;;  %v3040_v33 = vsel %vm478_vm14, %v6909_v38, 0.0 }
 0xcf6   :  { %4825 = vpow2.f32 %v3020_v16  ;;  %3041 = vadd.xlane.f32.xlu2 %v3040_v33  ;;  %v2801_v37 = vsel %vm478_vm14, %v6911_v26, 0.0 }
 0xcf7   :  { %2802 = vadd.xlane.f32.xlu1 %v2801_v37 }
 0xcf9   :  { %v2791_v41 = vpop.xlane.xlu2 %2790 }
 0xcfa   :  { %4827 = vrcp.f32 %v2791_v41 }
 0xcfc   :  { %v6917_v29 = vpop.eup %4825  ;;  %v2638_v37 = vpop.f32.mrf.mxu1 }
 0xcfd   :  { %v3043_v54 = vsel %vm478_vm14, %v6917_v29, 0.0 }
 0xcfe   :  { %3044 = vadd.xlane.f32.xlu0 %v3043_v54 }
 0xd00   :  { %v4828_v34 = vpop.eup %4827 }
 0xd01   :  { %v2815_v28 = vmul.f32 %v4828_v34, %v6854_v2 }
 0xd03   :  { %4457 = vmatmul.msk.f32.gmra.mxu3 %vm478_vm14, %v2815_v28  ;;  %v2011_v28 = vld [vmem:[#allocation2 + $0xe8] sm:$0xff] }
 0xd04   :  { %v2641_v41 = vpop.f32.mrf.mxu1 }
 0xd0c   :  { %v2644_v54 = vpop.f32.mrf.mxu1 }
 0xd14   :  { %v2647_v34 = vpop.f32.mrf.mxu1 }
 0xd39   :  { %v3024_v55 = vpop.xlane.xlu1 %3023 }
 0xd3a   :  { %4829 = vrcp.f32 %v3024_v55  ;;  %v2010_v55 = vld [vmem:[#allocation2 + $0xe0] sm:$0xff] }
 0xd40   :  { %v4830_v7 = vpop.eup %4829 }
 0xd41   :  { %v3054_v20 = vmul.f32 %v4830_v7, %v6860_v42  ;;  %v3027_v21 = vpop.xlane.xlu1 %3026 }
 0xd42   :  { %4831 = vrcp.f32 %v3027_v21  ;;  %v2636_v21 = vadd.f32 %v2635_v31, %v6761_v30 }
 0xd43   :  { %4478 = vmatmul.msk.f32.vlgmr.msrb.gmra.mxu1 %vm478_vm14, %v3054_v20 }
 0xd48   :  { %v4832_v1 = vpop.eup %4831 }
 0xd49   :  { %v3030_v59 = vpop.xlane.xlu0 %3029  ;;  %v2794_v12 = vpop.xlane.xlu1 %2793  ;;  %v3055_v47 = vmul.f32 %v4832_v1, %v6867_v35 }
 0xd4a   :  { %4833 = vrcp.f32 %v3030_v59 }
 0xd4b   :  { %4835 = vrcp.f32 %v2794_v12  ;;  %4479 = vmatmul.msk.f32.gmra.mxu1 %vm478_vm14, %v3055_v47  ;;  %v2639_v47 = vadd.f32 %v2638_v37, %v6763_v36 }
 0xd50   :  { %v4834_v2 = vpop.eup %4833 }
 0xd51   :  { %v4836_v22 = vpop.eup %4835  ;;  %v2797_v0 = vpop.xlane.xlu0 %2796  ;;  %v3056_v39 = vmul.f32 %v4834_v2, %v6876_v58 }
 0xd52   :  { %v3033_v63 = vpop.xlane.xlu2 %3032  ;;  %4837 = vrcp.f32 %v2797_v0  ;;  %v2816_v42 = vmul.f32 %v4836_v22, %v6873_v56 }
 0xd53   :  { %4839 = vrcp.f32 %v3033_v63  ;;  %4480 = vmatmul.msk.f32.gmra.mxu1 %vm478_vm14, %v3056_v39  ;;  %v2642_v39 = vadd.f32 %v2641_v41, %v6765_v3 }
 0xd54   :  { %4458 = vmatmul.msk.f32.gmra.mxu3 %vm478_vm14, %v2816_v42 }
 0xd58   :  { %v4838_v61 = vpop.eup %4837 }
 0xd59   :  { %v4840_v35 = vpop.eup %4839  ;;  %v3036_v24 = vpop.xlane.xlu1 %3035  ;;  %v2817_v25 = vmul.f32 %v4838_v61, %v6884_v51  ;;  %v2013_v51 = vld [vmem:[#allocation2 + $0xf8] sm:$0xff] }
 0xd5a   :  { %v2800_v23 = vpop.xlane.xlu2 %2799  ;;  %v3057_v57 = vmul.f32 %v4840_v35, %v6887_v11  ;;  %3181 = vmatpush.msrb.mxu2 %v2013_v51 }
 0xd5b   :  { %4841 = vrcp.f32 %v2800_v23  ;;  %v2645_v23 = vadd.f32 %v2644_v54, %v6767_v48 }
 0xd5c   :  { %4843 = vrcp.f32 %v3036_v24  ;;  %4459 = vmatmul.msk.f32.gmra.mxu3 %vm478_vm14, %v2817_v25  ;;  %4481 = vmatmul.msk.f32.gmra.mxu1 %vm478_vm14, %v3057_v57 }
 0xd5d   :  { %3182 = vmatpush.msrb.mxu2 %v2012_v43 }
 0xd5f   :  { %3183 = vmatpush.msrb.mxu2 %v2011_v28 }
 0xd61   :  { %v4842_v56 = vpop.eup %4841  ;;  %v3039_v17 = vpop.xlane.xlu0 %3038  ;;  %3184 = vmatpush.msrb.mxu2 %v2010_v55 }
 0xd62   :  { %v4844_v58 = vpop.eup %4843  ;;  %v2818_v18 = vmul.f32 %v4842_v56, %v6893_v62  ;;  %4845 = vrcp.f32 %v3039_v17  ;;  %v2648_v56 = vadd.f32 %v2647_v34, %v6771_v44 }
 0xd63   :  { %v3058_v52 = vmul.f32 %v4844_v58, %v6896_v13 }
 0xd64   :  { %4460 = vmatmul.msk.f32.gmra.mxu3 %vm478_vm14, %v2818_v18 }
 0xd65   :  { %4482 = vmatmul.msk.f32.gmra.mxu1 %vm478_vm14, %v3058_v52 }
 0xd68   :  { %v4846_v11 = vpop.eup %4845 }
 0xd69   :  { %v3042_v49 = vpop.xlane.xlu2 %3041  ;;  %v3059_v15 = vmul.f32 %v4846_v11, %v6904_v6 }
 0xd6a   :  { %4847 = vrcp.f32 %v3042_v49  ;;  %v2803_v10 = vpop.xlane.xlu1 %2802 }
 0xd6b   :  { %4849 = vrcp.f32 %v2803_v10 }
 0xd6d   :  { %4483 = vmatmul.msk.f32.gmra.mxu1 %vm478_vm14, %v3059_v15 }
 0xd70   :  { %v4848_v62 = vpop.eup %4847 }
 0xd71   :  { %v4850_v8 = vpop.eup %4849  ;;  %v3045_v13 = vpop.xlane.xlu0 %3044  ;;  %v3060_v5 = vmul.f32 %v4848_v62, %v6909_v38 }
 0xd72   :  { %4851 = vrcp.f32 %v3045_v13  ;;  %v2819_v16 = vmul.f32 %v4850_v8, %v6911_v26  ;;  %v2650_v38 = vpop.f32.mrf.mxu1  ;;  %v2869_v26 = vpop.f32.mrf.mxu3 }
 0xd73   :  { %v2893_v1 = vadd.f32 %v2869_v26, %v2636_v21  ;;  %v2651_v52 = vadd.f32 %v2650_v38, %v6775_v32  ;;  %v4553_v32 = vld [vmem:[%s7401_s5 + $0xd] ss:$0 sm:$0xff] }
 0xd74   :  { %4461 = vmatmul.msk.f32.gmra.mxu3 %vm478_vm14, %v2819_v16 }
 0xd75   :  { %4484 = vmatmul.msk.f32.gmra.mxu1 %vm478_vm14, %v3060_v5 }
 0xd78   :  { %v4852_v6 = vpop.eup %4851 }
 0xd79   :  { %v3061_v33 = vmul.f32 %v4852_v6, %v6917_v29 }
 0xd7a   :  { %v2653_v7 = vpop.f32.mrf.mxu1  ;;  %v2872_v59 = vpop.f32.mrf.mxu3 }
 0xd7b   :  { %v2894_v2 = vadd.f32 %v2872_v59, %v2639_v47  ;;  %v2654_v49 = vadd.f32 %v2653_v7, %v6779_v4 }
 0xd7d   :  { %4485 = vmatmul.msk.f32.gmra.mxu1 %vm478_vm14, %v3061_v33 }
 0xd82   :  { %v2656_v20 = vpop.f32.mrf.mxu1  ;;  %v2875_v0 = vpop.f32.mrf.mxu3 }
 0xd83   :  { %v2895_v42 = vadd.f32 %v2875_v0, %v2642_v39  ;;  %v2657_v44 = vadd.f32 %v2656_v20, %v6783_v50 }
 0xd8a   :  { %v2878_v35 = vpop.f32.mrf.mxu3 }
 0xd8b   :  { %v2896_v24 = vadd.f32 %v2878_v35, %v2645_v23 }
 0xdc0   :  { %v3111_v12 = vpop.f32.mrf.mxu1 }
 0xdc1   :  { %v3135_v29 = vadd.f32 %v3111_v12, %v2893_v1 }
 0xdc3   :  { %4486 = vmatmul.msk.f32.vlgmr.msrb.gmra.mxu2 %vm229_vm2, %v3135_v29 }
 0xdc8   :  { %v3114_v22 = vpop.f32.mrf.mxu1 }
 0xdc9   :  { %v3136_v63 = vadd.f32 %v3114_v22, %v2894_v2 }
 0xdcb   :  { %4487 = vmatmul.msk.f32.gmra.mxu2 %vm229_vm2, %v3136_v63 }
 0xdd0   :  { %v3117_v61 = vpop.f32.mrf.mxu1 }
 0xdd1   :  { %v3137_v30 = vadd.f32 %v3117_v61, %v2895_v42 }
 0xdd3   :  { %4488 = vmatmul.msk.f32.gmra.mxu2 %vm229_vm2, %v3137_v30 }
 0xdd7   :  { %v2881_v25 = vpop.f32.mrf.mxu3 }
 0xdd8   :  { %v2897_v58 = vadd.f32 %v2881_v25, %v2648_v56 }
 0xdd9   :  { %v3120_v57 = vpop.f32.mrf.mxu1 }
 0xdda   :  { %v3138_v36 = vadd.f32 %v3120_v57, %v2896_v24 }
 0xddc   :  { %4489 = vmatmul.msk.f32.gmra.mxu2 %vm229_vm2, %v3138_v36 }
 0xddf   :  { %v2884_v3 = vpop.f32.mrf.mxu3 }
 0xde0   :  { %v2898_v51 = vadd.f32 %v2884_v3, %v2651_v52 }
 0xde2   :  { %v3123_v17 = vpop.f32.mrf.mxu1 }
 0xde3   :  { %v3139_v18 = vadd.f32 %v3123_v17, %v2897_v58 }
 0xde5   :  { %4490 = vmatmul.msk.f32.gmra.mxu2 %vm229_vm2, %v3139_v18 }
 0xde7   :  { %v2887_v48 = vpop.f32.mrf.mxu3 }
 0xde8   :  { %v2899_v15 = vadd.f32 %v2887_v48, %v2654_v49 }
 0xdea   :  { %v3126_v43 = vpop.f32.mrf.mxu1 }
 0xdeb   :  { %v3140_v11 = vadd.f32 %v3126_v43, %v2898_v51 }
 0xded   :  { %4491 = vmatmul.msk.f32.gmra.mxu2 %vm229_vm2, %v3140_v11 }
 0xdf2   :  { %v3129_v10 = vpop.f32.mrf.mxu1 }
 0xdf3   :  { %v3141_v62 = vadd.f32 %v3129_v10, %v2899_v15 }
 0xdf5   :  { %4492 = vmatmul.msk.f32.gmra.mxu2 %vm229_vm2, %v3141_v62 }
 0xdf7   :  { %v2890_v8 = vpop.f32.mrf.mxu3 }
 0xdf8   :  { %v2900_v13 = vadd.f32 %v2890_v8, %v2657_v44 }
 0xdfa   :  { %v3132_v5 = vpop.f32.mrf.mxu1 }
 0xdfb   :  { %v3142_v31 = vadd.f32 %v3132_v5, %v2900_v13 }
 0xdfd   :  { %4493 = vmatmul.msk.f32.gmra.mxu2 %vm229_vm2, %v3142_v31 }
 0xe46   :  { %v3186_v16 = vpop.f32.mrf.mxu2 }
 0xe47   :  { %v3187_v6 = vadd.f32 %v4553_v32, %v3186_v16 }
 0xe49   :  { %v3210_v4 = vadd.f32 %v3187_v6, %v6168_v45 }
 0xe4b   :  { %v3220_v33 = vsel %vm229_vm2, %v3210_v4, 0.0 }
 0xe4c   :  { %3221 = vadd.xlane.f32.xlu1 %v3220_v33 }
 0xe4e   :  { %v3189_v37 = vpop.f32.mrf.mxu2 }
 0xe4f   :  { %v3190_v41 = vadd.f32 %v4553_v32, %v3189_v37  ;;  %v4497_v37 = vld [vmem:[%s7399_s3 + $0x38] sm:$0xff] }
 0xe50   :  { %3457 = vmatpush.msrb.mxu3 %v4497_v37 }
 0xe51   :  { %v3211_v50 = vadd.f32 %v3190_v41, %v6180_v40  ;;  %v4496_v41 = vld [vmem:[%s7399_s3 + $0x30] sm:$0xff] }
 0xe52   :  { %3458 = vmatpush.msrb.mxu3 %v4496_v41 }
 0xe53   :  { %v3223_v54 = vsel %vm229_vm2, %v3211_v50, 0.0 }
 0xe54   :  { %3224 = vadd.xlane.f32.xlu2 %v3223_v54  ;;  %v4494_v54 = vld [vmem:[%s7399_s3 + $0x20] sm:$0xff] }
 0xe56   :  { %v3192_v34 = vpop.f32.mrf.mxu2 }
 0xe57   :  { %v3193_v28 = vadd.f32 %v4553_v32, %v3192_v34 }
 0xe59   :  { %v3212_v55 = vadd.f32 %v3193_v28, %v6192_v19 }
 0xe5b   :  { %v3226_v38 = vsel %vm229_vm2, %v3212_v55, 0.0 }
 0xe5c   :  { %3227 = vadd.xlane.f32.xlu0 %v3226_v38 }
 0xe5f   :  { %v3195_v7 = vpop.f32.mrf.mxu2 }
 0xe60   :  { %v3196_v26 = vadd.f32 %v4553_v32, %v3195_v7 }
 0xe62   :  { %v3213_v45 = vadd.f32 %v3196_v26, %v6204_v9 }
 0xe64   :  { %v3229_v20 = vsel %vm229_vm2, %v3213_v45, 0.0 }
 0xe65   :  { %3230 = vadd.xlane.f32.xlu1 %v3229_v20 }
 0xe68   :  { %v3198_v21 = vpop.f32.mrf.mxu2 }
 0xe69   :  { %v3199_v1 = vadd.f32 %v4553_v32, %v3198_v21 }
 0xe6b   :  { %v3214_v40 = vadd.f32 %v3199_v1, %v6215_v46 }
 0xe6d   :  { %v3232_v59 = vsel %vm229_vm2, %v3214_v40, 0.0 }
 0xe6e   :  { %3233 = vadd.xlane.f32.xlu2 %v3232_v59 }
 0xe70   :  { %v3201_v12 = vpop.f32.mrf.mxu2 }
 0xe71   :  { %v3202_v29 = vadd.f32 %v4553_v32, %v3201_v12 }
 0xe73   :  { %v3215_v19 = vadd.f32 %v3202_v29, %v6226_v27 }
 0xe75   :  { %v3235_v47 = vsel %vm229_vm2, %v3215_v19, 0.0 }
 0xe76   :  { %3236 = vadd.xlane.f32.xlu0 %v3235_v47 }
 0xe78   :  { %v3204_v2 = vpop.f32.mrf.mxu2 }
 0xe79   :  { %v3205_v22 = vadd.f32 %v4553_v32, %v3204_v2 }
 0xe7b   :  { %v3216_v9 = vadd.f32 %v3205_v22, %v6237_v60 }
 0xe7d   :  { %v3238_v0 = vsel %vm229_vm2, %v3216_v9, 0.0 }
 0xe7e   :  { %3239 = vadd.xlane.f32.xlu2 %v3238_v0 }
 0xe80   :  { %v3207_v42 = vpop.f32.mrf.mxu2 }
 0xe81   :  { %v3208_v27 = vadd.f32 %v4553_v32, %v3207_v42  ;;  %v7048_v42 = vld [vmem:[%s7401_s5 + $0x10] ss:$0 sm:$0xff] }
 0xe83   :  { %v3217_v60 = vadd.f32 %v3208_v27, %v6249_v53 }
 0xe85   :  { %v3241_v36 = vsel %vm229_vm2, %v3217_v60, 0.0 }
 0xebf   :  { %v3222_v63 = vpop.xlane.xlu1 %3221 }
 0xec0   :  { %v3244_v46 = vmul.f32 %v3222_v63, %v5907_v14 }
 0xec2   :  { %v6981_v39 = vsub.f32 %v3210_v4, %v3244_v46 }
 0xec4   :  { %v3260_v61 = vmul.f32 %v6981_v39, %v6981_v39 }
 0xec6   :  { %v3268_v35 = vsel %vm229_vm2, %v3260_v61, 0.0 }
 0xec7   :  { %v3225_v30 = vpop.xlane.xlu2 %3224  ;;  %3269 = vadd.xlane.f32.xlu1 %v3268_v35  ;;  %v7053_v35 = vld [vmem:[%s7401_s5 + $0x11] ss:$0 sm:$0xff] }
 0xec8   :  { %v3245_v23 = vmul.f32 %v3225_v30, %v5907_v14 }
 0xeca   :  { %v6988_v24 = vsub.f32 %v3211_v50, %v3245_v23  ;;  %v4495_v50 = vld [vmem:[%s7399_s3 + $0x28] sm:$0xff] }
 0xecb   :  { %3459 = vmatpush.msrb.mxu3 %v4495_v50 }
 0xecc   :  { %v3261_v25 = vmul.f32 %v6988_v24, %v6988_v24 }
 0xecd   :  { %3460 = vmatpush.msrb.mxu3 %v4494_v54 }
 0xece   :  { %v3271_v57 = vsel %vm229_vm2, %v3261_v25, 0.0 }
 0xecf   :  { %v3228_v56 = vpop.xlane.xlu0 %3227  ;;  %3272 = vadd.xlane.f32.xlu0 %v3271_v57  ;;  %3242 = vadd.xlane.f32.xlu1 %v3241_v36 }
 0xed0   :  { %v3246_v58 = vmul.f32 %v3228_v56, %v5907_v14 }
 0xed2   :  { %v6995_v17 = vsub.f32 %v3212_v55, %v3246_v58 }
 0xed4   :  { %v3262_v18 = vmul.f32 %v6995_v17, %v6995_v17 }
 0xed6   :  { %v3274_v53 = vsel %vm229_vm2, %v3262_v18, 0.0 }
 0xed7   :  { %3275 = vadd.xlane.f32.xlu2 %v3274_v53 }
 0xed8   :  { %v3231_v3 = vpop.xlane.xlu1 %3230 }
 0xed9   :  { %v3247_v52 = vmul.f32 %v3231_v3, %v5907_v14 }
 0xedb   :  { %v7001_v51 = vsub.f32 %v3213_v45, %v3247_v52 }
 0xedd   :  { %v3263_v43 = vmul.f32 %v7001_v51, %v7001_v51 }
 0xedf   :  { %v3277_v11 = vsel %vm229_vm2, %v3263_v43, 0.0 }
 0xee0   :  { %3278 = vadd.xlane.f32.xlu0 %v3277_v11 }
 0xee1   :  { %v3234_v48 = vpop.xlane.xlu2 %3233 }
 0xee2   :  { %v3248_v49 = vmul.f32 %v3234_v48, %v5907_v14 }
 0xee4   :  { %v7007_v15 = vsub.f32 %v3214_v40, %v3248_v49 }
 0xee6   :  { %v3264_v10 = vmul.f32 %v7007_v15, %v7007_v15 }
 0xee8   :  { %v3280_v62 = vsel %vm229_vm2, %v3264_v10, 0.0 }
 0xee9   :  { %v3237_v44 = vpop.xlane.xlu0 %3236  ;;  %3281 = vadd.xlane.f32.xlu1 %v3280_v62 }
 0xeea   :  { %v3249_v8 = vmul.f32 %v3237_v44, %v5907_v14 }
 0xeec   :  { %v7013_v13 = vsub.f32 %v3215_v19, %v3249_v8 }
 0xeee   :  { %v3265_v5 = vmul.f32 %v7013_v13, %v7013_v13 }
 0xef0   :  { %v3283_v31 = vsel %vm229_vm2, %v3265_v5, 0.0 }
 0xef1   :  { %3284 = vadd.xlane.f32.xlu2 %v3283_v31  ;;  %v3240_v32 = vpop.xlane.xlu2 %3239 }
 0xef2   :  { %v3250_v16 = vmul.f32 %v3240_v32, %v5907_v14 }
 0xef4   :  { %v7019_v6 = vsub.f32 %v3216_v9, %v3250_v16 }
 0xef6   :  { %v3266_v4 = vmul.f32 %v7019_v6, %v7019_v6 }
 0xef8   :  { %v3286_v33 = vsel %vm229_vm2, %v3266_v4, 0.0 }
 0xef9   :  { %3287 = vadd.xlane.f32.xlu0 %v3286_v33 }
 0xf3a   :  { %v3270_v34 = vpop.xlane.xlu1 %3269 }
 0xf3b   :  { %v3292_v28 = vmul.f32 %v3270_v34, %v5907_v14 }
 0xf3d   :  { %v3300_v55 = vadd.f32 1e-05, %v3292_v28 }
 0xf3f   :  { %4853 = vrsqrt.f32 %v3300_v55  ;;  %vm3314_vm0 = vweird.f32 %v3300_v55 }
 0xf42   :  { %v3273_v38 = vpop.xlane.xlu0 %3272  ;;  %v3243_v7 = vpop.xlane.xlu1 %3242 }
 0xf43   :  { %v3293_v26 = vmul.f32 %v3273_v38, %v5907_v14  ;;  %v3251_v45 = vmul.f32 %v3243_v7, %v5907_v14 }
 0xf45   :  { %v4854_v20 = vpop.eup %4853  ;;  %v3301_v21 = vadd.f32 1e-05, %v3293_v26  ;;  %v7039_v1 = vsub.f32 %v3217_v60, %v3251_v45 }
 0xf46   :  { %v3309_v40 = vmul.f32 %v4854_v20, %v3300_v55  ;;  %vm3315_vm15 = vweird.f32 %v4854_v20 }
 0xf47   :  { %4855 = vrsqrt.f32 %v3301_v21  ;;  %v3267_v59 = vmul.f32 %v7039_v1, %v7039_v1  ;;  %vm3316_vm1 = vmor %vm3314_vm0, %vm3315_vm15  ;;  %vm3324_vm4 = vweird.f32 %v3301_v21 }
 0xf48   :  { %v3310_v12 = vmul.f32 %v4854_v20, %v3309_v40 }
 0xf49   :  { %v3289_v29 = vsel %vm229_vm2, %v3267_v59, 0.0 }
 0xf4a   :  { %v3311_v19 = vmul.f32 0.5, %v3310_v12  ;;  %v3276_v47 = vpop.xlane.xlu2 %3275  ;;  %3290 = vadd.xlane.f32.xlu1 %v3289_v29 }
 0xf4b   :  { %v3294_v2 = vmul.f32 %v3276_v47, %v5907_v14 }
 0xf4c   :  { %v3312_v22 = vsub.f32 1.5, %v3311_v19 }
 0xf4d   :  { %v4856_v9 = vpop.eup %4855  ;;  %v3302_v0 = vadd.f32 1e-05, %v3294_v2 }
 0xf4e   :  { %v3313_v63 = vmul.f32 %v4854_v20, %v3312_v22  ;;  %v3319_v46 = vmul.f32 %v4856_v9, %v3301_v21  ;;  %vm3325_vm3 = vweird.f32 %v4856_v9 }
 0xf4f   :  { %4857 = vrsqrt.f32 %v3302_v0  ;;  %vm3326_vm5 = vmor %vm3324_vm4, %vm3325_vm3  ;;  %vm3334_vm7 = vweird.f32 %v3302_v0 }
 0xf50   :  { %v3317_v61 = vsel %vm3316_vm1, %v4854_v20, %v3313_v63  ;;  %v3320_v27 = vmul.f32 %v4856_v9, %v3319_v46 }
 0xf51   :  { %v3388_v30 = vmul.f32 %v3317_v61, %v6981_v39 }
 0xf52   :  { %v3321_v23 = vmul.f32 0.5, %v3320_v27 }
 0xf53   :  { %v3397_v60 = vmul.f32 %v7048_v42, %v3388_v30  ;;  %v3279_v25 = vpop.xlane.xlu0 %3278 }
 0xf54   :  { %v3322_v57 = vsub.f32 1.5, %v3321_v23  ;;  %v3295_v36 = vmul.f32 %v3279_v25, %v5907_v14 }
 0xf55   :  { %v4858_v56 = vpop.eup %4857  ;;  %v7059_v58 = vadd.f32 %v7053_v35, %v3397_v60 }
 0xf56   :  { %v3323_v18 = vmul.f32 %v4856_v9, %v3322_v57  ;;  %v3329_v53 = vmul.f32 %v4858_v56, %v3302_v0  ;;  %v3303_v3 = vadd.f32 1e-05, %v3295_v36  ;;  %vm3335_vm6 = vweird.f32 %v4858_v56 }
 0xf57   :  { %4498 = vmatmul.msk.f32.vlgmr.msrb.gmra.mxu3 %vm229_vm2, %v7059_v58  ;;  %vm3336_vm8 = vmor %vm3334_vm7, %vm3335_vm6 }
 0xf58   :  { %v3327_v39 = vsel %vm3326_vm5, %v4856_v9, %v3323_v18  ;;  %v3330_v52 = vmul.f32 %v4858_v56, %v3329_v53  ;;  %4859 = vrsqrt.f32 %v3303_v3  ;;  %vm3344_vm10 = vweird.f32 %v3303_v3 }
 0xf59   :  { %v3389_v43 = vmul.f32 %v3327_v39, %v6988_v24 }
 0xf5a   :  { %v3331_v11 = vmul.f32 0.5, %v3330_v52 }
 0xf5b   :  { %v3398_v49 = vmul.f32 %v7048_v42, %v3389_v43 }
 0xf5c   :  { %v3282_v48 = vpop.xlane.xlu1 %3281  ;;  %v3332_v10 = vsub.f32 1.5, %v3331_v11  ;;  %v4513_v11 = vld [vmem:[%s7400_s4 + $0x78] sm:$0xff] }
 0xf5d   :  { %v3296_v62 = vmul.f32 %v3282_v48, %v5907_v14  ;;  %v7067_v44 = vadd.f32 %v7053_v35, %v3398_v49  ;;  %3537 = vmatpush.msrb.mxu0 %v4513_v11  ;;  %v4512_v48 = vld [vmem:[%s7400_s4 + $0x70] sm:$0xff]  ;;  %v4510_v49 = vld [vmem:[%s7400_s4 + $0x60] sm:$0xff] }
 0xf5e   :  { %v4860_v8 = vpop.eup %4859  ;;  %v3333_v5 = vmul.f32 %v4858_v56, %v3332_v10  ;;  %v4509_v10 = vld [vmem:[%s7400_s4 + $0x58] sm:$0xff] }
 0xf5f   :  { %v3304_v31 = vadd.f32 1e-05, %v3296_v62  ;;  %v3339_v32 = vmul.f32 %v4860_v8, %v3303_v3  ;;  %4499 = vmatmul.msk.f32.gmra.mxu3 %vm229_vm2, %v7067_v44  ;;  %vm3345_vm9 = vweird.f32 %v4860_v8  ;;  %3538 = vmatpush.msrb.mxu0 %v4512_v48  ;;  %v4508_v62 = vld [vmem:[%s7400_s4 + $0x50] sm:$0xff] }
 0xf60   :  { %v3337_v24 = vsel %vm3336_vm8, %v4858_v56, %v3333_v5  ;;  %vm3346_vm11 = vmor %vm3344_vm10, %vm3345_vm9  ;;  %v4507_v5 = vld [vmem:[%s7400_s4 + $0x48] sm:$0xff] }
 0xf61   :  { %4861 = vrsqrt.f32 %v3304_v31  ;;  %v3390_v16 = vmul.f32 %v3337_v24, %v6995_v17  ;;  %v3340_v4 = vmul.f32 %v4860_v8, %v3339_v32  ;;  %vm3354_vm13 = vweird.f32 %v3304_v31 }
 0xf63   :  { %v3341_v33 = vmul.f32 0.5, %v3340_v4  ;;  %v3399_v41 = vmul.f32 %v7048_v42, %v3390_v16 }
 0xf64   :  { %v3285_v37 = vpop.xlane.xlu2 %3284 }
 0xf65   :  { %v3297_v50 = vmul.f32 %v3285_v37, %v5907_v14  ;;  %v3342_v54 = vsub.f32 1.5, %v3341_v33  ;;  %v7075_v34 = vadd.f32 %v7053_v35, %v3399_v41 }
 0xf67   :  { %v4862_v28 = vpop.eup %4861  ;;  %v3305_v55 = vadd.f32 1e-05, %v3297_v50  ;;  %v3343_v38 = vmul.f32 %v4860_v8, %v3342_v54  ;;  %4500 = vmatmul.msk.f32.gmra.mxu3 %vm229_vm2, %v7075_v34 }
 0xf68   :  { %v3349_v7 = vmul.f32 %v4862_v28, %v3304_v31  ;;  %vm3355_vm12 = vweird.f32 %v4862_v28  ;;  %v4506_v31 = vld [vmem:[%s7400_s4 + $0x40] sm:$0xff] }
 0xf69   :  { %4863 = vrsqrt.f32 %v3305_v55  ;;  %v3347_v17 = vsel %vm3346_vm11, %v4860_v8, %v3343_v38  ;;  %vm3356_vm15 = vmor %vm3354_vm13, %vm3355_vm12  ;;  %vm3364_vm1 = vweird.f32 %v3305_v55  ;;  %v4556_v38 = vld [vmem:[%s7401_s5 + $0xe] ss:$0 sm:$0xff] }
 0xf6a   :  { %v3350_v26 = vmul.f32 %v4862_v28, %v3349_v7  ;;  %v3391_v45 = vmul.f32 %v3347_v17, %v7001_v51 }
 0xf6c   :  { %v3351_v20 = vmul.f32 0.5, %v3350_v26  ;;  %v3288_v21 = vpop.xlane.xlu0 %3287  ;;  %v3400_v59 = vmul.f32 %v7048_v42, %v3391_v45 }
 0xf6d   :  { %v3298_v40 = vmul.f32 %v3288_v21, %v5907_v14 }
 0xf6e   :  { %v3352_v12 = vsub.f32 1.5, %v3351_v20  ;;  %v7083_v47 = vadd.f32 %v7053_v35, %v3400_v59 }
 0xf6f   :  { %v4864_v29 = vpop.eup %4863  ;;  %v3306_v19 = vadd.f32 1e-05, %v3298_v40 }
 0xf70   :  { %v3353_v2 = vmul.f32 %v4862_v28, %v3352_v12  ;;  %v3359_v22 = vmul.f32 %v4864_v29, %v3305_v55  ;;  %4501 = vmatmul.msk.f32.gmra.mxu3 %vm229_vm2, %v7083_v47  ;;  %vm3365_vm0 = vweird.f32 %v4864_v29 }
 0xf71   :  { %4865 = vrsqrt.f32 %v3306_v19  ;;  %vm3366_vm3 = vmor %vm3364_vm1, %vm3365_vm0  ;;  %vm3374_vm5 = vweird.f32 %v3306_v19 }
 0xf72   :  { %v3357_v51 = vsel %vm3356_vm15, %v4862_v28, %v3353_v2  ;;  %v3360_v9 = vmul.f32 %v4864_v29, %v3359_v22 }
 0xf73   :  { %v3392_v0 = vmul.f32 %v3357_v51, %v7007_v15 }
 0xf74   :  { %v3361_v63 = vmul.f32 0.5, %v3360_v9 }
 0xf75   :  { %v3401_v46 = vmul.f32 %v7048_v42, %v3392_v0 }
 0xf76   :  { %v3362_v61 = vsub.f32 1.5, %v3361_v63 }
 0xf77   :  { %v4866_v27 = vpop.eup %4865  ;;  %v7090_v30 = vadd.f32 %v7053_v35, %v3401_v46 }
 0xf78   :  { %v3363_v23 = vmul.f32 %v4864_v29, %v3362_v61  ;;  %v3369_v60 = vmul.f32 %v4866_v27, %v3306_v19  ;;  %vm3375_vm4 = vweird.f32 %v4866_v27 }
 0xf79   :  { %4502 = vmatmul.msk.f32.gmra.mxu3 %vm229_vm2, %v7090_v30  ;;  %vm3376_vm6 = vmor %vm3374_vm5, %vm3375_vm4 }
 0xf7a   :  { %v3367_v25 = vsel %vm3366_vm3, %v4864_v29, %v3363_v23  ;;  %v3370_v57 = vmul.f32 %v4866_v27, %v3369_v60 }
 0xf7b   :  { %v3393_v15 = vmul.f32 %v3367_v25, %v7013_v13 }
 0xf7c   :  { %v3371_v36 = vmul.f32 0.5, %v3370_v57 }
 0xf7d   :  { %v3402_v56 = vmul.f32 %v7048_v42, %v3393_v15 }
 0xf7e   :  { %v3372_v18 = vsub.f32 1.5, %v3371_v36 }
 0xf7f   :  { %v7097_v53 = vadd.f32 %v7053_v35, %v3402_v56 }
 0xf80   :  { %v3373_v3 = vmul.f32 %v4866_v27, %v3372_v18 }
 0xf81   :  { %4503 = vmatmul.msk.f32.gmra.mxu3 %vm229_vm2, %v7097_v53 }
 0xf82   :  { %v3377_v39 = vsel %vm3376_vm6, %v4866_v27, %v3373_v3  ;;  %v4557_v27 = vld [vmem:[%s7401_s5 + $0xf] ss:$0 sm:$0xff] }
 0xf83   :  { %v3394_v52 = vmul.f32 %v3377_v39, %v7019_v6  ;;  %v4511_v6 = vld [vmem:[%s7400_s4 + $0x68] sm:$0xff] }
 0xf84   :  { %3539 = vmatpush.msrb.mxu0 %v4511_v6 }
 0xf85   :  { %v3403_v43 = vmul.f32 %v7048_v42, %v3394_v52 }
 0xf86   :  { %3540 = vmatpush.msrb.mxu0 %v4510_v49 }
 0xf87   :  { %v7104_v13 = vadd.f32 %v7053_v35, %v3403_v43 }
 0xf88   :  { %3541 = vmatpush.msrb.mxu0 %v4509_v10 }
 0xf89   :  { %4504 = vmatmul.msk.f32.gmra.mxu3 %vm229_vm2, %v7104_v13 }
 0xf8a   :  { %3542 = vmatpush.msrb.mxu0 %v4508_v62 }
 0xf8c   :  { %3543 = vmatpush.msrb.mxu0 %v4507_v5 }
 0xf8e   :  { %3544 = vmatpush.msrb.mxu0 %v4506_v31 }
 0xfbd   :  { %v3291_v8 = vpop.xlane.xlu1 %3290 }
 0xfbe   :  { %v3299_v32 = vmul.f32 %v3291_v8, %v5907_v14 }
 0xfc0   :  { %v3307_v24 = vadd.f32 1e-05, %v3299_v32 }
 0xfc2   :  { %4867 = vrsqrt.f32 %v3307_v24  ;;  %vm3384_vm8 = vweird.f32 %v3307_v24 }
 0xfc8   :  { %v4868_v16 = vpop.eup %4867 }
 0xfc9   :  { %v3379_v4 = vmul.f32 %v4868_v16, %v3307_v24  ;;  %vm3385_vm7 = vweird.f32 %v4868_v16 }
 0xfca   :  { %vm3386_vm9 = vmor %vm3384_vm8, %vm3385_vm7 }
 0xfcb   :  { %v3380_v33 = vmul.f32 %v4868_v16, %v3379_v4 }
 0xfcd   :  { %v3381_v37 = vmul.f32 0.5, %v3380_v33 }
 0xfcf   :  { %v3382_v41 = vsub.f32 1.5, %v3381_v37 }
 0xfd1   :  { %v3383_v50 = vmul.f32 %v4868_v16, %v3382_v41 }
 0xfd3   :  { %v3387_v54 = vsel %vm3386_vm9, %v4868_v16, %v3383_v50 }
 0xfd4   :  { %v3395_v28 = vmul.f32 %v3387_v54, %v7039_v1 }
 0xfd6   :  { %v3404_v55 = vmul.f32 %v7048_v42, %v3395_v28 }
 0xfd8   :  { %v7139_v7 = vadd.f32 %v7053_v35, %v3404_v55 }
 0xfda   :  { %v3462_v17 = vpop.f32.mrf.mxu3  ;;  %4505 = vmatmul.msk.f32.gmra.mxu3 %vm229_vm2, %v7139_v7 }
 0xfdb   :  { %v3463_v26 = vadd.f32 %v4556_v38, %v3462_v17 }
 0xfdd   :  { %v3486_v45 = vmax.f32 %v3463_v26, 0.0 }
 0xfdf   :  { %4514 = vmatmul.msk.f32.vlgmr.msrb.gmra.mxu0 %vm478_vm14, %v3486_v45 }
 0xfe2   :  { %v3465_v20 = vpop.f32.mrf.mxu3 }
 0xfe3   :  { %v3466_v21 = vadd.f32 %v4556_v38, %v3465_v20 }
 0xfe5   :  { %v3487_v1 = vmax.f32 %v3466_v21, 0.0 }
 0xfe7   :  { %4515 = vmatmul.msk.f32.gmra.mxu0 %vm478_vm14, %v3487_v1 }
 0xfea   :  { %v3468_v42 = vpop.f32.mrf.mxu3 }
 0xfeb   :  { %v3469_v40 = vadd.f32 %v4556_v38, %v3468_v42 }
 0xfed   :  { %v3488_v59 = vmax.f32 %v3469_v40, 0.0 }
 0xfef   :  { %4516 = vmatmul.msk.f32.gmra.mxu0 %vm478_vm14, %v3488_v59 }
 0xff3   :  { %v3471_v35 = vpop.f32.mrf.mxu3 }
 0xff4   :  { %v3472_v12 = vadd.f32 %v4556_v38, %v3471_v35 }
 0xff6   :  { %v3489_v29 = vmax.f32 %v3472_v12, 0.0 }
 0xff8   :  { %4517 = vmatmul.msk.f32.gmra.mxu0 %vm478_vm14, %v3489_v29 }
 0xffc   :  { %v3474_v19 = vpop.f32.mrf.mxu3 }
 0xffd   :  { %v3475_v2 = vadd.f32 %v4556_v38, %v3474_v19 }
 0xfff   :  { %v3490_v22 = vmax.f32 %v3475_v2, 0.0 }
0x1001   :  { %4518 = vmatmul.msk.f32.gmra.mxu0 %vm478_vm14, %v3490_v22 }
0x1004   :  { %v3477_v51 = vpop.f32.mrf.mxu3 }
0x1005   :  { %v3478_v9 = vadd.f32 %v4556_v38, %v3477_v51 }
0x1007   :  { %v3491_v0 = vmax.f32 %v3478_v9, 0.0 }
0x1009   :  { %4519 = vmatmul.msk.f32.gmra.mxu0 %vm478_vm14, %v3491_v0 }
0x100c   :  { %v3480_v63 = vpop.f32.mrf.mxu3 }
0x100d   :  { %v3481_v46 = vadd.f32 %v4556_v38, %v3480_v63 }
0x100f   :  { %v3492_v61 = vmax.f32 %v3481_v46, 0.0 }
0x1011   :  { %4520 = vmatmul.msk.f32.gmra.mxu0 %vm478_vm14, %v3492_v61 }
0x105c   :  { %v3546_v23 = vpop.f32.mrf.mxu0 }
0x105d   :  { %v3547_v60 = vadd.f32 %v4557_v27, %v3546_v23  ;;  %v3483_v25 = vpop.f32.mrf.mxu3 }
0x105e   :  { %v3484_v57 = vadd.f32 %v4556_v38, %v3483_v25 }
0x105f   :  { %v3570_v15 = vadd.f32 %v3547_v60, %v7059_v58 }
0x1060   :  { %v3493_v36 = vmax.f32 %v3484_v57, 0.0 }
0x1061   :  { %v3580_v56 = vsel %vm229_vm2, %v3570_v15, 0.0 }
0x1062   :  { %3581 = vadd.xlane.f32.xlu2 %v3580_v56  ;;  %4521 = vmatmul.msk.f32.gmra.mxu0 %vm478_vm14, %v3493_v36 }
0x1064   :  { %v3549_v18 = vpop.f32.mrf.mxu0 }
0x1065   :  { %v3550_v3 = vadd.f32 %v4557_v27, %v3549_v18 }
0x1067   :  { %v3571_v39 = vadd.f32 %v3550_v3, %v7067_v44 }
0x1069   :  { %v3583_v52 = vsel %vm229_vm2, %v3571_v39, 0.0 }
0x106a   :  { %3584 = vadd.xlane.f32.xlu0 %v3583_v52 }
0x106c   :  { %v3552_v43 = vpop.f32.mrf.mxu0 }
0x106d   :  { %v3553_v11 = vadd.f32 %v4557_v27, %v3552_v43 }
0x106f   :  { %v3572_v48 = vadd.f32 %v3553_v11, %v7075_v34 }
0x1071   :  { %v3586_v6 = vsel %vm229_vm2, %v3572_v48, 0.0 }
0x1072   :  { %3587 = vadd.xlane.f32.xlu1 %v3586_v6 }
0x1075   :  { %v3555_v58 = vpop.f32.mrf.mxu0 }
0x1076   :  { %v3556_v49 = vadd.f32 %v4557_v27, %v3555_v58 }
0x1078   :  { %v3573_v10 = vadd.f32 %v3556_v49, %v7083_v47 }
0x107a   :  { %v3589_v62 = vsel %vm229_vm2, %v3573_v10, 0.0 }
0x107b   :  { %3590 = vadd.xlane.f32.xlu0 %v3589_v62 }
0x107e   :  { %v3558_v8 = vpop.f32.mrf.mxu0 }
0x107f   :  { %v3559_v5 = vadd.f32 %v4557_v27, %v3558_v8 }
0x1081   :  { %v3574_v44 = vadd.f32 %v3559_v5, %v7090_v30 }
0x1083   :  { %v3592_v31 = vsel %vm229_vm2, %v3574_v44, 0.0 }
0x1084   :  { %3593 = vadd.xlane.f32.xlu2 %v3592_v31 }
0x1086   :  { %v3561_v32 = vpop.f32.mrf.mxu0 }
0x1087   :  { %v3562_v24 = vadd.f32 %v4557_v27, %v3561_v32 }
0x1089   :  { %v3575_v34 = vadd.f32 %v3562_v24, %v7097_v53 }
0x108b   :  { %v3595_v16 = vsel %vm229_vm2, %v3575_v34, 0.0 }
0x108c   :  { %3596 = vadd.xlane.f32.xlu1 %v3595_v16 }
0x108e   :  { %v3564_v4 = vpop.f32.mrf.mxu0 }
0x108f   :  { %v3565_v33 = vadd.f32 %v4557_v27, %v3564_v4  ;;  %v7224_v4 = vld [vmem:[%s7401_s5 + $0x12] ss:$0 sm:$0xff] }
0x1091   :  { %v3576_v47 = vadd.f32 %v3565_v33, %v7104_v13 }
0x1093   :  { %v3598_v37 = vsel %vm229_vm2, %v3576_v47, 0.0 }
0x1094   :  { %3599 = vadd.xlane.f32.xlu0 %v3598_v37  ;;  %v7230_v37 = vld [vmem:[%s7401_s5 + $0x13] ss:$0 sm:$0xff] }
0x10d5   :  { %v3582_v41 = vpop.xlane.xlu2 %3581 }
0x10d6   :  { %v3604_v30 = vmul.f32 %v3582_v41, %v5907_v14 }
0x10d8   :  { %v7169_v50 = vsub.f32 %v3570_v15, %v3604_v30 }
0x10da   :  { %v3620_v54 = vmul.f32 %v7169_v50, %v7169_v50 }
0x10dc   :  { %v3628_v53 = vsel %vm229_vm2, %v3620_v54, 0.0 }
0x10dd   :  { %v3585_v28 = vpop.xlane.xlu0 %3584  ;;  %3629 = vadd.xlane.f32.xlu1 %v3628_v53 }
0x10de   :  { %v3605_v38 = vmul.f32 %v3585_v28, %v5907_v14 }
0x10df   :  { %v3567_v55 = vpop.f32.mrf.mxu0 }
0x10e0   :  { %v3568_v17 = vadd.f32 %v4557_v27, %v3567_v55  ;;  %v7176_v26 = vsub.f32 %v3571_v39, %v3605_v38 }
0x10e2   :  { %v3577_v13 = vadd.f32 %v3568_v17, %v7139_v7  ;;  %v3621_v42 = vmul.f32 %v7176_v26, %v7176_v26 }
0x10e4   :  { %v3601_v45 = vsel %vm229_vm2, %v3577_v13, 0.0  ;;  %v3631_v59 = vsel %vm229_vm2, %v3621_v42, 0.0 }
0x10e5   :  { %3602 = vadd.xlane.f32.xlu2 %v3601_v45  ;;  %v3588_v20 = vpop.xlane.xlu1 %3587 }
0x10e6   :  { %v3606_v21 = vmul.f32 %v3588_v20, %v5907_v14 }
0x10e8   :  { %v7180_v1 = vsub.f32 %v3572_v48, %v3606_v21 }
0x10ea   :  { %v3622_v40 = vmul.f32 %v7180_v1, %v7180_v1 }
0x10ec   :  { %v3634_v7 = vsel %vm229_vm2, %v3622_v40, 0.0 }
0x10ed   :  { %3632 = vadd.xlane.f32.xlu2 %v3631_v59  ;;  %3635 = vadd.xlane.f32.xlu0 %v3634_v7 }
0x10ee   :  { %v3591_v35 = vpop.xlane.xlu0 %3590 }
0x10ef   :  { %v3607_v12 = vmul.f32 %v3591_v35, %v5907_v14 }
0x10f1   :  { %v7189_v29 = vsub.f32 %v3573_v10, %v3607_v12 }
0x10f3   :  { %v3623_v19 = vmul.f32 %v7189_v29, %v7189_v29 }
0x10f5   :  { %v3637_v2 = vsel %vm229_vm2, %v3623_v19, 0.0 }
0x10f6   :  { %3638 = vadd.xlane.f32.xlu2 %v3637_v2 }
0x10f7   :  { %v3594_v22 = vpop.xlane.xlu2 %3593 }
0x10f8   :  { %v3608_v51 = vmul.f32 %v3594_v22, %v5907_v14 }
0x10fa   :  { %v7195_v9 = vsub.f32 %v3574_v44, %v3608_v51 }
0x10fc   :  { %v3624_v0 = vmul.f32 %v7195_v9, %v7195_v9 }
0x10fe   :  { %v3640_v63 = vsel %vm229_vm2, %v3624_v0, 0.0 }
0x10ff   :  { %3641 = vadd.xlane.f32.xlu1 %v3640_v63  ;;  %v3597_v46 = vpop.xlane.xlu1 %3596 }
0x1100   :  { %v3609_v61 = vmul.f32 %v3597_v46, %v5907_v14 }
0x1102   :  { %v7201_v27 = vsub.f32 %v3575_v34, %v3609_v61 }
0x1104   :  { %v3625_v23 = vmul.f32 %v7201_v27, %v7201_v27 }
0x1106   :  { %v3643_v60 = vsel %vm229_vm2, %v3625_v23, 0.0 }
0x1107   :  { %v3600_v25 = vpop.xlane.xlu0 %3599  ;;  %3644 = vadd.xlane.f32.xlu0 %v3643_v60 }
0x1108   :  { %v3610_v57 = vmul.f32 %v3600_v25, %v5907_v14 }
0x110a   :  { %v7207_v15 = vsub.f32 %v3576_v47, %v3610_v57 }
0x110c   :  { %v3626_v36 = vmul.f32 %v7207_v15, %v7207_v15 }
0x110e   :  { %v3646_v56 = vsel %vm229_vm2, %v3626_v36, 0.0 }
0x110f   :  { %3647 = vadd.xlane.f32.xlu2 %v3646_v56 }
0x1150   :  { %v3630_v18 = vpop.xlane.xlu1 %3629 }
0x1151   :  { %v3652_v3 = vmul.f32 %v3630_v18, %v5907_v14 }
0x1153   :  { %v3660_v39 = vadd.f32 1e-05, %v3652_v3 }
0x1155   :  { %4869 = vrsqrt.f32 %v3660_v39  ;;  %vm3674_vm10 = vweird.f32 %v3660_v39 }
0x1158   :  { %v3603_v52 = vpop.xlane.xlu2 %3602 }
0x1159   :  { %v3611_v43 = vmul.f32 %v3603_v52, %v5907_v14 }
0x115b   :  { %v4870_v11 = vpop.eup %4869  ;;  %v7214_v48 = vsub.f32 %v3577_v13, %v3611_v43 }
0x115c   :  { %v3669_v6 = vmul.f32 %v4870_v11, %v3660_v39  ;;  %vm3675_vm14 = vweird.f32 %v4870_v11 }
0x115d   :  { %v3627_v58 = vmul.f32 %v7214_v48, %v7214_v48  ;;  %vm3676_vm11 = vmor %vm3674_vm10, %vm3675_vm14 }
0x115e   :  { %v3670_v49 = vmul.f32 %v4870_v11, %v3669_v6 }
0x115f   :  { %v3649_v10 = vsel %vm229_vm2, %v3627_v58, 0.0 }
0x1160   :  { %v3671_v62 = vmul.f32 0.5, %v3670_v49  ;;  %3650 = vadd.xlane.f32.xlu1 %v3649_v10  ;;  %v3633_v8 = vpop.xlane.xlu2 %3632  ;;  %v3636_v5 = vpop.xlane.xlu0 %3635 }
0x1161   :  { %v3653_v44 = vmul.f32 %v3633_v8, %v5907_v14  ;;  %v3654_v31 = vmul.f32 %v3636_v5, %v5907_v14 }
0x1162   :  { %v3672_v32 = vsub.f32 1.5, %v3671_v62 }
0x1163   :  { %v3661_v24 = vadd.f32 1e-05, %v3653_v44  ;;  %v3662_v34 = vadd.f32 1e-05, %v3654_v31 }
0x1164   :  { %v3673_v16 = vmul.f32 %v4870_v11, %v3672_v32 }
0x1165   :  { %4871 = vrsqrt.f32 %v3661_v24  ;;  %vm3684_vm15 = vweird.f32 %v3661_v24  ;;  %vm3694_vm1 = vweird.f32 %v3662_v34 }
0x1166   :  { %4873 = vrsqrt.f32 %v3662_v34  ;;  %v3677_v33 = vsel %vm3676_vm11, %v4870_v11, %v3673_v16 }
0x1167   :  { %v3748_v47 = vmul.f32 %v3677_v33, %v7169_v50 }
0x1169   :  { %v3639_v41 = vpop.xlane.xlu2 %3638  ;;  %v3757_v30 = vmul.f32 %v7224_v4, %v3748_v47 }
0x116a   :  { %v3655_v54 = vmul.f32 %v3639_v41, %v5907_v14 }
0x116b   :  { %v4872_v53 = vpop.eup %4871  ;;  %v7235_v28 = vadd.f32 %v7230_v37, %v3757_v30 }
0x116c   :  { %v4874_v55 = vpop.eup %4873  ;;  %v3679_v38 = vmul.f32 %v4872_v53, %v3661_v24  ;;  %v3663_v17 = vadd.f32 1e-05, %v3655_v54  ;;  %vm3685_vm12 = vweird.f32 %v4872_v53 }
0x116d   :  { %v3689_v13 = vmul.f32 %v4874_v55, %v3662_v34  ;;  %v3776_v50 = vsel %vm229_vm2, %v7235_v28, 0.0  ;;  %vm3695_vm13 = vweird.f32 %v4874_v55  ;;  %vm3686_vm0 = vmor %vm3684_vm15, %vm3685_vm12 }
0x116e   :  { %v3680_v45 = vmul.f32 %v4872_v53, %v3679_v38  ;;  %4875 = vrsqrt.f32 %v3663_v17  ;;  %3777 = vadd.xlane.f32.xlu0 %v3776_v50  ;;  %vm3696_vm3 = vmor %vm3694_vm1, %vm3695_vm13  ;;  %vm3704_vm5 = vweird.f32 %v3663_v17 }
0x116f   :  { %v3690_v20 = vmul.f32 %v4874_v55, %v3689_v13 }
0x1170   :  { %v3681_v21 = vmul.f32 0.5, %v3680_v45 }
0x1171   :  { %v3691_v42 = vmul.f32 0.5, %v3690_v20 }
0x1172   :  { %v3642_v40 = vpop.xlane.xlu1 %3641  ;;  %v3682_v59 = vsub.f32 1.5, %v3681_v21 }
0x1173   :  { %v3656_v7 = vmul.f32 %v3642_v40, %v5907_v14  ;;  %v3692_v35 = vsub.f32 1.5, %v3691_v42 }
0x1174   :  { %v4876_v12 = vpop.eup %4875  ;;  %v3683_v19 = vmul.f32 %v4872_v53, %v3682_v59 }
0x1175   :  { %v3664_v2 = vadd.f32 1e-05, %v3656_v7  ;;  %v3693_v22 = vmul.f32 %v4874_v55, %v3692_v35  ;;  %v3699_v51 = vmul.f32 %v4876_v12, %v3663_v17  ;;  %vm3705_vm4 = vweird.f32 %v4876_v12 }
0x1176   :  { %v3687_v0 = vsel %vm3686_vm0, %v4872_v53, %v3683_v19  ;;  %vm3706_vm6 = vmor %vm3704_vm5, %vm3705_vm4 }
0x1177   :  { %4877 = vrsqrt.f32 %v3664_v2  ;;  %v3700_v63 = vmul.f32 %v4876_v12, %v3699_v51  ;;  %v3749_v46 = vmul.f32 %v3687_v0, %v7176_v26  ;;  %v3697_v61 = vsel %vm3696_vm3, %v4874_v55, %v3693_v22 }
0x1178   :  { %v3750_v23 = vmul.f32 %v3697_v61, %v7180_v1  ;;  %vm3714_vm8 = vweird.f32 %v3664_v2 }
0x1179   :  { %v3701_v60 = vmul.f32 0.5, %v3700_v63  ;;  %v3758_v57 = vmul.f32 %v7224_v4, %v3749_v46 }
0x117a   :  { %v3645_v25 = vpop.xlane.xlu0 %3644  ;;  %v3759_v56 = vmul.f32 %v7224_v4, %v3750_v23 }
0x117b   :  { %v3657_v36 = vmul.f32 %v3645_v25, %v5907_v14  ;;  %v3702_v18 = vsub.f32 1.5, %v3701_v60  ;;  %v7246_v3 = vadd.f32 %v7230_v37, %v3758_v57 }
0x117c   :  { %v7249_v26 = vadd.f32 %v7230_v37, %v3759_v56 }
0x117d   :  { %v4878_v39 = vpop.eup %4877  ;;  %v3665_v52 = vadd.f32 1e-05, %v3657_v36  ;;  %v3703_v43 = vmul.f32 %v4876_v12, %v3702_v18  ;;  %v3779_v11 = vsel %vm229_vm2, %v7246_v3, 0.0 }
0x117e   :  { %v3709_v1 = vmul.f32 %v4878_v39, %v3664_v2  ;;  %3780 = vadd.xlane.f32.xlu1 %v3779_v11  ;;  %v3782_v6 = vsel %vm229_vm2, %v7249_v26, 0.0  ;;  %vm3715_vm7 = vweird.f32 %v4878_v39 }
0x117f   :  { %4879 = vrsqrt.f32 %v3665_v52  ;;  %3783 = vadd.xlane.f32.xlu2 %v3782_v6  ;;  %v3707_v49 = vsel %vm3706_vm6, %v4876_v12, %v3703_v43  ;;  %vm3716_vm9 = vmor %vm3714_vm8, %vm3715_vm7  ;;  %vm3724_vm10 = vweird.f32 %v3665_v52 }
0x1180   :  { %v3710_v58 = vmul.f32 %v4878_v39, %v3709_v1  ;;  %v3751_v10 = vmul.f32 %v3707_v49, %v7189_v29 }
0x1182   :  { %v3711_v62 = vmul.f32 0.5, %v3710_v58  ;;  %v3648_v8 = vpop.xlane.xlu2 %3647  ;;  %v3760_v44 = vmul.f32 %v7224_v4, %v3751_v10 }
0x1183   :  { %v3658_v5 = vmul.f32 %v3648_v8, %v5907_v14 }
0x1184   :  { %v3712_v31 = vsub.f32 1.5, %v3711_v62  ;;  %v7259_v34 = vadd.f32 %v7230_v37, %v3760_v44 }
0x1185   :  { %v4880_v32 = vpop.eup %4879  ;;  %v3666_v24 = vadd.f32 1e-05, %v3658_v5 }
0x1186   :  { %v3713_v16 = vmul.f32 %v4878_v39, %v3712_v31  ;;  %v3719_v33 = vmul.f32 %v4880_v32, %v3665_v52  ;;  %v3785_v29 = vsel %vm229_vm2, %v7259_v34, 0.0  ;;  %vm3725_vm14 = vweird.f32 %v4880_v32 }
0x1187   :  { %4881 = vrsqrt.f32 %v3666_v24  ;;  %3786 = vadd.xlane.f32.xlu1 %v3785_v29  ;;  %vm3726_vm11 = vmor %vm3724_vm10, %vm3725_vm14  ;;  %vm3734_vm13 = vweird.f32 %v3666_v24 }
0x1188   :  { %v3720_v47 = vmul.f32 %v4880_v32, %v3719_v33  ;;  %v3717_v41 = vsel %vm3716_vm9, %v4878_v39, %v3713_v16 }
0x1189   :  { %v3752_v30 = vmul.f32 %v3717_v41, %v7195_v9 }
0x118a   :  { %v3721_v54 = vmul.f32 0.5, %v3720_v47 }
0x118b   :  { %v3761_v53 = vmul.f32 %v7224_v4, %v3752_v30 }
0x118c   :  { %v3722_v55 = vsub.f32 1.5, %v3721_v54 }
0x118d   :  { %v4882_v38 = vpop.eup %4881  ;;  %v7266_v17 = vadd.f32 %v7230_v37, %v3761_v53 }
0x118e   :  { %v3723_v13 = vmul.f32 %v4880_v32, %v3722_v55  ;;  %v3729_v50 = vmul.f32 %v4882_v38, %v3666_v24  ;;  %vm3735_vm12 = vweird.f32 %v4882_v38 }
0x118f   :  { %v3788_v45 = vsel %vm229_vm2, %v7266_v17, 0.0  ;;  %vm3736_vm15 = vmor %vm3734_vm13, %vm3735_vm12 }
0x1190   :  { %v3730_v20 = vmul.f32 %v4882_v38, %v3729_v50  ;;  %3789 = vadd.xlane.f32.xlu0 %v3788_v45  ;;  %v3727_v21 = vsel %vm3726_vm11, %v4880_v32, %v3723_v13 }
0x1191   :  { %v3753_v9 = vmul.f32 %v3727_v21, %v7201_v27  ;;  %v3972_v21 = vld [vmem:[#allocation4 + $0x10] sm:$0xff] }
0x1192   :  { %v3731_v42 = vmul.f32 0.5, %v3730_v20  ;;  %v3973_v20 = vld [vmem:[#allocation4 + $0x18] sm:$0xff] }
0x1193   :  { %v3762_v40 = vmul.f32 %v7224_v4, %v3753_v9  ;;  %4017 = vmatpush.msra.mxu2 %v3973_v20  ;;  %v3971_v9 = vld [vmem:[#allocation4 + $0x8] sm:$0xff] }
0x1194   :  { %v3732_v59 = vsub.f32 1.5, %v3731_v42  ;;  %v3970_v42 = vld [vmem:[#allocation4] sm:$0xff] }
0x1195   :  { %v7273_v7 = vadd.f32 %v7230_v37, %v3762_v40  ;;  %4018 = vmatpush.msra.mxu2 %v3972_v21 }
0x1196   :  { %v3733_v35 = vmul.f32 %v4882_v38, %v3732_v59 }
0x1197   :  { %v3791_v12 = vsel %vm229_vm2, %v7273_v7, 0.0  ;;  %4019 = vmatpush.msra.mxu2 %v3971_v9  ;;  %v4115_v9 = vld [vmem:[#allocation4 + $0xb0] sm:$0xff] }
0x1198   :  { %3792 = vadd.xlane.f32.xlu2 %v3791_v12  ;;  %v3737_v19 = vsel %vm3736_vm15, %v4882_v38, %v3733_v35  ;;  %v3978_v35 = vld [vmem:[#allocation4 + $0x38] sm:$0xff] }
0x1199   :  { %v3754_v2 = vmul.f32 %v3737_v19, %v7207_v15  ;;  %4020 = vmatpush.msra.mxu2 %v3970_v42  ;;  %v4029_v12 = vld [vmem:[#allocation4 + $0x58] sm:$0xff]  ;;  %3994 = vmatpush.msra.mxu1 %v3978_v35 }
0x119a   :  { %4045 = vmatpush.msra.mxu3 %v4029_v12 }
0x119b   :  { %v3763_v27 = vmul.f32 %v7224_v4, %v3754_v2 }
0x119d   :  { %v3772_v22 = vadd.f32 %v7230_v37, %v3763_v27  ;;  %v3977_v27 = vld [vmem:[#allocation4 + $0x30] sm:$0xff] }
0x119e   :  { %3995 = vmatpush.msra.mxu1 %v3977_v27 }
0x119f   :  { %v3794_v51 = vsel %vm229_vm2, %v3772_v22, 0.0 }
0x11a0   :  { %3795 = vadd.xlane.f32.xlu1 %v3794_v51 }
0x11d3   :  { %v3651_v0 = vpop.xlane.xlu1 %3650 }
0x11d4   :  { %v3659_v63 = vmul.f32 %v3651_v0, %v5907_v14 }
0x11d6   :  { %v3667_v46 = vadd.f32 1e-05, %v3659_v63  ;;  %v3976_v63 = vld [vmem:[#allocation4 + $0x28] sm:$0xff] }
0x11d7   :  { %3996 = vmatpush.msra.mxu1 %v3976_v63 }
0x11d8   :  { %4883 = vrsqrt.f32 %v3667_v46  ;;  %vm3744_vm1 = vweird.f32 %v3667_v46 }
0x11de   :  { %v4884_v61 = vpop.eup %4883 }
0x11df   :  { %v3739_v23 = vmul.f32 %v4884_v61, %v3667_v46  ;;  %vm3745_vm0 = vweird.f32 %v4884_v61  ;;  %v4027_v46 = vld [vmem:[#allocation4 + $0x48] sm:$0xff] }
0x11e0   :  { %vm3746_vm3 = vmor %vm3744_vm1, %vm3745_vm0 }
0x11e1   :  { %v3740_v60 = vmul.f32 %v4884_v61, %v3739_v23  ;;  %v3778_v25 = vpop.xlane.xlu0 %3777 }
0x11e2   :  { %v3800_v57 = vmul.f32 %v3778_v25, %v5907_v14  ;;  %v4026_v25 = vld [vmem:[#allocation4 + $0x40] sm:$0xff] }
0x11e3   :  { %v3741_v36 = vmul.f32 0.5, %v3740_v60  ;;  %v3975_v60 = vld [vmem:[#allocation4 + $0x20] sm:$0xff] }
0x11e4   :  { %v7284_v15 = vsub.f32 %v7235_v28, %v3800_v57  ;;  %3997 = vmatpush.msra.mxu1 %v3975_v60 }
0x11e5   :  { %v3742_v56 = vsub.f32 1.5, %v3741_v36 }
0x11e6   :  { %v3816_v18 = vmul.f32 %v7284_v15, %v7284_v15 }
0x11e7   :  { %v3743_v39 = vmul.f32 %v4884_v61, %v3742_v56  ;;  %v4058_v56 = vld [vmem:[#allocation4 + $0x78] sm:$0xff] }
0x11e8   :  { %v3824_v52 = vsel %vm229_vm2, %v3816_v18, 0.0  ;;  %4074 = vmatpush.msrb.mxu1 %v4058_v56 }
0x11e9   :  { %3825 = vadd.xlane.f32.xlu2 %v3824_v52  ;;  %v3747_v43 = vsel %vm3746_vm3, %v4884_v61, %v3743_v39 }
0x11ea   :  { %v3755_v1 = vmul.f32 %v3747_v43, %v7214_v48 }
0x11ec   :  { %v3764_v11 = vmul.f32 %v7224_v4, %v3755_v1  ;;  %v4057_v1 = vld [vmem:[#allocation4 + $0x70] sm:$0xff] }
0x11ed   :  { %4075 = vmatpush.msrb.mxu1 %v4057_v1 }
0x11ee   :  { %v3773_v6 = vadd.f32 %v7230_v37, %v3764_v11 }
0x11f0   :  { %v3797_v28 = vsel %vm229_vm2, %v3773_v6, 0.0 }
0x11f1   :  { %3798 = vadd.xlane.f32.xlu0 %v3797_v28  ;;  %v3781_v58 = vpop.xlane.xlu1 %3780 }
0x11f2   :  { %v3784_v49 = vpop.xlane.xlu2 %3783  ;;  %v3801_v10 = vmul.f32 %v3781_v58, %v5907_v14  ;;  %v4056_v58 = vld [vmem:[#allocation4 + $0x68] sm:$0xff] }
0x11f3   :  { %v3802_v62 = vmul.f32 %v3784_v49, %v5907_v14  ;;  %4076 = vmatpush.msrb.mxu1 %v4056_v58 }
0x11f4   :  { %v7296_v8 = vsub.f32 %v7246_v3, %v3801_v10 }
0x11f5   :  { %v7299_v5 = vsub.f32 %v7249_v26, %v3802_v62  ;;  %v7346_v62 = vld [vmem:[%s7401_s5 + $0x14] ss:$0 sm:$0xff] }
0x11f6   :  { %v3817_v48 = vmul.f32 %v7296_v8, %v7296_v8 }
0x11f7   :  { %v3818_v4 = vmul.f32 %v7299_v5, %v7299_v5 }
0x11f8   :  { %v3827_v37 = vsel %vm229_vm2, %v3817_v48, 0.0  ;;  %v4055_v48 = vld [vmem:[#allocation4 + $0x60] sm:$0xff] }
0x11f9   :  { %v3830_v44 = vsel %vm229_vm2, %v3818_v4, 0.0  ;;  %3828 = vadd.xlane.f32.xlu0 %v3827_v37  ;;  %4077 = vmatpush.msrb.mxu1 %v4055_v48  ;;  %v7351_v37 = vld [vmem:[%s7401_s5 + $0x15] ss:$0 sm:$0xff] }
0x11fa   :  { %3831 = vadd.xlane.f32.xlu1 %v3830_v44  ;;  %v3787_v31 = vpop.xlane.xlu1 %3786 }
0x11fb   :  { %v3803_v32 = vmul.f32 %v3787_v31, %v5907_v14  ;;  %v4087_v31 = vld [vmem:[#allocation4 + $0x98] sm:$0xff] }
0x11fc   :  { %4103 = vmatpush.msrb.mxu2 %v4087_v31 }
0x11fd   :  { %v7309_v3 = vsub.f32 %v7259_v34, %v3803_v32 }
0x11ff   :  { %v3819_v26 = vmul.f32 %v7309_v3, %v7309_v3 }
0x1201   :  { %v3833_v24 = vsel %vm229_vm2, %v3819_v26, 0.0 }
0x1202   :  { %3834 = vadd.xlane.f32.xlu0 %v3833_v24  ;;  %v4086_v24 = vld [vmem:[#allocation4 + $0x90] sm:$0xff] }
0x1203   :  { %v3790_v16 = vpop.xlane.xlu0 %3789  ;;  %4104 = vmatpush.msrb.mxu2 %v4086_v24 }
0x1204   :  { %v3804_v33 = vmul.f32 %v3790_v16, %v5907_v14 }
0x1206   :  { %v7316_v29 = vsub.f32 %v7266_v17, %v3804_v33 }
0x1208   :  { %v3820_v47 = vmul.f32 %v7316_v29, %v7316_v29 }
0x120a   :  { %v3836_v41 = vsel %vm229_vm2, %v3820_v47, 0.0 }
0x120b   :  { %v3793_v30 = vpop.xlane.xlu2 %3792  ;;  %3837 = vadd.xlane.f32.xlu2 %v3836_v41  ;;  %v4085_v41 = vld [vmem:[#allocation4 + $0x88] sm:$0xff] }
0x120c   :  { %v3805_v34 = vmul.f32 %v3793_v30, %v5907_v14  ;;  %4105 = vmatpush.msrb.mxu2 %v4085_v41 }
0x120e   :  { %v7323_v54 = vsub.f32 %v7273_v7, %v3805_v34 }
0x1210   :  { %v3821_v53 = vmul.f32 %v7323_v54, %v7323_v54 }
0x1212   :  { %v3839_v55 = vsel %vm229_vm2, %v3821_v53, 0.0 }
0x1213   :  { %3840 = vadd.xlane.f32.xlu1 %v3839_v55  ;;  %v3796_v38 = vpop.xlane.xlu1 %3795 }
0x1214   :  { %v3806_v17 = vmul.f32 %v3796_v38, %v5907_v14 }
0x1216   :  { %v7329_v13 = vsub.f32 %v3772_v22, %v3806_v17  ;;  %v4028_v22 = vld [vmem:[#allocation4 + $0x50] sm:$0xff] }
0x1217   :  { %4046 = vmatpush.msra.mxu3 %v4028_v22  ;;  %v4113_v22 = vld [vmem:[#allocation4 + $0xa0] sm:$0xff] }
0x1218   :  { %v3822_v50 = vmul.f32 %v7329_v13, %v7329_v13 }
0x1219   :  { %4047 = vmatpush.msra.mxu3 %v4027_v46 }
0x121a   :  { %v3842_v45 = vsel %vm229_vm2, %v3822_v50, 0.0  ;;  %v4116_v50 = vld [vmem:[#allocation4 + $0xb8] sm:$0xff] }
0x121b   :  { %3843 = vadd.xlane.f32.xlu0 %v3842_v45  ;;  %4048 = vmatpush.msra.mxu3 %v4026_v25 }
0x121d   :  { %4132 = vmatpush.msrb.mxu3 %v4116_v50 }
0x121f   :  { %4133 = vmatpush.msrb.mxu3 %v4115_v9 }
0x125c   :  { %v3826_v40 = vpop.xlane.xlu2 %3825 }
0x125d   :  { %v3848_v59 = vmul.f32 %v3826_v40, %v5907_v14 }
0x125f   :  { %v3856_v7 = vadd.f32 1e-05, %v3848_v59 }
0x1261   :  { %4885 = vrsqrt.f32 %v3856_v7  ;;  %vm3870_vm5 = vweird.f32 %v3856_v7 }
0x1264   :  { %v3799_v19 = vpop.xlane.xlu0 %3798 }
0x1265   :  { %v3807_v2 = vmul.f32 %v3799_v19, %v5907_v14 }
0x1267   :  { %v4886_v51 = vpop.eup %4885  ;;  %v7336_v0 = vsub.f32 %v3773_v6, %v3807_v2 }
0x1268   :  { %v3865_v61 = vmul.f32 %v4886_v51, %v3856_v7  ;;  %vm3871_vm4 = vweird.f32 %v4886_v51  ;;  %v4114_v7 = vld [vmem:[#allocation4 + $0xa8] sm:$0xff] }
0x1269   :  { %v3823_v23 = vmul.f32 %v7336_v0, %v7336_v0  ;;  %vm3872_vm6 = vmor %vm3870_vm5, %vm3871_vm4  ;;  %4134 = vmatpush.msrb.mxu3 %v4114_v7 }
0x126a   :  { %v3866_v57 = vmul.f32 %v4886_v51, %v3865_v61 }
0x126b   :  { %v3845_v36 = vsel %vm229_vm2, %v3823_v23, 0.0  ;;  %4135 = vmatpush.msrb.mxu3 %v4113_v22  ;;  %v4172_v22 = vld [vmem:[#allocation4 + $0xe8] sm:$0xff] }
0x126c   :  { %v3867_v18 = vmul.f32 0.5, %v3866_v57  ;;  %3846 = vadd.xlane.f32.xlu2 %v3845_v36  ;;  %v3829_v39 = vpop.xlane.xlu0 %3828 }
0x126d   :  { %v3849_v52 = vmul.f32 %v3829_v39, %v5907_v14  ;;  %v3832_v43 = vpop.xlane.xlu1 %3831 }
0x126e   :  { %v3868_v11 = vsub.f32 1.5, %v3867_v18  ;;  %v3850_v6 = vmul.f32 %v3832_v43, %v5907_v14 }
0x126f   :  { %v3857_v28 = vadd.f32 1e-05, %v3849_v52  ;;  %v4145_v52 = vld [vmem:[#allocation4 + $0xd8] sm:$0xff] }
0x1270   :  { %v3869_v49 = vmul.f32 %v4886_v51, %v3868_v11  ;;  %v3858_v10 = vadd.f32 1e-05, %v3850_v6  ;;  %v4144_v6 = vld [vmem:[#allocation4 + $0xd0] sm:$0xff] }
0x1271   :  { %4887 = vrsqrt.f32 %v3857_v28  ;;  %vm3880_vm9 = vweird.f32 %v3857_v28 }
0x1272   :  { %v3873_v4 = vsel %vm3872_vm6, %v4886_v51, %v3869_v49  ;;  %4889 = vrsqrt.f32 %v3858_v10  ;;  %vm3890_vm10 = vweird.f32 %v3858_v10  ;;  %v4143_v49 = vld [vmem:[#allocation4 + $0xc8] sm:$0xff] }
0x1273   :  { %v3944_v44 = vmul.f32 %v3873_v4, %v7284_v15  ;;  %v4084_v15 = vld [vmem:[#allocation4 + $0x80] sm:$0xff] }
0x1274   :  { %4106 = vmatpush.msrb.mxu2 %v4084_v15 }
0x1275   :  { %v3953_v32 = vmul.f32 %v7346_v62, %v3944_v44  ;;  %v3835_v26 = vpop.xlane.xlu0 %3834  ;;  %v4142_v44 = vld [vmem:[#allocation4 + $0xc0] sm:$0xff] }
0x1276   :  { %v3851_v16 = vmul.f32 %v3835_v26, %v5907_v14 }
0x1277   :  { %v4888_v33 = vpop.eup %4887  ;;  %v3962_v47 = vadd.f32 %v7351_v37, %v3953_v32 }
0x1278   :  { %v4890_v30 = vpop.eup %4889  ;;  %v3875_v34 = vmul.f32 %v4888_v33, %v3857_v28  ;;  %v3859_v53 = vadd.f32 1e-05, %v3851_v16  ;;  %vm3881_vm7 = vweird.f32 %v4888_v33 }
0x1279   :  { %v3885_v55 = vmul.f32 %v4890_v30, %v3858_v10  ;;  %4523 = vmatmul.msk.f32.vlgmr.msra.gmra.mxu2 %vm229_vm2, %v3962_v47  ;;  %vm3891_vm8 = vweird.f32 %v4890_v30  ;;  %vm3882_vm14 = vmor %vm3880_vm9, %vm3881_vm7 }
0x127a   :  { %v3876_v38 = vmul.f32 %v4888_v33, %v3875_v34  ;;  %4891 = vrsqrt.f32 %v3859_v53  ;;  %vm3892_vm11 = vmor %vm3890_vm10, %vm3891_vm8  ;;  %vm3900_vm13 = vweird.f32 %v3859_v53 }
0x127b   :  { %v3886_v17 = vmul.f32 %v4890_v30, %v3885_v55 }
0x127c   :  { %v3877_v45 = vmul.f32 0.5, %v3876_v38 }
0x127d   :  { %v3887_v20 = vmul.f32 0.5, %v3886_v17 }
0x127e   :  { %v3838_v21 = vpop.xlane.xlu2 %3837  ;;  %v3878_v42 = vsub.f32 1.5, %v3877_v45 }
0x127f   :  { %v3852_v40 = vmul.f32 %v3838_v21, %v5907_v14  ;;  %v3888_v59 = vsub.f32 1.5, %v3887_v20 }
0x1280   :  { %v4892_v35 = vpop.eup %4891  ;;  %v3879_v12 = vmul.f32 %v4888_v33, %v3878_v42 }
0x1281   :  { %v3860_v19 = vadd.f32 1e-05, %v3852_v40  ;;  %v3889_v2 = vmul.f32 %v4890_v30, %v3888_v59  ;;  %v3895_v27 = vmul.f32 %v4892_v35, %v3859_v53  ;;  %vm3901_vm12 = vweird.f32 %v4892_v35 }
0x1282   :  { %v3883_v51 = vsel %vm3882_vm14, %v4888_v33, %v3879_v12  ;;  %vm3902_vm15 = vmor %vm3900_vm13, %vm3901_vm12 }
0x1283   :  { %4893 = vrsqrt.f32 %v3860_v19  ;;  %v3945_v63 = vmul.f32 %v3883_v51, %v7296_v8  ;;  %v3893_v46 = vsel %vm3892_vm11, %v4890_v30, %v3889_v2  ;;  %v3896_v61 = vmul.f32 %v4892_v35, %v3895_v27  ;;  %v4173_v27 = vld [vmem:[#allocation4 + $0xf0] sm:$0xff]  ;;  %v4171_v51 = vld [vmem:[#allocation4 + $0xe0] sm:$0xff] }
0x1284   :  { %v3946_v23 = vmul.f32 %v3893_v46, %v7299_v5  ;;  %vm3910_vm1 = vweird.f32 %v3860_v19 }
0x1285   :  { %v3954_v60 = vmul.f32 %v7346_v62, %v3945_v63  ;;  %v3897_v25 = vmul.f32 0.5, %v3896_v61 }
0x1286   :  { %v3841_v57 = vpop.xlane.xlu1 %3840  ;;  %v3955_v36 = vmul.f32 %v7346_v62, %v3946_v23 }
0x1287   :  { %v3853_v56 = vmul.f32 %v3841_v57, %v5907_v14  ;;  %v3963_v18 = vadd.f32 %v7351_v37, %v3954_v60  ;;  %v3898_v39 = vsub.f32 1.5, %v3897_v25 }
0x1288   :  { %v3964_v8 = vadd.f32 %v7351_v37, %v3955_v36 }
0x1289   :  { %v4894_v43 = vpop.eup %4893  ;;  %v3861_v1 = vadd.f32 1e-05, %v3853_v56  ;;  %v3899_v11 = vmul.f32 %v4892_v35, %v3898_v39  ;;  %4522 = vmatmul.msk.f32.vlgmr.msra.gmra.mxu1 %vm229_vm2, %v3963_v18 }
0x128a   :  { %v3905_v5 = vmul.f32 %v4894_v43, %v3860_v19  ;;  %4524 = vmatmul.msk.f32.vlgmr.msra.gmra.mxu3 %vm229_vm2, %v3964_v8  ;;  %4161 = vmatpush.msra.mxu1 %v4145_v52  ;;  %vm3911_vm0 = vweird.f32 %v4894_v43 }
0x128b   :  { %4895 = vrsqrt.f32 %v3861_v1  ;;  %v3903_v28 = vsel %vm3902_vm15, %v4892_v35, %v3899_v11  ;;  %vm3912_vm3 = vmor %vm3910_vm1, %vm3911_vm0  ;;  %vm3920_vm5 = vweird.f32 %v3861_v1 }
0x128c   :  { %v3906_v58 = vmul.f32 %v4894_v43, %v3905_v5  ;;  %v3947_v10 = vmul.f32 %v3903_v28, %v7309_v3  ;;  %4162 = vmatpush.msra.mxu1 %v4144_v6 }
0x128e   :  { %v3907_v48 = vmul.f32 0.5, %v3906_v58  ;;  %v3844_v4 = vpop.xlane.xlu0 %3843  ;;  %v3956_v31 = vmul.f32 %v7346_v62, %v3947_v10  ;;  %4163 = vmatpush.msra.mxu1 %v4143_v49 }
0x128f   :  { %v3854_v32 = vmul.f32 %v3844_v4, %v5907_v14 }
0x1290   :  { %v3908_v26 = vsub.f32 1.5, %v3907_v48  ;;  %v3965_v16 = vadd.f32 %v7351_v37, %v3956_v31  ;;  %4164 = vmatpush.msra.mxu1 %v4142_v44 }
0x1291   :  { %v4896_v24 = vpop.eup %4895  ;;  %v3862_v33 = vadd.f32 1e-05, %v3854_v32 }
0x1292   :  { %v3909_v47 = vmul.f32 %v4894_v43, %v3908_v26  ;;  %v3915_v41 = vmul.f32 %v4896_v24, %v3861_v1  ;;  %4525 = vmatmul.msk.f32.vlgmr.msrb.gmra.mxu1 %vm229_vm2, %v3965_v16  ;;  %vm3921_vm4 = vweird.f32 %v4896_v24 }
0x1293   :  { %4897 = vrsqrt.f32 %v3862_v33  ;;  %vm3922_vm6 = vmor %vm3920_vm5, %vm3921_vm4  ;;  %vm3930_vm8 = vweird.f32 %v3862_v33 }
0x1294   :  { %v3913_v3 = vsel %vm3912_vm3, %v4894_v43, %v3909_v47  ;;  %v3916_v30 = vmul.f32 %v4896_v24, %v3915_v41 }
0x1295   :  { %v3948_v34 = vmul.f32 %v3913_v3, %v7316_v29 }
0x1296   :  { %v3917_v53 = vmul.f32 0.5, %v3916_v30 }
0x1297   :  { %v3957_v55 = vmul.f32 %v7346_v62, %v3948_v34 }
0x1298   :  { %v3918_v15 = vsub.f32 1.5, %v3917_v53 }
0x1299   :  { %v4898_v38 = vpop.eup %4897  ;;  %v3966_v17 = vadd.f32 %v7351_v37, %v3957_v55 }
0x129a   :  { %v3919_v50 = vmul.f32 %v4896_v24, %v3918_v15  ;;  %v3925_v45 = vmul.f32 %v4898_v38, %v3862_v33  ;;  %vm3931_vm7 = vweird.f32 %v4898_v38 }
0x129b   :  { %4526 = vmatmul.msk.f32.vlgmr.msrb.gmra.mxu2 %vm229_vm2, %v3966_v17  ;;  %vm3932_vm9 = vmor %vm3930_vm8, %vm3931_vm7 }
0x129c   :  { %v3923_v20 = vsel %vm3922_vm6, %v4896_v24, %v3919_v50  ;;  %v3926_v21 = vmul.f32 %v4898_v38, %v3925_v45 }
0x129d   :  { %v3949_v9 = vmul.f32 %v3923_v20, %v7323_v54  ;;  %v4174_v54 = vld [vmem:[#allocation4 + $0xf8] sm:$0xff] }
0x129e   :  { %v3927_v42 = vmul.f32 0.5, %v3926_v21  ;;  %4190 = vmatpush.msra.mxu2 %v4174_v54 }
0x129f   :  { %v3958_v29 = vmul.f32 %v7346_v62, %v3949_v9 }
0x12a0   :  { %v3928_v40 = vsub.f32 1.5, %v3927_v42  ;;  %4191 = vmatpush.msra.mxu2 %v4173_v27 }
0x12a1   :  { %v3967_v59 = vadd.f32 %v7351_v37, %v3958_v29 }
0x12a2   :  { %v3929_v7 = vmul.f32 %v4898_v38, %v3928_v40  ;;  %4192 = vmatpush.msra.mxu2 %v4172_v22 }
0x12a3   :  { %4527 = vmatmul.msk.f32.vlgmr.msrb.gmra.mxu3 %vm229_vm2, %v3967_v59 }
0x12a4   :  { %v3933_v35 = vsel %vm3932_vm9, %v4898_v38, %v3929_v7  ;;  %4193 = vmatpush.msra.mxu2 %v4171_v51 }
0x12a5   :  { %v3950_v12 = vmul.f32 %v3933_v35, %v7329_v13 }
0x12a7   :  { %v3959_v19 = vmul.f32 %v7346_v62, %v3950_v12 }
0x12a9   :  { %v3968_v2 = vadd.f32 %v7351_v37, %v3959_v19 }
0x12ab   :  { %4528 = vmatmul.msk.f32.vlgmr.msra.gmra.mxu1 %vm229_vm2, %v3968_v2 }
0x12df   :  { %v3847_v63 = vpop.xlane.xlu2 %3846 }
0x12e0   :  { %v3855_v46 = vmul.f32 %v3847_v63, %v5907_v14 }
0x12e2   :  { %v3863_v61 = vadd.f32 1e-05, %v3855_v46 }
0x12e4   :  { %4899 = vrsqrt.f32 %v3863_v61  ;;  %vm3940_vm10 = vweird.f32 %v3863_v61 }
0x12ea   :  { %v4900_v13 = vpop.eup %4899 }
0x12eb   :  { %v3935_v23 = vmul.f32 %v4900_v13, %v3863_v61  ;;  %vm3941_vm14 = vweird.f32 %v4900_v13 }
0x12ec   :  { %vm3942_vm11 = vmor %vm3940_vm10, %vm3941_vm14 }
0x12ed   :  { %v3936_v60 = vmul.f32 %v4900_v13, %v3935_v23 }
0x12ef   :  { %v3937_v25 = vmul.f32 0.5, %v3936_v60 }
0x12f1   :  { %v3938_v57 = vsub.f32 1.5, %v3937_v25 }
0x12f3   :  { %v3939_v36 = vmul.f32 %v4900_v13, %v3938_v57 }
0x12f5   :  { %v3943_v56 = vsel %vm3942_vm11, %v4900_v13, %v3939_v36 }
0x12f6   :  { %v3951_v18 = vmul.f32 %v3943_v56, %v7336_v0  ;;  %v4562_v0 = vld [vmem:[%s7401_s5 + $0x16] ss:$0 sm:$0xff] }
0x12f8   :  { %v3960_v39 = vmul.f32 %v7346_v62, %v3951_v18 }
0x12fa   :  { %v3969_v52 = vadd.f32 %v7351_v37, %v3960_v39 }
0x12fc   :  { %4529 = vmatmul.msk.f32.vlgmr.msra.gmra.mxu2 %vm229_vm2, %v3969_v52  ;;  %v4022_v43 = vpop.f32.mrf.mxu2 }
0x1306   :  { %v3999_v14 = vpop.f32.mrf.mxu1 }
0x1307   :  { %v4023_v1 = vadd.f32 %v4022_v43, %v3999_v14 }
0x130d   :  { %v4050_v8 = vpop.f32.mrf.mxu3 }
0x130e   :  { %v4053_v11 = vadd.f32 %v4050_v8, %v4023_v1 }
0x130f   :  { %v4079_v5 = vpop.f32.mrf.mxu1 }
0x1310   :  { %v4082_v28 = vadd.f32 %v4079_v5, %v4053_v11 }
0x131e   :  { %v4108_v6 = vpop.f32.mrf.mxu2 }
0x131f   :  { %v4111_v49 = vadd.f32 %v4108_v6, %v4082_v28 }
0x1326   :  { %v4137_v58 = vpop.f32.mrf.mxu3 }
0x1327   :  { %v4140_v10 = vadd.f32 %v4137_v58, %v4111_v49 }
0x1328   :  { %v4166_v48 = vpop.f32.mrf.mxu1 }
0x1329   :  { %v4169_v4 = vadd.f32 %v4166_v48, %v4140_v10 }
0x137f   :  { %v4195_v62 = vpop.f32.mrf.mxu2 }
0x1380   :  { %v4198_v37 = vadd.f32 %v4195_v62, %v4169_v4 }
0x1382   :  { %v4201_v44 = vadd.f32 %v4562_v0, %v4198_v37 }
0x1384   :  { %4202 = vst [vmem:[%s7403_s7] sm:$0xff] %v4201_v44 }
0x1385   :  { %4207 = vsyncpa [#allocation3], 1 }
0x1386   :  { %4208 = vsyncpa [#allocation5], 1 }

</bundles_post_ra>
